<compile_context>
chip_gen: v7x
topology: tpu7x:2x2x1
jax: 0.10.0
libtpu: 0.0.40
codegen_flags: <defaults>
</compile_context>

<pallas_src>
import jax
import jax.numpy as jnp
from jax.experimental import pallas as pl
from jax.experimental.pallas import tpu as pltpu

# ----------------------- model hyper-parameters -------------------------------
TICKER_DIM = 4
INPUT_DIM = 16                 # per-ticker input dim (divisible by transform_dim)
DATA_POINT_DIM = 5             # deprecated in the module; unused
SHIFT_DIM = 2                  # deprecated in the module; unused
TRANSFORM_DIM = 4
OUTPUT_DIM = 8
CONST_FACTOR = 2               # args.const_factor
BLOCK_DEPTH = 2                # args.block_depth (number of mid blocks)
LINEAR_DIM = 8                 # args.linear_dim (>0 exercises the tanh MLP)

assert OUTPUT_DIM % TICKER_DIM == 0
assert INPUT_DIM % TRANSFORM_DIM == 0

LABEL_DIM = OUTPUT_DIM // TICKER_DIM            # 2
CONV_CH = LABEL_DIM * CONST_FACTOR              # 4   (conv_channel)
K1 = INPUT_DIM // TRANSFORM_DIM                 # 4   (c1 kernel == stride)
SEQ_LEN = INPUT_DIM * TICKER_DIM                # 64  (Conv1d W dimension)
T1 = SEQ_LEN // K1                              # 16  (length after any c1)
T2 = T1 // TRANSFORM_DIM                        # 4   (length after any c2)
assert LABEL_DIM * T2 == OUTPUT_DIM

BATCH = 2
LN_EPS = 1e-5

# Layout of the consolidated (COLS_TOTAL, 1) column tensor that carries every
# LayerNorm gamma/beta and every ConvTranspose bias (all flattened row-major as
# [channel, position]).  All offsets land on multiples of 8 (sublane aligned).
_COL_LAYOUT = [("g_ol1", CONV_CH * T1), ("b_ol1", CONV_CH * T1),
               ("b_oct1", CONV_CH * SEQ_LEN)]
for _d in range(BLOCK_DEPTH):
    _COL_LAYOUT += [(f"g1_{_d}", CONV_CH * T1), (f"b1_{_d}", CONV_CH * T1),
                    (f"g2_{_d}", CONV_CH * T2), (f"b2_{_d}", CONV_CH * T2),
                    (f"bct_{_d}", CONV_CH * SEQ_LEN)]
_COL_OFFSETS = {}
_off = 0
for _name, _size in _COL_LAYOUT:
    _COL_OFFSETS[_name] = (_off, _size)
    _off += _size
COLS_TOTAL = _off

# Per-sample matmul FLOPs of the folded network (for pl.CostEstimate).
_FLOPS_PER_SAMPLE = 2 * (
    64 * 64 + 256 * 64
    + BLOCK_DEPTH * (64 * 256 + 16 * 64 + 32 * 16 + 16 * 32 + 256 * 16)
    + 8 * 256)
_TRANSC_PER_SAMPLE = (1 + 2 * BLOCK_DEPTH)               \
    + BLOCK_DEPTH * (CONV_CH * LINEAR_DIM + CONV_CH * T2) \
    + OUTPUT_DIM                                          # rsqrt + tanh + sigmoid


# ----------------------------- weight folding ---------------------------------
def _fold_conv1d(w, w_in):
    """Strided Conv1d (kernel == stride) as a dense matrix acting on the
    [channel, position] row-major flattened feature vector."""
    c_out, c_in, k = w.shape
    t = w_in // k
    eye = jnp.eye(t, dtype=w.dtype)
    m = jnp.einsum("oik,ts->itkos", w, eye)          # (C_in, T, K, C_out, T)
    return m.reshape(c_in * w_in, c_out * t)


def _fold_conv_transpose1d(w, b, t):
    """ConvTranspose1d (kernel == stride) as a dense matrix + bias row."""
    c_in, c_out, k = w.shape
    eye = jnp.eye(t, dtype=w.dtype)
    m = jnp.einsum("iok,ts->itosk", w, eye)          # (C_in, T, C_out, T, K)
    wmat = m.reshape(c_in * t, c_out * t * k)
    bvec = jnp.repeat(b, t * k).reshape(1, c_out * t * k)
    return wmat, bvec


def _fold_linear_per_channel(w, c):
    """nn.Linear on the last (position) axis of a (B, C, P) tensor as a
    block-diagonal matrix on the flattened [channel, position] vector."""
    return jnp.kron(jnp.eye(c, dtype=w.dtype), w.T)


def _col(a):
    """Flatten a per-feature parameter to a feature-major (F, 1) column."""
    return a.reshape(-1, 1).astype(jnp.float32)


def prepare_kernel_params(p):
    """Fold every conv / conv-transpose / per-position linear into dense,
    pre-transposed (feature-major) matmul operands; fuse the bias-only chains
    (ct2∘ct1 per block, c1∘c2 in the wrapper tail).  Done once, offline."""
    high = jax.lax.Precision.HIGHEST
    c = CONV_CH

    # --- wrapper head: original_c1 / original_l1 / original_ct1 ---
    w_oc1T = _fold_conv1d(p["w_oc1"], SEQ_LEN).T                  # (64, 64)
    w_oct1, b_oct1 = _fold_conv_transpose1d(p["w_oct1"], p["b_oct1"], T1)
    w_oct1T = w_oct1.T                                            # (256, 64)

    cols = {"g_ol1": _col(p["g_ol1"]),
            "b_ol1": _col(p["b_ol1"]),
            "b_oct1": _col(b_oct1)}

    # --- mid blocks ---
    wc1T, wc2T, wl1T, wl2T, wctT = [], [], [], [], []
    for d, blk in enumerate(p["blocks"]):
        wc1T.append(_fold_conv1d(blk["w_c1"], SEQ_LEN).T)         # (64, 256)
        wc2T.append(_fold_conv1d(blk["w_c2"], T1).T)              # (16, 64)
        wl1T.append(_fold_linear_per_channel(blk["w_lin1"], c).T) # (32, 16)
        wl2T.append(_fold_linear_per_channel(blk["w_lin2"], c).T) # (16, 32)
        # Fuse ct2 ∘ ct1 (no nonlinearity between them).
        w_ct2, b_ct2 = _fold_conv_transpose1d(blk["w_ct2"], blk["b_ct2"], T2)
        w_ct1, b_ct1 = _fold_conv_transpose1d(blk["w_ct1"], blk["b_ct1"], T1)
        w_ct = jnp.matmul(w_ct2, w_ct1, precision=high)           # (16, 256)
        b_ct = jnp.matmul(b_ct2, w_ct1, precision=high) + b_ct1   # (1, 256)
        wctT.append(w_ct.T)                                       # (256, 16)
        cols[f"g1_{d}"] = _col(blk["g_l1"])
        cols[f"b1_{d}"] = _col(blk["b_l1"])
        cols[f"g2_{d}"] = _col(blk["g_l2"])
        cols[f"b2_{d}"] = _col(blk["b_l2"])
        cols[f"bct_{d}"] = _col(b_ct)

    # --- wrapper tail: c1 ∘ c2 fused (no nonlinearity between them) ---
    w_c1f = _fold_conv1d(p["w_c1"], SEQ_LEN)                      # (256, 64)
    w_c2f = _fold_conv1d(p["w_c2"], T1)                           # (64, 8)
    w_tailT = jnp.matmul(w_c1f, w_c2f, precision=high).T          # (8, 256)

    # --- consolidated column tensor ---
    parts = []
    for name, size in _COL_LAYOUT:
        a = cols[name]
        assert a.shape == (size, 1), (name, a.shape, size)
        parts.append(a)
    cols_cat = jnp.concatenate(parts, axis=0)                     # (COLS_TOTAL, 1)

    return (cols_cat, w_oc1T, w_oct1T,
            jnp.stack(wc1T), jnp.stack(wc2T),
            jnp.stack(wl1T), jnp.stack(wl2T),
            jnp.stack(wctT), w_tailT)


# ------------------------------ Pallas kernel ---------------------------------
def conv_block_wrapper_kernel(
        x_ref,                       # (64, TB)           feature-major input
        cols_ref,                    # (COLS_TOTAL, 1)    all gammas/betas/biases
        w_oc1_ref,                   # (64, 64)
        w_oct1_ref,                  # (256, 64)
        blk_wc1_ref,                 # (D, 64, 256)
        blk_wc2_ref,                 # (D, 16, 64)
        blk_wl1_ref,                 # (D, 32, 16)
        blk_wl2_ref,                 # (D, 16, 32)
        blk_wct_ref,                 # (D, 256, 16)       fused ct2∘ct1
        w_tail_ref,                  # (8, 256)           fused c1∘c2
        o_ref):                      # (8, TB)
    mm = lambda w, h: jnp.dot(w, h, preferred_element_type=jnp.float32)

    def col(name):
        off, size = _COL_OFFSETS[name]                   # static Python ints
        return cols_ref[pl.ds(off, size), :]             # (size, 1) column

    def ln(h, g, b):
        # LayerNorm jointly over the whole flattened (C, W) feature axis
        # (axis 0 here); lanes carry independent batch samples.
        mu = jnp.mean(h, axis=0, keepdims=True)
        xc = h - mu
        var = jnp.mean(xc * xc, axis=0, keepdims=True)
        return xc * jax.lax.rsqrt(var + LN_EPS) * g + b

    x = x_ref[...]                                        # (64, TB)

    # original_c1 -> original_l1 -> relu -> original_ct1
    h = mm(w_oc1_ref[...], x)                             # (64, TB)
    h = jnp.maximum(ln(h, col("g_ol1"), col("b_ol1")), 0.0)
    h = mm(w_oct1_ref[...], h) + col("b_oct1")            # (256, TB)

    # mid_blocks: Sequential of ConvBlockTransposedNew (statically unrolled)
    for d in range(BLOCK_DEPTH):
        res = h
        t = mm(blk_wc1_ref[d], h)                         # (64, TB)
        t = jnp.maximum(ln(t, col(f"g1_{d}"), col(f"b1_{d}")), 0.0)
        t = mm(blk_wc2_ref[d], t)                         # (16, TB)
        t = jnp.maximum(ln(t, col(f"g2_{d}"), col(f"b2_{d}")), 0.0)
        if LINEAR_DIM > 0:
            t = jnp.tanh(mm(blk_wl1_ref[d], t))           # (32, TB)
            t = jnp.tanh(mm(blk_wl2_ref[d], t))           # (16, TB)
        # fused ct2∘ct1 + residual
        h = mm(blk_wct_ref[d], t) + col(f"bct_{d}") + res  # (256, TB)

    # fused wrapper c1∘c2 -> sigmoid  (lane-dense (8, TB) store)
    o_ref[...] = jax.nn.sigmoid(mm(w_tail_ref[...], h))


# -------------------------------- wrapper --------------------------------------
def _pick_batch_tile(b):
    # Small batches: one block whose shape equals the full array (always legal).
    if b < 256:
        return b
    # Lane-dense tiles (multiples of 128) with at least two grid blocks so the
    # "parallel" batch axis shards across v7x's two TensorCores; cap at 1024 so
    # live activations stay small even under v7x's 64 MiB VMEM.
    tb = min(1024, (b // 2 // 128) * 128)
    return max(128, tb)


def conv_block_wrapper_forward(x, folded):
    b = x.shape[0]
    tb = _pick_batch_tile(b)
    n_blocks = -(-b // tb)                                # ceil-div (no assert)
    b_pad = n_blocks * tb

    x_t = x.T                                             # (64, B): batch on lanes
    if b_pad != b:
        x_t = jnp.pad(x_t, ((0, 0), (0, b_pad - b)))

    def const_spec(a):
        nd = a.ndim
        return pl.BlockSpec(a.shape, lambda i, _nd=nd: (0,) * _nd)  # VMEM-resident

    in_specs = [pl.BlockSpec((SEQ_LEN, tb), lambda i: (0, i))]
    in_specs += [const_spec(a) for a in folded]

    weight_bytes = sum(int(a.size) for a in folded) * 4
    cost = pl.CostEstimate(
        flops=_FLOPS_PER_SAMPLE * b_pad,
        transcendentals=_TRANSC_PER_SAMPLE * b_pad,
        bytes_accessed=4 * b_pad * (SEQ_LEN + OUTPUT_DIM) + weight_bytes)

    y = pl.pallas_call(
        conv_block_wrapper_kernel,
        out_shape=jax.ShapeDtypeStruct((OUTPUT_DIM, b_pad), jnp.float32),
        grid=(n_blocks,),
        in_specs=in_specs,
        out_specs=pl.BlockSpec((OUTPUT_DIM, tb), lambda i: (0, i)),
        compiler_params=pltpu.CompilerParams(
            dimension_semantics=("parallel",),
            vmem_limit_bytes=48 * 1024 * 1024),
        cost_estimate=cost,
    )(x_t, *folded)

    return y[:, :b].T                                     # back to (B, OUTPUT_DIM)


# ---------------------------- pure-JAX reference --------------------------------
def conv_block_wrapper_ref(x, p):
    HIGH = jax.lax.Precision.HIGHEST

    def conv1d(h, w, stride):
        return jax.lax.conv_general_dilated(
            h, w, (stride,), "VALID",
            dimension_numbers=("NCH", "OIH", "NCH"), precision=HIGH)

    def conv_transpose1d(h, w, b):
        # PyTorch ConvTranspose1d with kernel_size == stride == K.
        bsz, _, t = h.shape
        c_out, k = w.shape[1], w.shape[2]
        y = jnp.einsum("bct,cok->botk", h, w, precision=HIGH)
        return y.reshape(bsz, c_out, t * k) + b[None, :, None]

    def layer_norm(h, g, b):
        mu = jnp.mean(h, axis=(-2, -1), keepdims=True)
        var = jnp.mean((h - mu) ** 2, axis=(-2, -1), keepdims=True)
        return (h - mu) * jax.lax.rsqrt(var + LN_EPS) * g[None] + b[None]

    h = x[:, None, :]                                               # (B, 1, L)
    h = conv1d(h, p["w_oc1"], K1)                                   # (B, C, T1)
    h = jax.nn.relu(layer_norm(h, p["g_ol1"], p["b_ol1"]))
    h = conv_transpose1d(h, p["w_oct1"], p["b_oct1"])               # (B, C, L)

    for blk in p["blocks"]:
        res = h
        t = conv1d(h, blk["w_c1"], K1)                              # (B, C, T1)
        t = jax.nn.relu(layer_norm(t, blk["g_l1"], blk["b_l1"]))
        t = conv1d(t, blk["w_c2"], TRANSFORM_DIM)                   # (B, C, T2)
        t = jax.nn.relu(layer_norm(t, blk["g_l2"], blk["b_l2"]))
        if LINEAR_DIM > 0:
            t = jnp.tanh(jnp.einsum("bct,ot->bco", t, blk["w_lin1"], precision=HIGH))
            t = jnp.tanh(jnp.einsum("bco,jo->bcj", t, blk["w_lin2"], precision=HIGH))
        t = conv_transpose1d(t, blk["w_ct2"], blk["b_ct2"])         # (B, C, T1)
        t = conv_transpose1d(t, blk["w_ct1"], blk["b_ct1"])         # (B, C, L)
        h = t + res

    h = conv1d(h, p["w_c1"], K1)                                    # (B, C, T1)
    h = conv1d(h, p["w_c2"], TRANSFORM_DIM)                         # (B, label, T2)
    return jax.nn.sigmoid(h.reshape(-1, OUTPUT_DIM))


# ----------------------------- parameter init ----------------------------------
def init_params(key):
    c, ld = CONV_CH, LINEAR_DIM
    keys = iter(jax.random.split(key, 64))
    nrm = lambda shape, s: jax.random.normal(next(keys), shape, jnp.float32) * s

    def block_params():
        return {
            "w_c1": nrm((c, c, K1), 0.3),
            "g_l1": 1.0 + nrm((c, T1), 0.1), "b_l1": nrm((c, T1), 0.1),
            "w_c2": nrm((c, c, TRANSFORM_DIM), 0.3),
            "g_l2": 1.0 + nrm((c, T2), 0.1), "b_l2": nrm((c, T2), 0.1),
            "w_lin1": nrm((ld, T2), 0.3), "w_lin2": nrm((T2, ld), 0.3),
            "w_ct2": nrm((c, c, TRANSFORM_DIM), 0.3), "b_ct2": nrm((c,), 0.1),
            "w_ct1": nrm((c, c, K1), 0.3), "b_ct1": nrm((c,), 0.1),
        }

    return {
        "w_oc1": nrm((c, 1, K1), 0.4),
        "g_ol1": 1.0 + nrm((c, T1), 0.1), "b_ol1": nrm((c, T1), 0.1),
        "w_oct1": nrm((c, c, K1), 0.3), "b_oct1": nrm((c,), 0.1),
        "blocks": [block_params() for _ in range(BLOCK_DEPTH)],
        "w_c1": nrm((c, c, K1), 0.2),
        "w_c2": nrm((LABEL_DIM, c, TRANSFORM_DIM), 0.2),
    }


# ----------------------------------- main ---------------------------------------
if __name__ == "__main__":
    key = jax.random.PRNGKey(0)
    pkey, xkey = jax.random.split(key)
    params = init_params(pkey)
    folded = prepare_kernel_params(params)          # fold + fuse once, offline
    x = jax.random.normal(xkey, (BATCH, SEQ_LEN), jnp.float32)

    y_kernel = jax.block_until_ready(conv_block_wrapper_forward(x, folded))
    y_ref = jax.block_until_ready(conv_block_wrapper_ref(x, params))

    assert y_kernel.shape == (BATCH, OUTPUT_DIM)
    assert bool(jnp.isfinite(y_kernel).all())
    assert jnp.allclose(y_kernel, y_ref, atol=1e-4, rtol=1e-4), (y_kernel, y_ref)
    print("KERNEL_OK")
</pallas_src>

<mosaic_0001>
module attributes {stable_mosaic.version = 11 : i64} {
  func.func @conv_block_wrapper_kernel(%arg0: i32, %arg1: memref<64x2xf32, #tpu.memory_space<vmem>>, %arg2: memref<1216x1xf32, #tpu.memory_space<vmem>>, %arg3: memref<64x64xf32, #tpu.memory_space<vmem>>, %arg4: memref<256x64xf32, #tpu.memory_space<vmem>>, %arg5: memref<2x64x256xf32, #tpu.memory_space<vmem>>, %arg6: memref<2x16x64xf32, #tpu.memory_space<vmem>>, %arg7: memref<2x32x16xf32, #tpu.memory_space<vmem>>, %arg8: memref<2x16x32xf32, #tpu.memory_space<vmem>>, %arg9: memref<2x256x16xf32, #tpu.memory_space<vmem>>, %arg10: memref<8x256xf32, #tpu.memory_space<vmem>>, %arg11: memref<8x2xf32, #tpu.memory_space<vmem>>) attributes {dimension_semantics = [#tpu.dimension_semantics<parallel>], iteration_bounds = array<i64: 1>, scalar_prefetch = 0 : i64, scratch_operands = 0 : i64, tpu.core_type = #tpu.core_type<tc>, window_params = [{transform_indices = @transform_0, window_bounds = array<i64: 64, 2>}, {pipeline_mode = #tpu.pipeline_mode<synchronous>, transform_indices = @transform_1, window_bounds = array<i64: 1216, 1>}, {pipeline_mode = #tpu.pipeline_mode<synchronous>, transform_indices = @transform_2, window_bounds = array<i64: 64, 64>}, {pipeline_mode = #tpu.pipeline_mode<synchronous>, transform_indices = @transform_3, window_bounds = array<i64: 256, 64>}, {pipeline_mode = #tpu.pipeline_mode<synchronous>, transform_indices = @transform_4, window_bounds = array<i64: 2, 64, 256>}, {pipeline_mode = #tpu.pipeline_mode<synchronous>, transform_indices = @transform_5, window_bounds = array<i64: 2, 16, 64>}, {pipeline_mode = #tpu.pipeline_mode<synchronous>, transform_indices = @transform_6, window_bounds = array<i64: 2, 32, 16>}, {pipeline_mode = #tpu.pipeline_mode<synchronous>, transform_indices = @transform_7, window_bounds = array<i64: 2, 16, 32>}, {pipeline_mode = #tpu.pipeline_mode<synchronous>, transform_indices = @transform_8, window_bounds = array<i64: 2, 256, 16>}, {pipeline_mode = #tpu.pipeline_mode<synchronous>, transform_indices = @transform_9, window_bounds = array<i64: 8, 256>}, {transform_indices = @transform_10, window_bounds = array<i64: 8, 2>}]} {
    %c0 = arith.constant 0 : index
    %c0_0 = arith.constant 0 : index
    %0 = vector.load %arg1[%c0, %c0_0] : memref<64x2xf32, #tpu.memory_space<vmem>>, vector<64x2xf32>
    %c0_1 = arith.constant 0 : index
    %c0_2 = arith.constant 0 : index
    %1 = vector.load %arg3[%c0_1, %c0_2] : memref<64x64xf32, #tpu.memory_space<vmem>>, vector<64x64xf32>
    %cst = arith.constant dense<0.000000e+00> : vector<64x2xf32>
    %2 = tpu.matmul %1, %0, %cst {dimension_numbers = #tpu.dot_dimension_numbers<[1], [0], [0], [1], [0, 0, 1, 1], [], []>} : vector<64x64xf32>, vector<64x2xf32>, vector<64x2xf32> -> vector<64x2xf32>
    %c0_3 = arith.constant 0 : index
    %c0_4 = arith.constant 0 : index
    %3 = vector.load %arg2[%c0_3, %c0_4] : memref<1216x1xf32, #tpu.memory_space<vmem>>, vector<64x1xf32>
    %c64 = arith.constant 64 : index
    %c0_5 = arith.constant 0 : index
    %4 = vector.load %arg2[%c64, %c0_5] : memref<1216x1xf32, #tpu.memory_space<vmem>>, vector<64x1xf32>
    %cst_6 = arith.constant dense<0.000000e+00> : vector<2xf32>
    %5 = vector.multi_reduction <add>, %2, %cst_6 [0] : vector<64x2xf32> to vector<2xf32>
    %6 = vector.shape_cast %5 : vector<2xf32> to vector<1x2xf32>
    %cst_7 = arith.constant 6.400000e+01 : f32
    %7 = vector.broadcast %cst_7 : f32 to vector<1x2xf32>
    %8 = arith.divf %6, %7 : vector<1x2xf32>
    %9 = vector.broadcast %8 : vector<1x2xf32> to vector<64x2xf32>
    %10 = arith.subf %2, %9 : vector<64x2xf32>
    %11 = arith.mulf %10, %10 : vector<64x2xf32>
    %cst_8 = arith.constant dense<0.000000e+00> : vector<2xf32>
    %12 = vector.multi_reduction <add>, %11, %cst_8 [0] : vector<64x2xf32> to vector<2xf32>
    %13 = vector.shape_cast %12 : vector<2xf32> to vector<1x2xf32>
    %cst_9 = arith.constant 6.400000e+01 : f32
    %14 = vector.broadcast %cst_9 : f32 to vector<1x2xf32>
    %15 = arith.divf %13, %14 : vector<1x2xf32>
    %cst_10 = arith.constant 9.99999974E-6 : f32
    %16 = vector.broadcast %cst_10 : f32 to vector<1x2xf32>
    %17 = arith.addf %15, %16 : vector<1x2xf32>
    %18 = math.rsqrt %17 : vector<1x2xf32>
    %19 = vector.broadcast %18 : vector<1x2xf32> to vector<64x2xf32>
    %20 = arith.mulf %10, %19 : vector<64x2xf32>
    %21 = vector.broadcast %3 : vector<64x1xf32> to vector<64x2xf32>
    %22 = arith.mulf %20, %21 : vector<64x2xf32>
    %23 = vector.broadcast %4 : vector<64x1xf32> to vector<64x2xf32>
    %24 = arith.addf %22, %23 : vector<64x2xf32>
    %cst_11 = arith.constant 0.000000e+00 : f32
    %25 = vector.broadcast %cst_11 : f32 to vector<64x2xf32>
    %26 = arith.maximumf %24, %25 : vector<64x2xf32>
    %c0_12 = arith.constant 0 : index
    %c0_13 = arith.constant 0 : index
    %27 = vector.load %arg4[%c0_12, %c0_13] : memref<256x64xf32, #tpu.memory_space<vmem>>, vector<256x64xf32>
    %cst_14 = arith.constant dense<0.000000e+00> : vector<256x2xf32>
    %28 = tpu.matmul %27, %26, %cst_14 {dimension_numbers = #tpu.dot_dimension_numbers<[1], [0], [0], [1], [0, 0, 1, 1], [], []>} : vector<256x64xf32>, vector<64x2xf32>, vector<256x2xf32> -> vector<256x2xf32>
    %c128 = arith.constant 128 : index
    %c0_15 = arith.constant 0 : index
    %29 = vector.load %arg2[%c128, %c0_15] : memref<1216x1xf32, #tpu.memory_space<vmem>>, vector<256x1xf32>
    %30 = vector.broadcast %29 : vector<256x1xf32> to vector<256x2xf32>
    %31 = arith.addf %28, %30 : vector<256x2xf32>
    %c0_16 = arith.constant 0 : index
    %c0_17 = arith.constant 0 : index
    %c0_18 = arith.constant 0 : index
    %32 = vector.load %arg5[%c0_16, %c0_17, %c0_18] : memref<2x64x256xf32, #tpu.memory_space<vmem>>, vector<1x64x256xf32>
    %33 = vector.shape_cast %32 : vector<1x64x256xf32> to vector<64x256xf32>
    %cst_19 = arith.constant dense<0.000000e+00> : vector<64x2xf32>
    %34 = tpu.matmul %33, %31, %cst_19 {dimension_numbers = #tpu.dot_dimension_numbers<[1], [0], [0], [1], [0, 0, 1, 1], [], []>} : vector<64x256xf32>, vector<256x2xf32>, vector<64x2xf32> -> vector<64x2xf32>
    %c384 = arith.constant 384 : index
    %c0_20 = arith.constant 0 : index
    %35 = vector.load %arg2[%c384, %c0_20] : memref<1216x1xf32, #tpu.memory_space<vmem>>, vector<64x1xf32>
    %c448 = arith.constant 448 : index
    %c0_21 = arith.constant 0 : index
    %36 = vector.load %arg2[%c448, %c0_21] : memref<1216x1xf32, #tpu.memory_space<vmem>>, vector<64x1xf32>
    %cst_22 = arith.constant dense<0.000000e+00> : vector<2xf32>
    %37 = vector.multi_reduction <add>, %34, %cst_22 [0] : vector<64x2xf32> to vector<2xf32>
    %38 = vector.shape_cast %37 : vector<2xf32> to vector<1x2xf32>
    %cst_23 = arith.constant 6.400000e+01 : f32
    %39 = vector.broadcast %cst_23 : f32 to vector<1x2xf32>
    %40 = arith.divf %38, %39 : vector<1x2xf32>
    %41 = vector.broadcast %40 : vector<1x2xf32> to vector<64x2xf32>
    %42 = arith.subf %34, %41 : vector<64x2xf32>
    %43 = arith.mulf %42, %42 : vector<64x2xf32>
    %cst_24 = arith.constant dense<0.000000e+00> : vector<2xf32>
    %44 = vector.multi_reduction <add>, %43, %cst_24 [0] : vector<64x2xf32> to vector<2xf32>
    %45 = vector.shape_cast %44 : vector<2xf32> to vector<1x2xf32>
    %cst_25 = arith.constant 6.400000e+01 : f32
    %46 = vector.broadcast %cst_25 : f32 to vector<1x2xf32>
    %47 = arith.divf %45, %46 : vector<1x2xf32>
    %cst_26 = arith.constant 9.99999974E-6 : f32
    %48 = vector.broadcast %cst_26 : f32 to vector<1x2xf32>
    %49 = arith.addf %47, %48 : vector<1x2xf32>
    %50 = math.rsqrt %49 : vector<1x2xf32>
    %51 = vector.broadcast %50 : vector<1x2xf32> to vector<64x2xf32>
    %52 = arith.mulf %42, %51 : vector<64x2xf32>
    %53 = vector.broadcast %35 : vector<64x1xf32> to vector<64x2xf32>
    %54 = arith.mulf %52, %53 : vector<64x2xf32>
    %55 = vector.broadcast %36 : vector<64x1xf32> to vector<64x2xf32>
    %56 = arith.addf %54, %55 : vector<64x2xf32>
    %cst_27 = arith.constant 0.000000e+00 : f32
    %57 = vector.broadcast %cst_27 : f32 to vector<64x2xf32>
    %58 = arith.maximumf %56, %57 : vector<64x2xf32>
    %c0_28 = arith.constant 0 : index
    %c0_29 = arith.constant 0 : index
    %c0_30 = arith.constant 0 : index
    %59 = vector.load %arg6[%c0_28, %c0_29, %c0_30] : memref<2x16x64xf32, #tpu.memory_space<vmem>>, vector<1x16x64xf32>
    %60 = vector.shape_cast %59 : vector<1x16x64xf32> to vector<16x64xf32>
    %cst_31 = arith.constant dense<0.000000e+00> : vector<16x2xf32>
    %61 = tpu.matmul %60, %58, %cst_31 {dimension_numbers = #tpu.dot_dimension_numbers<[1], [0], [0], [1], [0, 0, 1, 1], [], []>} : vector<16x64xf32>, vector<64x2xf32>, vector<16x2xf32> -> vector<16x2xf32>
    %c512 = arith.constant 512 : index
    %c0_32 = arith.constant 0 : index
    %62 = vector.load %arg2[%c512, %c0_32] : memref<1216x1xf32, #tpu.memory_space<vmem>>, vector<16x1xf32>
    %c528 = arith.constant 528 : index
    %c0_33 = arith.constant 0 : index
    %63 = vector.load %arg2[%c528, %c0_33] : memref<1216x1xf32, #tpu.memory_space<vmem>>, vector<16x1xf32>
    %cst_34 = arith.constant dense<0.000000e+00> : vector<2xf32>
    %64 = vector.multi_reduction <add>, %61, %cst_34 [0] : vector<16x2xf32> to vector<2xf32>
    %65 = vector.shape_cast %64 : vector<2xf32> to vector<1x2xf32>
    %cst_35 = arith.constant 1.600000e+01 : f32
    %66 = vector.broadcast %cst_35 : f32 to vector<1x2xf32>
    %67 = arith.divf %65, %66 : vector<1x2xf32>
    %68 = vector.broadcast %67 : vector<1x2xf32> to vector<16x2xf32>
    %69 = arith.subf %61, %68 : vector<16x2xf32>
    %70 = arith.mulf %69, %69 : vector<16x2xf32>
    %cst_36 = arith.constant dense<0.000000e+00> : vector<2xf32>
    %71 = vector.multi_reduction <add>, %70, %cst_36 [0] : vector<16x2xf32> to vector<2xf32>
    %72 = vector.shape_cast %71 : vector<2xf32> to vector<1x2xf32>
    %cst_37 = arith.constant 1.600000e+01 : f32
    %73 = vector.broadcast %cst_37 : f32 to vector<1x2xf32>
    %74 = arith.divf %72, %73 : vector<1x2xf32>
    %cst_38 = arith.constant 9.99999974E-6 : f32
    %75 = vector.broadcast %cst_38 : f32 to vector<1x2xf32>
    %76 = arith.addf %74, %75 : vector<1x2xf32>
    %77 = math.rsqrt %76 : vector<1x2xf32>
    %78 = vector.broadcast %77 : vector<1x2xf32> to vector<16x2xf32>
    %79 = arith.mulf %69, %78 : vector<16x2xf32>
    %80 = vector.broadcast %62 : vector<16x1xf32> to vector<16x2xf32>
    %81 = arith.mulf %79, %80 : vector<16x2xf32>
    %82 = vector.broadcast %63 : vector<16x1xf32> to vector<16x2xf32>
    %83 = arith.addf %81, %82 : vector<16x2xf32>
    %cst_39 = arith.constant 0.000000e+00 : f32
    %84 = vector.broadcast %cst_39 : f32 to vector<16x2xf32>
    %85 = arith.maximumf %83, %84 : vector<16x2xf32>
    %c0_40 = arith.constant 0 : index
    %c0_41 = arith.constant 0 : index
    %c0_42 = arith.constant 0 : index
    %86 = vector.load %arg7[%c0_40, %c0_41, %c0_42] : memref<2x32x16xf32, #tpu.memory_space<vmem>>, vector<1x32x16xf32>
    %87 = vector.shape_cast %86 : vector<1x32x16xf32> to vector<32x16xf32>
    %cst_43 = arith.constant dense<0.000000e+00> : vector<32x2xf32>
    %88 = tpu.matmul %87, %85, %cst_43 {dimension_numbers = #tpu.dot_dimension_numbers<[1], [0], [0], [1], [0, 0, 1, 1], [], []>} : vector<32x16xf32>, vector<16x2xf32>, vector<32x2xf32> -> vector<32x2xf32>
    %89 = math.tanh %88 : vector<32x2xf32>
    %c0_44 = arith.constant 0 : index
    %c0_45 = arith.constant 0 : index
    %c0_46 = arith.constant 0 : index
    %90 = vector.load %arg8[%c0_44, %c0_45, %c0_46] : memref<2x16x32xf32, #tpu.memory_space<vmem>>, vector<1x16x32xf32>
    %91 = vector.shape_cast %90 : vector<1x16x32xf32> to vector<16x32xf32>
    %cst_47 = arith.constant dense<0.000000e+00> : vector<16x2xf32>
    %92 = tpu.matmul %91, %89, %cst_47 {dimension_numbers = #tpu.dot_dimension_numbers<[1], [0], [0], [1], [0, 0, 1, 1], [], []>} : vector<16x32xf32>, vector<32x2xf32>, vector<16x2xf32> -> vector<16x2xf32>
    %93 = math.tanh %92 : vector<16x2xf32>
    %c0_48 = arith.constant 0 : index
    %c0_49 = arith.constant 0 : index
    %c0_50 = arith.constant 0 : index
    %94 = vector.load %arg9[%c0_48, %c0_49, %c0_50] : memref<2x256x16xf32, #tpu.memory_space<vmem>>, vector<1x256x16xf32>
    %95 = vector.shape_cast %94 : vector<1x256x16xf32> to vector<256x16xf32>
    %cst_51 = arith.constant dense<0.000000e+00> : vector<256x2xf32>
    %96 = tpu.matmul %95, %93, %cst_51 {dimension_numbers = #tpu.dot_dimension_numbers<[1], [0], [0], [1], [0, 0, 1, 1], [], []>} : vector<256x16xf32>, vector<16x2xf32>, vector<256x2xf32> -> vector<256x2xf32>
    %c544 = arith.constant 544 : index
    %c0_52 = arith.constant 0 : index
    %97 = vector.load %arg2[%c544, %c0_52] : memref<1216x1xf32, #tpu.memory_space<vmem>>, vector<256x1xf32>
    %98 = vector.broadcast %97 : vector<256x1xf32> to vector<256x2xf32>
    %99 = arith.addf %96, %98 : vector<256x2xf32>
    %100 = arith.addf %99, %31 : vector<256x2xf32>
    %c1 = arith.constant 1 : index
    %c0_53 = arith.constant 0 : index
    %c0_54 = arith.constant 0 : index
    %101 = vector.load %arg5[%c1, %c0_53, %c0_54] : memref<2x64x256xf32, #tpu.memory_space<vmem>>, vector<1x64x256xf32>
    %102 = vector.shape_cast %101 : vector<1x64x256xf32> to vector<64x256xf32>
    %cst_55 = arith.constant dense<0.000000e+00> : vector<64x2xf32>
    %103 = tpu.matmul %102, %100, %cst_55 {dimension_numbers = #tpu.dot_dimension_numbers<[1], [0], [0], [1], [0, 0, 1, 1], [], []>} : vector<64x256xf32>, vector<256x2xf32>, vector<64x2xf32> -> vector<64x2xf32>
    %c800 = arith.constant 800 : index
    %c0_56 = arith.constant 0 : index
    %104 = vector.load %arg2[%c800, %c0_56] : memref<1216x1xf32, #tpu.memory_space<vmem>>, vector<64x1xf32>
    %c864 = arith.constant 864 : index
    %c0_57 = arith.constant 0 : index
    %105 = vector.load %arg2[%c864, %c0_57] : memref<1216x1xf32, #tpu.memory_space<vmem>>, vector<64x1xf32>
    %cst_58 = arith.constant dense<0.000000e+00> : vector<2xf32>
    %106 = vector.multi_reduction <add>, %103, %cst_58 [0] : vector<64x2xf32> to vector<2xf32>
    %107 = vector.shape_cast %106 : vector<2xf32> to vector<1x2xf32>
    %cst_59 = arith.constant 6.400000e+01 : f32
    %108 = vector.broadcast %cst_59 : f32 to vector<1x2xf32>
    %109 = arith.divf %107, %108 : vector<1x2xf32>
    %110 = vector.broadcast %109 : vector<1x2xf32> to vector<64x2xf32>
    %111 = arith.subf %103, %110 : vector<64x2xf32>
    %112 = arith.mulf %111, %111 : vector<64x2xf32>
    %cst_60 = arith.constant dense<0.000000e+00> : vector<2xf32>
    %113 = vector.multi_reduction <add>, %112, %cst_60 [0] : vector<64x2xf32> to vector<2xf32>
    %114 = vector.shape_cast %113 : vector<2xf32> to vector<1x2xf32>
    %cst_61 = arith.constant 6.400000e+01 : f32
    %115 = vector.broadcast %cst_61 : f32 to vector<1x2xf32>
    %116 = arith.divf %114, %115 : vector<1x2xf32>
    %cst_62 = arith.constant 9.99999974E-6 : f32
    %117 = vector.broadcast %cst_62 : f32 to vector<1x2xf32>
    %118 = arith.addf %116, %117 : vector<1x2xf32>
    %119 = math.rsqrt %118 : vector<1x2xf32>
    %120 = vector.broadcast %119 : vector<1x2xf32> to vector<64x2xf32>
    %121 = arith.mulf %111, %120 : vector<64x2xf32>
    %122 = vector.broadcast %104 : vector<64x1xf32> to vector<64x2xf32>
    %123 = arith.mulf %121, %122 : vector<64x2xf32>
    %124 = vector.broadcast %105 : vector<64x1xf32> to vector<64x2xf32>
    %125 = arith.addf %123, %124 : vector<64x2xf32>
    %cst_63 = arith.constant 0.000000e+00 : f32
    %126 = vector.broadcast %cst_63 : f32 to vector<64x2xf32>
    %127 = arith.maximumf %125, %126 : vector<64x2xf32>
    %c1_64 = arith.constant 1 : index
    %c0_65 = arith.constant 0 : index
    %c0_66 = arith.constant 0 : index
    %128 = vector.load %arg6[%c1_64, %c0_65, %c0_66] : memref<2x16x64xf32, #tpu.memory_space<vmem>>, vector<1x16x64xf32>
    %129 = vector.shape_cast %128 : vector<1x16x64xf32> to vector<16x64xf32>
    %cst_67 = arith.constant dense<0.000000e+00> : vector<16x2xf32>
    %130 = tpu.matmul %129, %127, %cst_67 {dimension_numbers = #tpu.dot_dimension_numbers<[1], [0], [0], [1], [0, 0, 1, 1], [], []>} : vector<16x64xf32>, vector<64x2xf32>, vector<16x2xf32> -> vector<16x2xf32>
    %c928 = arith.constant 928 : index
    %c0_68 = arith.constant 0 : index
    %131 = vector.load %arg2[%c928, %c0_68] : memref<1216x1xf32, #tpu.memory_space<vmem>>, vector<16x1xf32>
    %c944 = arith.constant 944 : index
    %c0_69 = arith.constant 0 : index
    %132 = vector.load %arg2[%c944, %c0_69] : memref<1216x1xf32, #tpu.memory_space<vmem>>, vector<16x1xf32>
    %cst_70 = arith.constant dense<0.000000e+00> : vector<2xf32>
    %133 = vector.multi_reduction <add>, %130, %cst_70 [0] : vector<16x2xf32> to vector<2xf32>
    %134 = vector.shape_cast %133 : vector<2xf32> to vector<1x2xf32>
    %cst_71 = arith.constant 1.600000e+01 : f32
    %135 = vector.broadcast %cst_71 : f32 to vector<1x2xf32>
    %136 = arith.divf %134, %135 : vector<1x2xf32>
    %137 = vector.broadcast %136 : vector<1x2xf32> to vector<16x2xf32>
    %138 = arith.subf %130, %137 : vector<16x2xf32>
    %139 = arith.mulf %138, %138 : vector<16x2xf32>
    %cst_72 = arith.constant dense<0.000000e+00> : vector<2xf32>
    %140 = vector.multi_reduction <add>, %139, %cst_72 [0] : vector<16x2xf32> to vector<2xf32>
    %141 = vector.shape_cast %140 : vector<2xf32> to vector<1x2xf32>
    %cst_73 = arith.constant 1.600000e+01 : f32
    %142 = vector.broadcast %cst_73 : f32 to vector<1x2xf32>
    %143 = arith.divf %141, %142 : vector<1x2xf32>
    %cst_74 = arith.constant 9.99999974E-6 : f32
    %144 = vector.broadcast %cst_74 : f32 to vector<1x2xf32>
    %145 = arith.addf %143, %144 : vector<1x2xf32>
    %146 = math.rsqrt %145 : vector<1x2xf32>
    %147 = vector.broadcast %146 : vector<1x2xf32> to vector<16x2xf32>
    %148 = arith.mulf %138, %147 : vector<16x2xf32>
    %149 = vector.broadcast %131 : vector<16x1xf32> to vector<16x2xf32>
    %150 = arith.mulf %148, %149 : vector<16x2xf32>
    %151 = vector.broadcast %132 : vector<16x1xf32> to vector<16x2xf32>
    %152 = arith.addf %150, %151 : vector<16x2xf32>
    %cst_75 = arith.constant 0.000000e+00 : f32
    %153 = vector.broadcast %cst_75 : f32 to vector<16x2xf32>
    %154 = arith.maximumf %152, %153 : vector<16x2xf32>
    %c1_76 = arith.constant 1 : index
    %c0_77 = arith.constant 0 : index
    %c0_78 = arith.constant 0 : index
    %155 = vector.load %arg7[%c1_76, %c0_77, %c0_78] : memref<2x32x16xf32, #tpu.memory_space<vmem>>, vector<1x32x16xf32>
    %156 = vector.shape_cast %155 : vector<1x32x16xf32> to vector<32x16xf32>
    %cst_79 = arith.constant dense<0.000000e+00> : vector<32x2xf32>
    %157 = tpu.matmul %156, %154, %cst_79 {dimension_numbers = #tpu.dot_dimension_numbers<[1], [0], [0], [1], [0, 0, 1, 1], [], []>} : vector<32x16xf32>, vector<16x2xf32>, vector<32x2xf32> -> vector<32x2xf32>
    %158 = math.tanh %157 : vector<32x2xf32>
    %c1_80 = arith.constant 1 : index
    %c0_81 = arith.constant 0 : index
    %c0_82 = arith.constant 0 : index
    %159 = vector.load %arg8[%c1_80, %c0_81, %c0_82] : memref<2x16x32xf32, #tpu.memory_space<vmem>>, vector<1x16x32xf32>
    %160 = vector.shape_cast %159 : vector<1x16x32xf32> to vector<16x32xf32>
    %cst_83 = arith.constant dense<0.000000e+00> : vector<16x2xf32>
    %161 = tpu.matmul %160, %158, %cst_83 {dimension_numbers = #tpu.dot_dimension_numbers<[1], [0], [0], [1], [0, 0, 1, 1], [], []>} : vector<16x32xf32>, vector<32x2xf32>, vector<16x2xf32> -> vector<16x2xf32>
    %162 = math.tanh %161 : vector<16x2xf32>
    %c1_84 = arith.constant 1 : index
    %c0_85 = arith.constant 0 : index
    %c0_86 = arith.constant 0 : index
    %163 = vector.load %arg9[%c1_84, %c0_85, %c0_86] : memref<2x256x16xf32, #tpu.memory_space<vmem>>, vector<1x256x16xf32>
    %164 = vector.shape_cast %163 : vector<1x256x16xf32> to vector<256x16xf32>
    %cst_87 = arith.constant dense<0.000000e+00> : vector<256x2xf32>
    %165 = tpu.matmul %164, %162, %cst_87 {dimension_numbers = #tpu.dot_dimension_numbers<[1], [0], [0], [1], [0, 0, 1, 1], [], []>} : vector<256x16xf32>, vector<16x2xf32>, vector<256x2xf32> -> vector<256x2xf32>
    %c960 = arith.constant 960 : index
    %c0_88 = arith.constant 0 : index
    %166 = vector.load %arg2[%c960, %c0_88] : memref<1216x1xf32, #tpu.memory_space<vmem>>, vector<256x1xf32>
    %167 = vector.broadcast %166 : vector<256x1xf32> to vector<256x2xf32>
    %168 = arith.addf %165, %167 : vector<256x2xf32>
    %169 = arith.addf %168, %100 : vector<256x2xf32>
    %c0_89 = arith.constant 0 : index
    %c0_90 = arith.constant 0 : index
    %170 = vector.load %arg10[%c0_89, %c0_90] : memref<8x256xf32, #tpu.memory_space<vmem>>, vector<8x256xf32>
    %cst_91 = arith.constant dense<0.000000e+00> : vector<8x2xf32>
    %171 = tpu.matmul %170, %169, %cst_91 {dimension_numbers = #tpu.dot_dimension_numbers<[1], [0], [0], [1], [0, 0, 1, 1], [], []>} : vector<8x256xf32>, vector<256x2xf32>, vector<8x2xf32> -> vector<8x2xf32>
    %172 = arith.negf %171 : vector<8x2xf32>
    %173 = math.exp %172 : vector<8x2xf32>
    %cst_92 = arith.constant 1.000000e+00 : f32
    %174 = vector.broadcast %cst_92 : f32 to vector<8x2xf32>
    %175 = arith.addf %174, %173 : vector<8x2xf32>
    %176 = arith.divf %174, %175 : vector<8x2xf32>
    %c0_93 = arith.constant 0 : index
    %c0_94 = arith.constant 0 : index
    %177 = vector.load %arg11[%c0_93, %c0_94] : memref<8x2xf32, #tpu.memory_space<vmem>>, vector<8x2xf32>
    tpu.vector_store %arg11[%c0_93, %c0_94], %176 {strides = array<i32>} : memref<8x2xf32, #tpu.memory_space<vmem>>, vector<8x2xf32>,
    return
  }
  func.func @transform_0(%arg0: i32) -> (i32, i32) {
    %c0_i32 = arith.constant 0 : i32
    %c0_i32_0 = arith.constant 0 : i32
    return %c0_i32, %arg0 : i32, i32
  }
  func.func @transform_1(%arg0: i32) -> (i32, i32) {
    %c0_i32 = arith.constant 0 : i32
    %c0_i32_0 = arith.constant 0 : i32
    %c0_i32_1 = arith.constant 0 : i32
    return %c0_i32, %c0_i32_0 : i32, i32
  }
  func.func @transform_2(%arg0: i32) -> (i32, i32) {
    %c0_i32 = arith.constant 0 : i32
    %c0_i32_0 = arith.constant 0 : i32
    %c0_i32_1 = arith.constant 0 : i32
    return %c0_i32, %c0_i32_0 : i32, i32
  }
  func.func @transform_3(%arg0: i32) -> (i32, i32) {
    %c0_i32 = arith.constant 0 : i32
    %c0_i32_0 = arith.constant 0 : i32
    %c0_i32_1 = arith.constant 0 : i32
    return %c0_i32, %c0_i32_0 : i32, i32
  }
  func.func @transform_4(%arg0: i32) -> (i32, i32, i32) {
    %c0_i32 = arith.constant 0 : i32
    %c0_i32_0 = arith.constant 0 : i32
    %c0_i32_1 = arith.constant 0 : i32
    %c0_i32_2 = arith.constant 0 : i32
    return %c0_i32, %c0_i32_0, %c0_i32_1 : i32, i32, i32
  }
  func.func @transform_5(%arg0: i32) -> (i32, i32, i32) {
    %c0_i32 = arith.constant 0 : i32
    %c0_i32_0 = arith.constant 0 : i32
    %c0_i32_1 = arith.constant 0 : i32
    %c0_i32_2 = arith.constant 0 : i32
    return %c0_i32, %c0_i32_0, %c0_i32_1 : i32, i32, i32
  }
  func.func @transform_6(%arg0: i32) -> (i32, i32, i32) {
    %c0_i32 = arith.constant 0 : i32
    %c0_i32_0 = arith.constant 0 : i32
    %c0_i32_1 = arith.constant 0 : i32
    %c0_i32_2 = arith.constant 0 : i32
    return %c0_i32, %c0_i32_0, %c0_i32_1 : i32, i32, i32
  }
  func.func @transform_7(%arg0: i32) -> (i32, i32, i32) {
    %c0_i32 = arith.constant 0 : i32
    %c0_i32_0 = arith.constant 0 : i32
    %c0_i32_1 = arith.constant 0 : i32
    %c0_i32_2 = arith.constant 0 : i32
    return %c0_i32, %c0_i32_0, %c0_i32_1 : i32, i32, i32
  }
  func.func @transform_8(%arg0: i32) -> (i32, i32, i32) {
    %c0_i32 = arith.constant 0 : i32
    %c0_i32_0 = arith.constant 0 : i32
    %c0_i32_1 = arith.constant 0 : i32
    %c0_i32_2 = arith.constant 0 : i32
    return %c0_i32, %c0_i32_0, %c0_i32_1 : i32, i32, i32
  }
  func.func @transform_9(%arg0: i32) -> (i32, i32) {
    %c0_i32 = arith.constant 0 : i32
    %c0_i32_0 = arith.constant 0 : i32
    %c0_i32_1 = arith.constant 0 : i32
    return %c0_i32, %c0_i32_0 : i32, i32
  }
  func.func @transform_10(%arg0: i32) -> (i32, i32) {
    %c0_i32 = arith.constant 0 : i32
    %c0_i32_0 = arith.constant 0 : i32
    return %c0_i32, %arg0 : i32, i32
  }
}

</mosaic_0001>

<bundles_post_ra>
// kernel: tpu_custom_call.1
= control target key start
LH: loop header
LB: loop body
LE: loop exit
PB: predicated region body
PF: predicated region fallthrough
CT: control target
= control target key end

     0   :  { %v4448_v0 = vmov 0   ;;  %vm51_vm0 = vcmask 523264   ;;  %vm197_vm1 = vcmask 15360   ;;  %vm1375_vm2 = vcmask 130048   ;;  %s6282_s1 = inlined_call_operand.vmem [shape: f32[1216,1], index: 1, kind: input, shape index: {}]   ;;  %s6283_s0 = inlined_call_operand.vmem [shape: f32[64,2], index: 0, kind: input, shape index: {}]   ;;  %s6284_s2 = inlined_call_operand.vmem [shape: f32[64,64], index: 2, kind: input, shape index: {}]   ;;  %s6285_s3 = inlined_call_operand.vmem [shape: f32[256,64], index: 3, kind: input, shape index: {}]   ;;  %s6286_s4 = inlined_call_operand.vmem [shape: f32[2,64,256], index: 4, kind: input, shape index: {}]   ;;  %s6287_s5 = inlined_call_operand.vmem [shape: f32[2,16,64], index: 5, kind: input, shape index: {}]   ;;  %s6288_s6 = inlined_call_operand.vmem [shape: f32[2,32,16], index: 6, kind: input, shape index: {}]   ;;  %s6289_s7 = inlined_call_operand.vmem [shape: f32[2,16,32], index: 7, kind: input, shape index: {}]   ;;  %s6290_s8 = inlined_call_operand.vmem [shape: f32[2,256,16], index: 8, kind: input, shape index: {}]   ;;  %s6291_s9 = inlined_call_operand.vmem [shape: f32[8,256], index: 9, kind: input, shape index: {}]   ;;  %s6292_s10 = inlined_call_operand.vmem [shape: f32[8,2], index: 10, kind: output, shape index: {}]  }
   0x1   :  { %4409 = vset.pattern.permute.xlu1 %v4448_v0  ;;  %4408 = vset.pattern.permute.xlu0 %v4448_v0  ;;  %v189_v1 = vld [vmem:[%s6282_s1 + $0x40] sm:$0xff]  ;;  %v36_v4 = vld [vmem:[%s6283_s0 + $0x8] sm:$0xff]  ;;  %v37_v7 = vld [vmem:[%s6283_s0 + $0x10] sm:$0xff]  ;;  %vm1479_vm3 = vcmask 261120  }
   0x2   :  { %v181_v2 = vld [vmem:[%s6282_s1] sm:$0xff]  ;;  %319 = vperm.xlu1 %4409, %v189_v1   ;;  %v190_v6 = vld [vmem:[%s6282_s1 + $0x48] sm:$0xff]  ;;  %v38_v8 = vld [vmem:[%s6283_s0 + $0x18] sm:$0xff] }
   0x3   :  { %v35_v3 = vld [vmem:[%s6283_s0] sm:$0xff]  ;;  %271 = vperm.xlu0 %4408, %v181_v2   ;;  %v182_v9 = vld [vmem:[%s6282_s1 + $0x8] sm:$0xff]  ;;  %v4219_v10 = vpack.c.bf16 %v38_v8, %v37_v7  ;;  %v184_v13 = vld [vmem:[%s6282_s1 + $0x18] sm:$0xff] }
   0x4   :  { %v4215_v5 = vpack.c.bf16 %v36_v4, %v35_v3  ;;  %v39_v11 = vld [vmem:[%s6283_s0 + $0x20] sm:$0xff]  ;;  %v40_v12 = vld [vmem:[%s6283_s0 + $0x28] sm:$0xff]  ;;  %v183_v16 = vld [vmem:[%s6282_s1 + $0x10] sm:$0xff] }
   0x5   :  { %v4223_v14 = vpack.c.bf16 %v40_v12, %v39_v11  ;;  %v43_v15 = vld [vmem:[%s6284_s2] sm:$0xff]  ;;  %v41_v17 = vld [vmem:[%s6283_s0 + $0x30] sm:$0xff]  ;;  %v42_v18 = vld [vmem:[%s6283_s0 + $0x38] sm:$0xff] }
   0x6   :  { %4216 = vmatprep.subr.bf16.mxu0 %v4215_v5  ;;  %324 = vperm.xlu1 %4409, %v190_v6   ;;  %v192_v19 = vld [vmem:[%s6282_s1 + $0x58] sm:$0xff]  ;;  %v4227_v20 = vpack.c.bf16 %v42_v18, %v41_v17  ;;  %v191_v21 = vld [vmem:[%s6282_s1 + $0x50] sm:$0xff]  ;;  %v186_v22 = vld [vmem:[%s6282_s1 + $0x28] sm:$0xff] }
   0x7   :  { %4218 = vmatpush3.bf16.msra.mxu0 %v4215_v5  ;;  %276 = vperm.xlu0 %4408, %v182_v9   ;;  %v185_v23 = vld [vmem:[%s6282_s1 + $0x20] sm:$0xff]  ;;  %v44_v24 = vld [vmem:[%s6284_s2 + $0x8] sm:$0xff]  ;;  %v45_v26 = vld [vmem:[%s6284_s2 + $0x10] sm:$0xff] }
   0x8   :  { %4220 = vmatprep.subr.bf16.mxu0 %v4219_v10  ;;  %3955 = vmatprep.mubr.msk.f32.mxu0 %vm51_vm0, %v43_v15  ;;  %v194_v25 = vld [vmem:[%s6282_s1 + $0x68] sm:$0xff]  ;;  %v193_v27 = vld [vmem:[%s6282_s1 + $0x60] sm:$0xff]  ;;  %v46_v28 = vld [vmem:[%s6284_s2 + $0x18] sm:$0xff] }
   0x9   :  { %v188_v29 = vld [vmem:[%s6282_s1 + $0x38] sm:$0xff]  ;;  %v47_v30 = vld [vmem:[%s6284_s2 + $0x20] sm:$0xff]  ;;  %v187_v31 = vld [vmem:[%s6282_s1 + $0x30] sm:$0xff] }
   0xa   :  { %286 = vperm.xlu1 %4409, %v184_v13   ;;  %v48_v32 = vld [vmem:[%s6284_s2 + $0x28] sm:$0xff]  ;;  %v196_v33 = vld [vmem:[%s6282_s1 + $0x78] sm:$0xff]  ;;  %v49_v34 = vld [vmem:[%s6284_s2 + $0x30] sm:$0xff] }
   0xb   :  { %4222 = vmatpush3.bf16.msra.mxu0 %v4219_v10  ;;  %281 = vperm.xlu0 %4408, %v183_v16   ;;  %v195_v35 = vld [vmem:[%s6282_s1 + $0x70] sm:$0xff]  ;;  %v50_v36 = vld [vmem:[%s6284_s2 + $0x38] sm:$0xff]  ;;  %v422_v37 = vld [vmem:[%s6282_s1 + $0x108] sm:$0xff] }
   0xc   :  { %4224 = vmatprep.subr.bf16.mxu0 %v4223_v14  ;;  %v421_v38 = vld [vmem:[%s6282_s1 + $0x100] sm:$0xff]  ;;  %v406_v39 = vld [vmem:[%s6282_s1 + $0x88] sm:$0xff]  ;;  %v424_v41 = vld [vmem:[%s6282_s1 + $0x118] sm:$0xff] }
   0xd   :  { %v405_v40 = vld [vmem:[%s6282_s1 + $0x80] sm:$0xff]  ;;  %v423_v42 = vld [vmem:[%s6282_s1 + $0x110] sm:$0xff]  ;;  %v408_v43 = vld [vmem:[%s6282_s1 + $0x98] sm:$0xff] }
   0xe   :  { %334 = vperm.xlu1 %4409, %v192_v19   ;;  %v407_v44 = vld [vmem:[%s6282_s1 + $0x90] sm:$0xff]  ;;  %v426_v45 = vld [vmem:[%s6282_s1 + $0x128] sm:$0xff]  ;;  %v425_v46 = vld [vmem:[%s6282_s1 + $0x120] sm:$0xff] }
   0xf   :  { %4226 = vmatpush3.bf16.msra.mxu0 %v4223_v14  ;;  %329 = vperm.xlu0 %4408, %v191_v21   ;;  %v410_v47 = vld [vmem:[%s6282_s1 + $0xa8] sm:$0xff]  ;;  %v409_v48 = vld [vmem:[%s6282_s1 + $0xa0] sm:$0xff]  ;;  %v428_v49 = vld [vmem:[%s6282_s1 + $0x138] sm:$0xff] }
  0x10   :  { %4228 = vmatprep.subr.bf16.mxu0 %v4227_v20  ;;  %v427_v50 = vld [vmem:[%s6282_s1 + $0x130] sm:$0xff]  ;;  %v412_v51 = vld [vmem:[%s6282_s1 + $0xb8] sm:$0xff]  ;;  %v430_v53 = vld [vmem:[%s6282_s1 + $0x148] sm:$0xff] }
  0x11   :  { %v411_v52 = vld [vmem:[%s6282_s1 + $0xb0] sm:$0xff]  ;;  %v429_v54 = vld [vmem:[%s6282_s1 + $0x140] sm:$0xff]  ;;  %v414_v55 = vld [vmem:[%s6282_s1 + $0xc8] sm:$0xff] }
  0x12   :  { %296 = vperm.xlu1 %4409, %v186_v22   ;;  %v413_v56 = vld [vmem:[%s6282_s1 + $0xc0] sm:$0xff]  ;;  %v432_v57 = vld [vmem:[%s6282_s1 + $0x158] sm:$0xff]  ;;  %v431_v58 = vld [vmem:[%s6282_s1 + $0x150] sm:$0xff] }
  0x13   :  { %4230 = vmatpush3.bf16.msra.mxu0 %v4227_v20  ;;  %291 = vperm.xlu0 %4408, %v185_v23   ;;  %v416_v59 = vld [vmem:[%s6282_s1 + $0xd8] sm:$0xff]  ;;  %v415_v60 = vld [vmem:[%s6282_s1 + $0xd0] sm:$0xff]  ;;  %v434_v61 = vld [vmem:[%s6282_s1 + $0x168] sm:$0xff] }
  0x14   :  { %v433_v62 = vld [vmem:[%s6282_s1 + $0x160] sm:$0xff]  ;;  %v418_v63 = vld [vmem:[%s6282_s1 + $0xe8] sm:$0xff]  ;;  %v436_v1 = vld [vmem:[%s6282_s1 + $0x178] sm:$0xff] }
  0x15   :  { %v417_v0 = vld [vmem:[%s6282_s1 + $0xe0] sm:$0xff]  ;;  %v435_v2 = vld [vmem:[%s6282_s1 + $0x170] sm:$0xff]  ;;  %v420_v3 = vld [vmem:[%s6282_s1 + $0xf8] sm:$0xff] }
  0x16   :  { %3956 = vmatmul.mubr.msk.f32.vlgmr.msra.gmra.mrb[0].mxu0 %vm51_vm0, %v44_v24  ;;  %344 = vperm.xlu1 %4409, %v194_v25   ;;  %v419_v4 = vld [vmem:[%s6282_s1 + $0xf0] sm:$0xff]  ;;  %v1040_v5 = vld [vmem:[%s6282_s1 + $0x188] sm:$0xff]  ;;  %v1039_v6 = vld [vmem:[%s6282_s1 + $0x180] sm:$0xff] }
  0x17   :  { %3958 = vmatprep.mubr.msk.f32.mxu0 %vm51_vm0, %v45_v26  ;;  %339 = vperm.xlu0 %4408, %v193_v27   ;;  %v1048_v7 = vld [vmem:[%s6282_s1 + $0x1c8] sm:$0xff]  ;;  %v1047_v8 = vld [vmem:[%s6282_s1 + $0x1c0] sm:$0xff]  ;;  %v1042_v9 = vld [vmem:[%s6282_s1 + $0x198] sm:$0xff] }
  0x18   :  { %v1041_v10 = vld [vmem:[%s6282_s1 + $0x190] sm:$0xff]  ;;  %v1050_v11 = vld [vmem:[%s6282_s1 + $0x1d8] sm:$0xff]  ;;  %v1044_v13 = vld [vmem:[%s6282_s1 + $0x1a8] sm:$0xff] }
  0x19   :  { %v1049_v12 = vld [vmem:[%s6282_s1 + $0x1d0] sm:$0xff]  ;;  %v1043_v14 = vld [vmem:[%s6282_s1 + $0x1a0] sm:$0xff]  ;;  %v1052_v15 = vld [vmem:[%s6282_s1 + $0x1e8] sm:$0xff] }
  0x1a   :  { %3959 = vmatmul.mubr.msk.f32.gmra.mrb[2].mxu0 %vm51_vm0, %v46_v28  ;;  %306 = vperm.xlu1 %4409, %v188_v29   ;;  %v1051_v16 = vld [vmem:[%s6282_s1 + $0x1e0] sm:$0xff]  ;;  %v1046_v17 = vld [vmem:[%s6282_s1 + $0x1b8] sm:$0xff]  ;;  %v1045_v18 = vld [vmem:[%s6282_s1 + $0x1b0] sm:$0xff] }
  0x1b   :  { %3961 = vmatprep.mubr.msk.f32.mxu0 %vm51_vm0, %v47_v30  ;;  %301 = vperm.xlu0 %4408, %v187_v31   ;;  %v1054_v19 = vld [vmem:[%s6282_s1 + $0x1f8] sm:$0xff]  ;;  %v1053_v20 = vld [vmem:[%s6282_s1 + $0x1f0] sm:$0xff]  ;;  %v1313_v21 = vld [vmem:[%s6282_s1 + $0x208] sm:$0xff] }
  0x1c   :  { %v1312_v22 = vld [vmem:[%s6282_s1 + $0x200] sm:$0xff]  ;;  %v1315_v23 = vld [vmem:[%s6282_s1 + $0x218] sm:$0xff]  ;;  %v1314_v24 = vld [vmem:[%s6282_s1 + $0x210] sm:$0xff] }
  0x1d   :  { %v1612_v25 = vld [vmem:[%s6282_s1 + $0x2a8] sm:$0xff]  ;;  %v1611_v26 = vld [vmem:[%s6282_s1 + $0x2a0] sm:$0xff]  ;;  %v1614_v29 = vld [vmem:[%s6282_s1 + $0x2b8] sm:$0xff] }
  0x1e   :  { %3962 = vmatmul.mubr.msk.f32.gmra.mrb[4].mxu0 %vm51_vm0, %v48_v32  ;;  %354 = vperm.xlu1 %4409, %v196_v33   ;;  %v1596_v27 = vld [vmem:[%s6282_s1 + $0x228] sm:$0xff]  ;;  %v1595_v28 = vld [vmem:[%s6282_s1 + $0x220] sm:$0xff]  ;;  %v1613_v30 = vld [vmem:[%s6282_s1 + $0x2b0] sm:$0xff] }
  0x1f   :  { %3964 = vmatprep.mubr.msk.f32.mxu0 %vm51_vm0, %v49_v34  ;;  %349 = vperm.xlu0 %4408, %v195_v35   ;;  %v1598_v33 = vld [vmem:[%s6282_s1 + $0x238] sm:$0xff]  ;;  %v1597_v34 = vld [vmem:[%s6282_s1 + $0x230] sm:$0xff]  ;;  %v1616_v35 = vld [vmem:[%s6282_s1 + $0x2c8] sm:$0xff] }
  0x22   :  { %3965 = vmatmul.mubr.msk.f32.gmra.mrb[6].mxu0 %vm51_vm0, %v50_v36  ;;  %524 = vperm.xlu1 %4409, %v422_v37   ;;  %v1615_v37 = vld [vmem:[%s6282_s1 + $0x2c0] sm:$0xff] }
  0x23   :  { %519 = vperm.xlu0 %4408, %v421_v38  }
  0x26   :  { %444 = vperm.xlu1 %4409, %v406_v39   ;;  %v1600_v39 = vld [vmem:[%s6282_s1 + $0x248] sm:$0xff] }
  0x27   :  { %439 = vperm.xlu0 %4408, %v405_v40   ;;  %v1599_v40 = vld [vmem:[%s6282_s1 + $0x240] sm:$0xff] }
  0x2a   :  { %534 = vperm.xlu1 %4409, %v424_v41  }
  0x2b   :  { %529 = vperm.xlu0 %4408, %v423_v42  }
  0x2e   :  { %454 = vperm.xlu1 %4409, %v408_v43   ;;  %v1618_v43 = vld [vmem:[%s6282_s1 + $0x2d8] sm:$0xff] }
  0x2f   :  { %449 = vperm.xlu0 %4408, %v407_v44   ;;  %v1617_v44 = vld [vmem:[%s6282_s1 + $0x2d0] sm:$0xff] }
  0x32   :  { %544 = vperm.xlu1 %4409, %v426_v45   ;;  %v1602_v45 = vld [vmem:[%s6282_s1 + $0x258] sm:$0xff] }
  0x33   :  { %539 = vperm.xlu0 %4408, %v425_v46  }
  0x36   :  { %464 = vperm.xlu1 %4409, %v410_v47   ;;  %v1601_v47 = vld [vmem:[%s6282_s1 + $0x250] sm:$0xff] }
  0x37   :  { %459 = vperm.xlu0 %4408, %v409_v48  }
  0x3a   :  { %554 = vperm.xlu1 %4409, %v428_v49   ;;  %v1620_v49 = vld [vmem:[%s6282_s1 + $0x2e8] sm:$0xff] }
  0x3b   :  { %549 = vperm.xlu0 %4408, %v427_v50   ;;  %v1619_v50 = vld [vmem:[%s6282_s1 + $0x2e0] sm:$0xff] }
  0x3e   :  { %474 = vperm.xlu1 %4409, %v412_v51  }
  0x3f   :  { %469 = vperm.xlu0 %4408, %v411_v52  }
  0x42   :  { %564 = vperm.xlu1 %4409, %v430_v53   ;;  %v1604_v53 = vld [vmem:[%s6282_s1 + $0x268] sm:$0xff] }
  0x43   :  { %559 = vperm.xlu0 %4408, %v429_v54   ;;  %v1603_v54 = vld [vmem:[%s6282_s1 + $0x260] sm:$0xff] }
  0x46   :  { %484 = vperm.xlu1 %4409, %v414_v55   ;;  %v1622_v55 = vld [vmem:[%s6282_s1 + $0x2f8] sm:$0xff] }
  0x47   :  { %479 = vperm.xlu0 %4408, %v413_v56  }
  0x4a   :  { %574 = vperm.xlu1 %4409, %v432_v57   ;;  %v1621_v57 = vld [vmem:[%s6282_s1 + $0x2f0] sm:$0xff] }
  0x4b   :  { %569 = vperm.xlu0 %4408, %v431_v58  }
  0x4e   :  { %494 = vperm.xlu1 %4409, %v416_v59   ;;  %v1606_v59 = vld [vmem:[%s6282_s1 + $0x278] sm:$0xff] }
  0x4f   :  { %489 = vperm.xlu0 %4408, %v415_v60   ;;  %v1605_v60 = vld [vmem:[%s6282_s1 + $0x270] sm:$0xff] }
  0x52   :  { %584 = vperm.xlu1 %4409, %v434_v61  }
  0x53   :  { %579 = vperm.xlu0 %4408, %v433_v62  }
  0x56   :  { %504 = vperm.xlu1 %4409, %v418_v63   ;;  %v1624_v63 = vld [vmem:[%s6282_s1 + $0x308] sm:$0xff] }
  0x57   :  { %499 = vperm.xlu0 %4408, %v417_v0   ;;  %v1623_v0 = vld [vmem:[%s6282_s1 + $0x300] sm:$0xff] }
  0x5a   :  { %594 = vperm.xlu1 %4409, %v436_v1   ;;  %v1608_v1 = vld [vmem:[%s6282_s1 + $0x288] sm:$0xff] }
  0x5b   :  { %589 = vperm.xlu0 %4408, %v435_v2  }
  0x5e   :  { %514 = vperm.xlu1 %4409, %v420_v3   ;;  %v1607_v3 = vld [vmem:[%s6282_s1 + $0x280] sm:$0xff] }
  0x5f   :  { %509 = vperm.xlu0 %4408, %v419_v4  }
  0x62   :  { %1132 = vperm.xlu1 %4409, %v1040_v5   ;;  %v1626_v5 = vld [vmem:[%s6282_s1 + $0x318] sm:$0xff] }
  0x63   :  { %1127 = vperm.xlu0 %4408, %v1039_v6   ;;  %v1625_v6 = vld [vmem:[%s6282_s1 + $0x310] sm:$0xff] }
  0x66   :  { %1180 = vperm.xlu1 %4409, %v1048_v7  }
  0x67   :  { %1175 = vperm.xlu0 %4408, %v1047_v8  }
  0x6a   :  { %1142 = vperm.xlu1 %4409, %v1042_v9   ;;  %v1610_v9 = vld [vmem:[%s6282_s1 + $0x298] sm:$0xff] }
  0x6b   :  { %1137 = vperm.xlu0 %4408, %v1041_v10   ;;  %v1609_v10 = vld [vmem:[%s6282_s1 + $0x290] sm:$0xff] }
  0x6e   :  { %1190 = vperm.xlu1 %4409, %v1050_v11   ;;  %v2263_v11 = vld [vmem:[%s6282_s1 + $0x328] sm:$0xff] }
  0x6f   :  { %1185 = vperm.xlu0 %4408, %v1049_v12  }
  0x72   :  { %1152 = vperm.xlu1 %4409, %v1044_v13   ;;  %v2262_v13 = vld [vmem:[%s6282_s1 + $0x320] sm:$0xff] }
  0x73   :  { %1147 = vperm.xlu0 %4408, %v1043_v14  }
  0x76   :  { %1200 = vperm.xlu1 %4409, %v1052_v15   ;;  %v2271_v15 = vld [vmem:[%s6282_s1 + $0x368] sm:$0xff] }
  0x77   :  { %1195 = vperm.xlu0 %4408, %v1051_v16   ;;  %v2270_v16 = vld [vmem:[%s6282_s1 + $0x360] sm:$0xff] }
  0x7a   :  { %1162 = vperm.xlu1 %4409, %v1046_v17  }
  0x7b   :  { %1157 = vperm.xlu0 %4408, %v1045_v18  }
  0x7e   :  { %1210 = vperm.xlu1 %4409, %v1054_v19   ;;  %v2265_v19 = vld [vmem:[%s6282_s1 + $0x338] sm:$0xff] }
  0x7f   :  { %1205 = vperm.xlu0 %4408, %v1053_v20   ;;  %v373_v20 = vld [vmem:[%s6285_s3] sm:$0xff] }
  0x80   :  { %3983 = vmatprep.mubr.msk.f32.mxu1 %vm51_vm0, %v373_v20 }
  0x81   :  { %v4782_v31 = vpop.permute.xlu1 %319 }
  0x82   :  { %1352 = vperm.xlu1 %4409, %v1313_v21   ;;  %v4784_v32 = vpop.permute.xlu0 %271  ;;  %v2264_v21 = vld [vmem:[%s6282_s1 + $0x330] sm:$0xff] }
  0x83   :  { %1347 = vperm.xlu0 %4408, %v1312_v22   ;;  %v2273_v22 = vld [vmem:[%s6282_s1 + $0x378] sm:$0xff] }
  0x85   :  { %v4795_v36 = vpop.permute.xlu1 %324 }
  0x86   :  { %1364 = vperm.xlu1 %4409, %v1315_v23   ;;  %v4800_v38 = vpop.permute.xlu0 %276 }
  0x87   :  { %1359 = vperm.xlu0 %4408, %v1314_v24   ;;  %v2272_v24 = vld [vmem:[%s6282_s1 + $0x370] sm:$0xff] }
  0x89   :  { %v4808_v41 = vpop.permute.xlu1 %286 }
  0x8a   :  { %1714 = vperm.xlu1 %4409, %v1612_v25   ;;  %v4810_v42 = vpop.permute.xlu0 %281 }
  0x8b   :  { %1709 = vperm.xlu0 %4408, %v1611_v26   ;;  %v2267_v26 = vld [vmem:[%s6282_s1 + $0x348] sm:$0xff] }
  0x8d   :  { %v4821_v46 = vpop.permute.xlu1 %334 }
  0x8e   :  { %1634 = vperm.xlu1 %4409, %v1596_v27   ;;  %v4826_v48 = vpop.permute.xlu0 %329  ;;  %v2266_v27 = vld [vmem:[%s6282_s1 + $0x340] sm:$0xff] }
  0x8f   :  { %1629 = vperm.xlu0 %4408, %v1595_v28  }
  0x91   :  { %v4834_v51 = vpop.permute.xlu1 %296 }
  0x92   :  { %1724 = vperm.xlu1 %4409, %v1614_v29   ;;  %v4836_v52 = vpop.permute.xlu0 %291 }
  0x93   :  { %1719 = vperm.xlu0 %4408, %v1613_v30   ;;  %v2275_v30 = vld [vmem:[%s6282_s1 + $0x388] sm:$0xff] }
  0x95   :  { %v4847_v56 = vpop.permute.xlu1 %344 }
  0x96   :  { %1644 = vperm.xlu1 %4409, %v1598_v33   ;;  %v4852_v58 = vpop.permute.xlu0 %339  ;;  %v2274_v33 = vld [vmem:[%s6282_s1 + $0x380] sm:$0xff] }
  0x97   :  { %1639 = vperm.xlu0 %4408, %v1597_v34   ;;  %v2269_v34 = vld [vmem:[%s6282_s1 + $0x358] sm:$0xff] }
  0x99   :  { %v4860_v61 = vpop.permute.xlu1 %306 }
  0x9a   :  { %1734 = vperm.xlu1 %4409, %v1616_v35   ;;  %v4862_v62 = vpop.permute.xlu0 %301 }
  0x9b   :  { %1729 = vperm.xlu0 %4408, %v1615_v37   ;;  %v2268_v37 = vld [vmem:[%s6282_s1 + $0x350] sm:$0xff] }
  0x9d   :  { %v4873_v2 = vpop.permute.xlu1 %354 }
  0x9e   :  { %1654 = vperm.xlu1 %4409, %v1600_v39   ;;  %v4878_v4 = vpop.permute.xlu0 %349 }
  0x9f   :  { %1649 = vperm.xlu0 %4408, %v1599_v40   ;;  %v2277_v40 = vld [vmem:[%s6282_s1 + $0x398] sm:$0xff] }
  0xa1   :  { %v4886_v7 = vpop.permute.xlu1 %524 }
  0xa2   :  { %1744 = vperm.xlu1 %4409, %v1618_v43   ;;  %v4888_v8 = vpop.permute.xlu0 %519  ;;  %v2276_v43 = vld [vmem:[%s6282_s1 + $0x390] sm:$0xff] }
  0xa3   :  { %1739 = vperm.xlu0 %4408, %v1617_v44  }
  0xa5   :  { %v4899_v12 = vpop.permute.xlu1 %444 }
  0xa6   :  { %1664 = vperm.xlu1 %4409, %v1602_v45   ;;  %v4904_v14 = vpop.permute.xlu0 %439 }
  0xa7   :  { %1659 = vperm.xlu0 %4408, %v1601_v47   ;;  %v2537_v47 = vld [vmem:[%s6282_s1 + $0x3a8] sm:$0xff] }
  0xa9   :  { %v4912_v17 = vpop.permute.xlu1 %534 }
  0xaa   :  { %1754 = vperm.xlu1 %4409, %v1620_v49   ;;  %v4914_v18 = vpop.permute.xlu0 %529 }
  0xab   :  { %1749 = vperm.xlu0 %4408, %v1619_v50   ;;  %v2536_v50 = vld [vmem:[%s6282_s1 + $0x3a0] sm:$0xff] }
  0xad   :  { %v4929_v23 = vpop.permute.xlu1 %454 }
  0xae   :  { %1674 = vperm.xlu1 %4409, %v1604_v53   ;;  %v4934_v25 = vpop.permute.xlu0 %449 }
  0xaf   :  { %1669 = vperm.xlu0 %4408, %v1603_v54  }
  0xb1   :  { %v4942_v28 = vpop.permute.xlu1 %544 }
  0xb2   :  { %1764 = vperm.xlu1 %4409, %v1622_v55   ;;  %v4944_v29 = vpop.permute.xlu0 %539 }
  0xb3   :  { %1759 = vperm.xlu0 %4408, %v1621_v57  }
  0xb5   :  { %v4955_v35 = vpop.permute.xlu1 %464 }
  0xb6   :  { %1684 = vperm.xlu1 %4409, %v1606_v59   ;;  %v4960_v39 = vpop.permute.xlu0 %459  ;;  %v2539_v59 = vld [vmem:[%s6282_s1 + $0x3b8] sm:$0xff] }
  0xb7   :  { %1679 = vperm.xlu0 %4408, %v1605_v60  }
  0xb9   :  { %v4968_v44 = vpop.permute.xlu1 %554 }
  0xba   :  { %1774 = vperm.xlu1 %4409, %v1624_v63   ;;  %v4970_v45 = vpop.permute.xlu0 %549 }
  0xbb   :  { %1769 = vperm.xlu0 %4408, %v1623_v0   ;;  %v2538_v0 = vld [vmem:[%s6282_s1 + $0x3b0] sm:$0xff] }
  0xbd   :  { %v4989_v60 = vpop.permute.xlu1 %474 }
  0xbe   :  { %1694 = vperm.xlu1 %4409, %v1608_v1   ;;  %v4996_v1 = vpop.permute.xlu0 %469 }
  0xbf   :  { %1689 = vperm.xlu0 %4408, %v1607_v3  }
  0xc2   :  { %1784 = vperm.xlu1 %4409, %v1626_v5  }
  0xc3   :  { %1779 = vperm.xlu0 %4408, %v1625_v6  }
  0xc6   :  { %1704 = vperm.xlu1 %4409, %v1610_v9   ;;  %v2836_v9 = vld [vmem:[%s6282_s1 + $0x448] sm:$0xff] }
  0xc7   :  { %1699 = vperm.xlu0 %4408, %v1609_v10  }
  0xca   :  { %2355 = vperm.xlu1 %4409, %v2263_v11  }
  0xcb   :  { %2350 = vperm.xlu0 %4408, %v2262_v13   ;;  %v2835_v13 = vld [vmem:[%s6282_s1 + $0x440] sm:$0xff] }
  0xce   :  { %2403 = vperm.xlu1 %4409, %v2271_v15  }
  0xcf   :  { %2398 = vperm.xlu0 %4408, %v2270_v16  }
  0xd2   :  { %2365 = vperm.xlu1 %4409, %v2265_v19   ;;  %v5007_v19 = vpop.permute.xlu1 %564 }
  0xd3   :  { %2360 = vperm.xlu0 %4408, %v2264_v21   ;;  %v5010_v21 = vpop.permute.xlu0 %559 }
  0xd6   :  { %2413 = vperm.xlu1 %4409, %v2273_v22  }
  0xd7   :  { %2408 = vperm.xlu0 %4408, %v2272_v24   ;;  %v2820_v24 = vld [vmem:[%s6282_s1 + $0x3c8] sm:$0xff] }
  0xda   :  { %2375 = vperm.xlu1 %4409, %v2267_v26  }
  0xdb   :  { %2370 = vperm.xlu0 %4408, %v2266_v27  }
  0xde   :  { %2423 = vperm.xlu1 %4409, %v2275_v30   ;;  %v2819_v30 = vld [vmem:[%s6282_s1 + $0x3c0] sm:$0xff] }
  0xdf   :  { %2418 = vperm.xlu0 %4408, %v2274_v33  }
  0xe2   :  { %2385 = vperm.xlu1 %4409, %v2269_v34  }
  0xe3   :  { %2380 = vperm.xlu0 %4408, %v2268_v37  }
  0xe6   :  { %2433 = vperm.xlu1 %4409, %v2277_v40  }
  0xe7   :  { %2428 = vperm.xlu0 %4408, %v2276_v43   ;;  %v2838_v43 = vld [vmem:[%s6282_s1 + $0x458] sm:$0xff] }
  0xe9   :  { %v4975_v49 = vpop.f32.mrb[0].mxu0 }
  0xea   :  { %v199_v53 = vsel %vm197_vm1, %v4975_v49, 0.0  ;;  %v4982_v54 = vpop.f32.mrb[1].mxu0  ;;  %2575 = vperm.xlu1 %4409, %v2537_v47   ;;  %v5023_v47 = vpop.permute.xlu1 %484 }
  0xeb   :  { %v198_v55 = vsel %vm197_vm1, %v4982_v54, 0.0  ;;  %2570 = vperm.xlu0 %4408, %v2536_v50  }
  0xec   :  { %v200_v57 = vadd.f32 %v199_v53, %v198_v55  ;;  %v2837_v53 = vld [vmem:[%s6282_s1 + $0x450] sm:$0xff]  ;;  %v5029_v55 = vpop.permute.xlu0 %479 }
  0xed   :  { %v4991_v63 = vpop.f32.mrb[2].mxu0 }
  0xee   :  { %v152_v3 = vpop.f32.mrb[3].mxu0  ;;  %2587 = vperm.xlu1 %4409, %v2539_v59   ;;  %v203_v10 = vsel %vm197_vm1, %v4991_v63, 0.0 }
  0xef   :  { %v201_v5 = vsel %vm197_vm1, %v152_v3, 0.0  ;;  %2582 = vperm.xlu0 %4408, %v2538_v0   ;;  %v2822_v0 = vld [vmem:[%s6282_s1 + $0x3d8] sm:$0xff] }
  0xf0   :  { %v202_v6 = vadd.f32 %v201_v5, %v200_v57  ;;  %v2821_v5 = vld [vmem:[%s6282_s1 + $0x3d0] sm:$0xff] }
  0xf1   :  { %v3963_v11 = vpop.f32.mrb[4].mxu0 }
  0xf2   :  { %v162_v15 = vpop.f32.mrb[5].mxu0  ;;  %v204_v16 = vadd.f32 %v203_v10, %v202_v6  ;;  %2938 = vperm.xlu1 %4409, %v2836_v9   ;;  %v207_v26 = vsel %vm197_vm1, %v3963_v11, 0.0  ;;  %v5037_v9 = vpop.permute.xlu1 %574 }
  0xf3   :  { %v205_v20 = vsel %vm197_vm1, %v162_v15, 0.0  ;;  %2933 = vperm.xlu0 %4408, %v2835_v13   ;;  %v5039_v10 = vpop.permute.xlu0 %569 }
  0xf4   :  { %v206_v22 = vadd.f32 %v205_v20, %v204_v16  ;;  %v2840_v16 = vld [vmem:[%s6282_s1 + $0x468] sm:$0xff]  ;;  %v2839_v20 = vld [vmem:[%s6282_s1 + $0x460] sm:$0xff] }
  0xf5   :  { %v3966_v27 = vpop.f32.mrb[6].mxu0 }
  0xf6   :  { %v172_v33 = vpop.f32.mrb[7].mxu0  ;;  %v208_v34 = vadd.f32 %v207_v26, %v206_v22  ;;  %2858 = vperm.xlu1 %4409, %v2820_v24   ;;  %v211_v50 = vsel %vm197_vm1, %v3966_v27, 0.0  ;;  %v2824_v26 = vld [vmem:[%s6282_s1 + $0x3e8] sm:$0xff] }
  0xf7   :  { %v209_v37 = vsel %vm197_vm1, %v172_v33, 0.0  ;;  %2853 = vperm.xlu0 %4408, %v2819_v30   ;;  %v5050_v30 = vpop.permute.xlu1 %494 }
  0xf8   :  { %v210_v40 = vadd.f32 %v209_v37, %v208_v34  ;;  %v2823_v34 = vld [vmem:[%s6282_s1 + $0x3e0] sm:$0xff]  ;;  %v5055_v37 = vpop.permute.xlu0 %489 }
  0xfa   :  { %v212_v57 = vadd.f32 %v211_v50, %v210_v40  ;;  %2948 = vperm.xlu1 %4409, %v2838_v43   ;;  %v2842_v50 = vld [vmem:[%s6282_s1 + $0x478] sm:$0xff] }
  0xfb   :  { %2943 = vperm.xlu0 %4408, %v2837_v53   ;;  %v2841_v53 = vld [vmem:[%s6282_s1 + $0x470] sm:$0xff] }
  0xfc   :  { %v213_v59 = vrot.slane %v212_v57, 4 }
  0xfe   :  { %v214_v6 = vadd.f32 %v213_v59, %v212_v57  ;;  %2868 = vperm.xlu1 %4409, %v2822_v0  }
  0xff   :  { %2863 = vperm.xlu0 %4408, %v2821_v5  }
 0x100   :  { %v215_v13 = vrot.slane %v214_v6, 2 }
 0x102   :  { %v216_v22 = vadd.f32 %v215_v13, %v214_v6  ;;  %2958 = vperm.xlu1 %4409, %v2840_v16   ;;  %v5074_v6 = vpop.permute.xlu1 %584 }
 0x103   :  { %2953 = vperm.xlu0 %4408, %v2839_v20   ;;  %6318 = vst [vmem:[#allocation2_spill] sm:$0xff] %v5074_v6  ;;  %v2845_v6 = vld [vmem:[%s6282_s1 + $0x490] sm:$0xff] }
 0x104   :  { %v217_v24 = vrot.slane %v216_v22, 1 }
 0x106   :  { %v218_v40 = vadd.f32 %v217_v24, %v216_v22  ;;  %2878 = vperm.xlu1 %4409, %v2824_v26  }
 0x107   :  { %2873 = vperm.xlu0 %4408, %v2823_v34  }
 0x108   :  { %v220_v43 = vmul.f32 0.015625, %v218_v40 }
 0x10a   :  { %v5064_v57 = vsub.f32 %v4982_v54, %v220_v43  ;;  %v5067_v59 = vsub.f32 %v4975_v49, %v220_v43  ;;  %v5069_v0 = vsub.f32 %v152_v3, %v220_v43  ;;  %v5072_v5 = vsub.f32 %v4991_v63, %v220_v43  ;;  %2968 = vperm.xlu1 %4409, %v2842_v50   ;;  %v5084_v54 = vpop.permute.xlu0 %579  ;;  %v5108_v50 = vpop.permute.xlu1 %504 }
 0x10b   :  { %v5076_v13 = vsub.f32 %v162_v15, %v220_v43  ;;  %v5078_v16 = vsub.f32 %v3963_v11, %v220_v43  ;;  %v5080_v20 = vsub.f32 %v172_v33, %v220_v43  ;;  %v5082_v22 = vsub.f32 %v3966_v27, %v220_v43  ;;  %6319 = vst [vmem:[#allocation3_spill] sm:$0xff] %v5084_v54  ;;  %v2826_v11 = vld [vmem:[%s6282_s1 + $0x3f8] sm:$0xff]  ;;  %v2825_v15 = vld [vmem:[%s6282_s1 + $0x3f0] sm:$0xff]  ;;  %v2844_v43 = vld [vmem:[%s6282_s1 + $0x488] sm:$0xff] }
 0x10c   :  { %v229_v49 = vmul.f32 %v5064_v57, %v5064_v57  ;;  %v230_v63 = vmul.f32 %v5067_v59, %v5067_v59  ;;  %v231_v3 = vmul.f32 %v5069_v0, %v5069_v0  ;;  %2963 = vperm.xlu0 %4408, %v2841_v53   ;;  %v232_v27 = vmul.f32 %v5072_v5, %v5072_v5  ;;  %v2827_v54 = vld [vmem:[%s6282_s1 + $0x400] sm:$0xff] }
 0x10d   :  { %v233_v34 = vmul.f32 %v5076_v13, %v5076_v13 }
 0x10e   :  { %v237_v33 = vsel %vm197_vm1, %v229_v49, 0.0  ;;  %v238_v24 = vsel %vm197_vm1, %v230_v63, 0.0  ;;  %2888 = vperm.xlu1 %4409, %v2826_v11   ;;  %v240_v40 = vsel %vm197_vm1, %v231_v3, 0.0  ;;  %v2843_v49 = vld [vmem:[%s6282_s1 + $0x480] sm:$0xff]  ;;  %v5113_v63 = vpop.permute.xlu0 %499  ;;  %v234_v11 = vmul.f32 %v5078_v16, %v5078_v16 }
 0x10f   :  { %v239_v26 = vadd.f32 %v238_v24, %v237_v33  ;;  %6320 = vst [vmem:[#allocation4_spill] sm:$0xff] %v5113_v63  ;;  %v242_v33 = vsel %vm197_vm1, %v232_v27, 0.0  ;;  %v244_v24 = vsel %vm197_vm1, %v233_v34, 0.0  ;;  %v236_v27 = vmul.f32 %v5082_v22, %v5082_v22 }
 0x110   :  { %2883 = vperm.xlu0 %4408, %v2825_v15   ;;  %v235_v15 = vmul.f32 %v5080_v20, %v5080_v20 }
 0x111   :  { %v241_v53 = vadd.f32 %v240_v40, %v239_v26  ;;  %v2828_v26 = vld [vmem:[%s6282_s1 + $0x408] sm:$0xff] }
 0x112   :  { %2978 = vperm.xlu1 %4409, %v2844_v43   ;;  %v246_v43 = vsel %vm197_vm1, %v234_v11, 0.0  ;;  %v5132_v34 = vpop.permute.xlu0 %589  ;;  %v250_v11 = vsel %vm197_vm1, %v236_v27, 0.0 }
 0x113   :  { %v243_v3 = vadd.f32 %v242_v33, %v241_v53  ;;  %v5130_v53 = vpop.permute.xlu1 %594  ;;  %6321 = vst [vmem:[#allocation5_spill] sm:$0xff] %v5132_v34 }
 0x114   :  { %2973 = vperm.xlu0 %4408, %v2843_v49   ;;  %v248_v49 = vsel %vm197_vm1, %v235_v15, 0.0 }
 0x115   :  { %v245_v40 = vadd.f32 %v244_v24, %v243_v3  ;;  %v2846_v3 = vld [vmem:[%s6282_s1 + $0x498] sm:$0xff] }
 0x116   :  { %2898 = vperm.xlu1 %4409, %v2828_v26   ;;  %v2830_v26 = vld [vmem:[%s6282_s1 + $0x418] sm:$0xff] }
 0x117   :  { %v247_v33 = vadd.f32 %v246_v43, %v245_v40  ;;  %v5145_v15 = vpop.permute.xlu1 %514  ;;  %v2829_v40 = vld [vmem:[%s6282_s1 + $0x410] sm:$0xff]  ;;  %v5150_v43 = vpop.permute.xlu0 %509 }
 0x118   :  { %2893 = vperm.xlu0 %4408, %v2827_v54  }
 0x119   :  { %v249_v24 = vadd.f32 %v248_v49, %v247_v33  ;;  %v2847_v49 = vld [vmem:[%s6282_s1 + $0x4a0] sm:$0xff] }
 0x11a   :  { %2988 = vperm.xlu1 %4409, %v2846_v3  }
 0x11b   :  { %v251_v63 = vadd.f32 %v250_v11, %v249_v24  ;;  %v5158_v3 = vpop.permute.xlu1 %1132  ;;  %v5160_v11 = vpop.permute.xlu0 %1127 }
 0x11c   :  { %2983 = vperm.xlu0 %4408, %v2845_v6   ;;  %v2848_v6 = vld [vmem:[%s6282_s1 + $0x4a8] sm:$0xff]  ;;  %6322 = vst [vmem:[#allocation6_spill] sm:$0xff] %v5158_v3  ;;  %6323 = vst [vmem:[#allocation7_spill] sm:$0xff] %v5160_v11 }
 0x11d   :  { %v252_v54 = vrot.slane %v251_v63, 4 }
 0x11e   :  { %2908 = vperm.xlu1 %4409, %v2830_v26  }
 0x11f   :  { %v253_v33 = vadd.f32 %v252_v54, %v251_v63  ;;  %v2832_v63 = vld [vmem:[%s6282_s1 + $0x428] sm:$0xff]  ;;  %v2831_v54 = vld [vmem:[%s6282_s1 + $0x420] sm:$0xff]  ;;  %v5176_v3 = vpop.permute.xlu0 %1175 }
 0x120   :  { %2903 = vperm.xlu0 %4408, %v2829_v40   ;;  %6325 = vst [vmem:[#allocation9_spill] sm:$0xff] %v5176_v3 }
 0x121   :  { %v254_v27 = vrot.slane %v253_v33, 2 }
 0x122   :  { %2998 = vperm.xlu1 %4409, %v2848_v6   ;;  %v5171_v6 = vpop.permute.xlu1 %1180 }
 0x123   :  { %v255_v24 = vadd.f32 %v254_v27, %v253_v33  ;;  %v2850_v33 = vld [vmem:[%s6282_s1 + $0x4b8] sm:$0xff]  ;;  %6324 = vst [vmem:[#allocation8_spill] sm:$0xff] %v5171_v6 }
 0x124   :  { %2993 = vperm.xlu0 %4408, %v2847_v49   ;;  %v2849_v49 = vld [vmem:[%s6282_s1 + $0x4b0] sm:$0xff] }
 0x125   :  { %v256_v26 = vrot.slane %v255_v24, 1 }
 0x126   :  { %2918 = vperm.xlu1 %4409, %v2832_v63   ;;  %v2833_v63 = vld [vmem:[%s6282_s1 + $0x430] sm:$0xff] }
 0x127   :  { %v257_v40 = vadd.f32 %v256_v26, %v255_v24  ;;  %v2834_v24 = vld [vmem:[%s6282_s1 + $0x438] sm:$0xff]  ;;  %v5184_v26 = vpop.permute.xlu1 %1142 }
 0x128   :  { %2913 = vperm.xlu0 %4408, %v2831_v54   ;;  %6326 = vst [vmem:[#allocation10_spill] sm:$0xff] %v5184_v26  ;;  %v5186_v54 = vpop.permute.xlu0 %1137 }
 0x129   :  { %v258_v27 = vmul.f32 0.015625, %v257_v40 }
 0x12a   :  { %3008 = vperm.xlu1 %4409, %v2850_v33  }
 0x12b   :  { %v259_v11 = vadd.f32 1e-05, %v258_v27 }
 0x12c   :  { %3003 = vperm.xlu0 %4408, %v2849_v49  }
 0x12d   :  { %4410 = vrsqrt.f32 %v259_v11 }
 0x12e   :  { %2928 = vperm.xlu1 %4409, %v2834_v24  }
 0x130   :  { %2923 = vperm.xlu0 %4408, %v2833_v63  }
 0x137   :  { %v4411_v40 = vpop.eup %4410 }
 0x138   :  { %v267_v27 = vmul.f32 %v4411_v40, %v5080_v20  ;;  %v261_v33 = vmul.f32 %v4411_v40, %v5064_v57  ;;  %v262_v49 = vmul.f32 %v4411_v40, %v5067_v59  ;;  %v263_v6 = vmul.f32 %v4411_v40, %v5069_v0 }
 0x139   :  { %v264_v11 = vmul.f32 %v4411_v40, %v5072_v5  ;;  %v265_v3 = vmul.f32 %v4411_v40, %v5076_v13  ;;  %v266_v34 = vmul.f32 %v4411_v40, %v5078_v16  ;;  %v268_v24 = vmul.f32 %v4411_v40, %v5082_v22 }
 0x13a   :  { %v315_v26 = vmul.f32 %v4862_v62, %v267_v27  ;;  %v309_v63 = vmul.f32 %v4784_v32, %v261_v33  ;;  %v310_v20 = vmul.f32 %v4800_v38, %v262_v49  ;;  %v311_v57 = vmul.f32 %v4810_v42, %v263_v6  ;;  %v379_v49 = vld [vmem:[%s6285_s3 + $0x30] sm:$0xff] }
 0x13b   :  { %v312_v59 = vmul.f32 %v4808_v41, %v264_v11  ;;  %v313_v0 = vmul.f32 %v4836_v52, %v265_v3  ;;  %v314_v5 = vmul.f32 %v4834_v51, %v266_v34  ;;  %v316_v13 = vmul.f32 %v4860_v61, %v268_v24  ;;  %v380_v11 = vld [vmem:[%s6285_s3 + $0x38] sm:$0xff]  ;;  %v381_v24 = vld [vmem:[%s6285_s3 + $0x40] sm:$0xff] }
 0x13c   :  { %v357_v16 = vadd.f32 %v4782_v31, %v309_v63  ;;  %v358_v22 = vadd.f32 %v4795_v36, %v310_v20  ;;  %v359_v62 = vadd.f32 %v4826_v48, %v311_v57  ;;  %v363_v32 = vadd.f32 %v4878_v4, %v315_v26  ;;  %v378_v26 = vld [vmem:[%s6285_s3 + $0x28] sm:$0xff]  ;;  %v383_v20 = vld [vmem:[%s6285_s3 + $0x50] sm:$0xff]  ;;  %v384_v57 = vld [vmem:[%s6285_s3 + $0x58] sm:$0xff] }
 0x13d   :  { %v360_v38 = vadd.f32 %v4821_v46, %v312_v59  ;;  %v361_v42 = vadd.f32 %v4852_v58, %v313_v0  ;;  %v362_v41 = vadd.f32 %v4847_v56, %v314_v5  ;;  %v364_v52 = vadd.f32 %v4873_v2, %v316_v13  ;;  %v374_v46 = vld [vmem:[%s6285_s3 + $0x8] sm:$0xff]  ;;  %v375_v56 = vld [vmem:[%s6285_s3 + $0x10] sm:$0xff]  ;;  %v376_v58 = vld [vmem:[%s6285_s3 + $0x18] sm:$0xff] }
 0x13e   :  { %v365_v3 = vmax.f32 %v357_v16, 0.0  ;;  %v366_v51 = vmax.f32 %v358_v22, 0.0  ;;  %v367_v34 = vmax.f32 %v359_v62, 0.0  ;;  %v371_v61 = vmax.f32 %v363_v32, 0.0  ;;  %v377_v2 = vld [vmem:[%s6285_s3 + $0x20] sm:$0xff]  ;;  %v382_v63 = vld [vmem:[%s6285_s3 + $0x48] sm:$0xff] }
 0x13f   :  { %v368_v6 = vmax.f32 %v360_v38, 0.0  ;;  %v369_v31 = vmax.f32 %v361_v42, 0.0  ;;  %v370_v40 = vmax.f32 %v362_v41, 0.0  ;;  %v372_v36 = vmax.f32 %v364_v52, 0.0  ;;  %v385_v59 = vld [vmem:[%s6285_s3 + $0x60] sm:$0xff]  ;;  %v386_v0 = vld [vmem:[%s6285_s3 + $0x68] sm:$0xff] }
 0x140   :  { %v4231_v27 = vpack.c.bf16 %v366_v51, %v365_v3  ;;  %v387_v5 = vld [vmem:[%s6285_s3 + $0x70] sm:$0xff]  ;;  %v388_v13 = vld [vmem:[%s6285_s3 + $0x78] sm:$0xff]  ;;  %v389_v16 = vld [vmem:[%s6285_s3 + $0x80] sm:$0xff] }
 0x141   :  { %v4235_v48 = vpack.c.bf16 %v368_v6, %v367_v34  ;;  %v4239_v33 = vpack.c.bf16 %v370_v40, %v369_v31  ;;  %v4243_v4 = vpack.c.bf16 %v372_v36, %v371_v61  ;;  %v390_v22 = vld [vmem:[%s6285_s3 + $0x88] sm:$0xff]  ;;  %v391_v62 = vld [vmem:[%s6285_s3 + $0x90] sm:$0xff]  ;;  %v392_v32 = vld [vmem:[%s6285_s3 + $0x98] sm:$0xff] }
 0x142   :  { %4232 = vmatprep.subr.bf16.mxu1 %v4231_v27  ;;  %v393_v38 = vld [vmem:[%s6285_s3 + $0xa0] sm:$0xff]  ;;  %v394_v42 = vld [vmem:[%s6285_s3 + $0xa8] sm:$0xff]  ;;  %v395_v41 = vld [vmem:[%s6285_s3 + $0xb0] sm:$0xff] }
 0x143   :  { %4234 = vmatpush3.bf16.msra.mxu1 %v4231_v27  ;;  %v396_v52 = vld [vmem:[%s6285_s3 + $0xb8] sm:$0xff]  ;;  %v397_v3 = vld [vmem:[%s6285_s3 + $0xc0] sm:$0xff]  ;;  %v398_v51 = vld [vmem:[%s6285_s3 + $0xc8] sm:$0xff] }
 0x144   :  { %4236 = vmatprep.subr.bf16.mxu1 %v4235_v48  ;;  %v399_v34 = vld [vmem:[%s6285_s3 + $0xd0] sm:$0xff]  ;;  %v400_v61 = vld [vmem:[%s6285_s3 + $0xd8] sm:$0xff]  ;;  %v401_v6 = vld [vmem:[%s6285_s3 + $0xe0] sm:$0xff] }
 0x145   :  { %v402_v31 = vld [vmem:[%s6285_s3 + $0xe8] sm:$0xff]  ;;  %v403_v40 = vld [vmem:[%s6285_s3 + $0xf0] sm:$0xff]  ;;  %v404_v36 = vld [vmem:[%s6285_s3 + $0xf8] sm:$0xff] }
 0x146   :  { %v919_v27 = vld [vmem:[%s6286_s4 + $0x8] sm:$0xff] }
 0x147   :  { %4238 = vmatpush3.bf16.msra.mxu1 %v4235_v48  ;;  %998 = vmatprep.mubr.f32.mxu0 %v919_v27 }
 0x148   :  { %4240 = vmatprep.subr.bf16.mxu1 %v4239_v33 }
 0x14b   :  { %4242 = vmatpush3.bf16.msra.mxu1 %v4239_v33 }
 0x14c   :  { %4244 = vmatprep.subr.bf16.mxu1 %v4243_v4 }
 0x14f   :  { %4246 = vmatpush3.bf16.msra.mxu1 %v4243_v4 }
 0x152   :  { %3984 = vmatmul.mubr.msk.f32.vlgmr.msra.gmra.mrb[0].mxu1 %vm51_vm0, %v374_v46 }
 0x153   :  { %3986 = vmatprep.mubr.msk.f32.mxu1 %vm51_vm0, %v375_v56 }
 0x156   :  { %3987 = vmatmul.mubr.msk.f32.gmra.mrb[2].mxu1 %vm51_vm0, %v376_v58 }
 0x157   :  { %3989 = vmatprep.mubr.msk.f32.mxu1 %vm51_vm0, %v377_v2 }
 0x15a   :  { %3990 = vmatmul.mubr.msk.f32.gmra.mrb[4].mxu1 %vm51_vm0, %v378_v26 }
 0x15b   :  { %3992 = vmatprep.mubr.msk.f32.mxu1 %vm51_vm0, %v379_v49 }
 0x15e   :  { %3993 = vmatmul.mubr.msk.f32.gmra.mrb[6].mxu1 %vm51_vm0, %v380_v11 }
 0x15f   :  { %3995 = vmatprep.mubr.msk.f32.mxu1 %vm51_vm0, %v381_v24 }
 0x162   :  { %3996 = vmatmul.mubr.msk.f32.gmra.mrb[8].mxu1 %vm51_vm0, %v382_v63 }
 0x163   :  { %3998 = vmatprep.mubr.msk.f32.mxu1 %vm51_vm0, %v383_v20 }
 0x166   :  { %3999 = vmatmul.mubr.msk.f32.gmra.mrb[10].mxu1 %vm51_vm0, %v384_v57 }
 0x167   :  { %4001 = vmatprep.mubr.msk.f32.mxu1 %vm51_vm0, %v385_v59 }
 0x16a   :  { %4002 = vmatmul.mubr.msk.f32.gmra.mrb[12].mxu1 %vm51_vm0, %v386_v0 }
 0x16b   :  { %4004 = vmatprep.mubr.msk.f32.mxu1 %vm51_vm0, %v387_v5 }
 0x16e   :  { %4005 = vmatmul.mubr.msk.f32.gmra.mrb[14].mxu1 %vm51_vm0, %v388_v13 }
 0x16f   :  { %4007 = vmatprep.mubr.msk.f32.mxu1 %vm51_vm0, %v389_v16 }
 0x172   :  { %4008 = vmatmul.mubr.msk.f32.gmra.mrb[16].mxu1 %vm51_vm0, %v390_v22 }
 0x173   :  { %4010 = vmatprep.mubr.msk.f32.mxu1 %vm51_vm0, %v391_v62 }
 0x176   :  { %4011 = vmatmul.mubr.msk.f32.gmra.mrb[18].mxu1 %vm51_vm0, %v392_v32 }
 0x177   :  { %4013 = vmatprep.mubr.msk.f32.mxu1 %vm51_vm0, %v393_v38 }
 0x17a   :  { %4014 = vmatmul.mubr.msk.f32.gmra.mrb[20].mxu1 %vm51_vm0, %v394_v42 }
 0x17b   :  { %4016 = vmatprep.mubr.msk.f32.mxu1 %vm51_vm0, %v395_v41 }
 0x17e   :  { %4017 = vmatmul.mubr.msk.f32.gmra.mrb[22].mxu1 %vm51_vm0, %v396_v52 }
 0x17f   :  { %4019 = vmatprep.mubr.msk.f32.mxu1 %vm51_vm0, %v397_v3 }
 0x182   :  { %4020 = vmatmul.mubr.msk.f32.gmra.mrb[24].mxu1 %vm51_vm0, %v398_v51 }
 0x183   :  { %4022 = vmatprep.mubr.msk.f32.mxu1 %vm51_vm0, %v399_v34 }
 0x186   :  { %4023 = vmatmul.mubr.msk.f32.gmra.mrb[26].mxu1 %vm51_vm0, %v400_v61 }
 0x187   :  { %4025 = vmatprep.mubr.msk.f32.mxu1 %vm51_vm0, %v401_v6 }
 0x18a   :  { %4026 = vmatmul.mubr.msk.f32.gmra.mrb[28].mxu1 %vm51_vm0, %v402_v31 }
 0x18b   :  { %4028 = vmatprep.mubr.msk.f32.mxu1 %vm51_vm0, %v403_v40 }
 0x18e   :  { %4029 = vmatmul.mubr.msk.f32.gmra.mrb[30].mxu1 %vm51_vm0, %v404_v36 }
 0x225   :  { %v3985_v48 = vpop.f32.mrb[0].mxu1 }
 0x226   :  { %v759_v33 = vpop.f32.mrb[1].mxu1  ;;  %v5348_v13 = vadd.f32 %v3985_v48, %v4899_v12 }
 0x227   :  { %v5351_v16 = vadd.f32 %v759_v33, %v4904_v14 }
 0x229   :  { %v3988_v4 = vpop.f32.mrb[2].mxu1  ;;  %v4249_v41 = vpack.c.bf16 %v5348_v13, %v5351_v16 }
 0x22a   :  { %v769_v46 = vpop.f32.mrb[3].mxu1  ;;  %v5364_v12 = vadd.f32 %v3988_v4, %v4929_v23 }
 0x22b   :  { %v5367_v14 = vadd.f32 %v769_v46, %v4934_v25 }
 0x22d   :  { %v3991_v56 = vpop.f32.mrb[4].mxu1  ;;  %v4253_v23 = vpack.c.bf16 %v5364_v12, %v5367_v14 }
 0x22e   :  { %v779_v58 = vpop.f32.mrb[5].mxu1  ;;  %v5380_v34 = vadd.f32 %v3991_v56, %v4955_v35 }
 0x22f   :  { %v5383_v25 = vadd.f32 %v779_v58, %v4960_v39 }
 0x231   :  { %v3994_v2 = vpop.f32.mrb[6].mxu1  ;;  %v4257_v35 = vpack.c.bf16 %v5380_v34, %v5383_v25 }
 0x232   :  { %v789_v26 = vpop.f32.mrb[7].mxu1  ;;  %v5396_v40 = vadd.f32 %v3994_v2, %v4989_v60 }
 0x233   :  { %v5399_v39 = vadd.f32 %v789_v26, %v4996_v1 }
 0x235   :  { %v3997_v49 = vpop.f32.mrb[8].mxu1  ;;  %v4261_v60 = vpack.c.bf16 %v5396_v40, %v5399_v39 }
 0x236   :  { %v799_v11 = vpop.f32.mrb[9].mxu1  ;;  %v5412_v33 = vadd.f32 %v3997_v49, %v5023_v47 }
 0x237   :  { %v5415_v1 = vadd.f32 %v799_v11, %v5029_v55  ;;  %v6334_v11 = vld [vmem:[#allocation4_spill] sm:$0xff] }
 0x239   :  { %v4000_v24 = vpop.f32.mrb[10].mxu1  ;;  %v4265_v47 = vpack.c.bf16 %v5412_v33, %v5415_v1 }
 0x23a   :  { %v809_v63 = vpop.f32.mrb[11].mxu1  ;;  %v5428_v58 = vadd.f32 %v4000_v24, %v5050_v30  ;;  %v6336_v24 = vld [vmem:[#allocation2_spill] sm:$0xff] }
 0x23b   :  { %v5431_v55 = vadd.f32 %v809_v63, %v5055_v37 }
 0x23c   :  { %6329 = vst [vmem:[#allocation13_spill] sm:$0xff] %v5428_v58 }
 0x23d   :  { %v5339_v20 = vpop.f32.mrb[12].mxu1  ;;  %6330 = vst [vmem:[#allocation14_spill] sm:$0xff] %v5431_v55  ;;  %v4269_v30 = vpack.c.bf16 %v5428_v58, %v5431_v55 }
 0x23e   :  { %v5341_v57 = vpop.f32.mrb[13].mxu1  ;;  %v5445_v37 = vadd.f32 %v5339_v20, %v5108_v50 }
 0x240   :  { %6333 = vst [vmem:[#allocation17_spill] sm:$0xff] %v5445_v37 }
 0x241   :  { %v5343_v59 = vpop.f32.mrb[14].mxu1 }
 0x242   :  { %v5345_v0 = vpop.f32.mrb[15].mxu1  ;;  %v5463_v20 = vadd.f32 %v5343_v59, %v5145_v15  ;;  %v920_v59 = vld [vmem:[%s6286_s4 + $0x10] sm:$0xff] }
 0x244   :  { %6340 = vst [vmem:[#allocation18_spill] sm:$0xff] %v5463_v20 }
 0x245   :  { %v4009_v5 = vpop.f32.mrb[16].mxu1 }
 0x246   :  { %v5354_v22 = vadd.f32 %v4009_v5, %v4886_v7  ;;  %v839_v62 = vpop.f32.mrb[17].mxu1  ;;  %v6338_v5 = vld [vmem:[#allocation3_spill] sm:$0xff] }
 0x247   :  { %v5357_v32 = vadd.f32 %v839_v62, %v4888_v8 }
 0x249   :  { %v4247_v38 = vpack.c.bf16 %v5354_v22, %v5357_v32  ;;  %v4012_v42 = vpop.f32.mrb[18].mxu1 }
 0x24a   :  { %v5370_v7 = vadd.f32 %v4012_v42, %v4912_v17  ;;  %v849_v52 = vpop.f32.mrb[19].mxu1 }
 0x24b   :  { %v5373_v8 = vadd.f32 %v849_v52, %v4914_v18  ;;  %4248 = vmatprep.subr.bf16.mxu0 %v4247_v38 }
 0x24c   :  { %4250 = vmatpush3.bf16.msra.mxu0 %v4249_v41 }
 0x24d   :  { %v4251_v3 = vpack.c.bf16 %v5370_v7, %v5373_v8  ;;  %v4015_v51 = vpop.f32.mrb[20].mxu1 }
 0x24e   :  { %v5386_v17 = vadd.f32 %v4015_v51, %v4942_v28  ;;  %v859_v18 = vpop.f32.mrb[21].mxu1 }
 0x24f   :  { %v5389_v61 = vadd.f32 %v859_v18, %v4944_v29  ;;  %4252 = vmatprep.subr.bf16.mxu0 %v4251_v3  ;;  %v6343_v3 = vld [vmem:[#allocation5_spill] sm:$0xff]  ;;  %v922_v18 = vld [vmem:[%s6286_s4 + $0x20] sm:$0xff] }
 0x250   :  { %4254 = vmatpush3.bf16.msra.mxu0 %v4253_v23 }
 0x251   :  { %v4255_v6 = vpack.c.bf16 %v5386_v17, %v5389_v61  ;;  %v4018_v31 = vpop.f32.mrb[22].mxu1 }
 0x252   :  { %v5402_v28 = vadd.f32 %v4018_v31, %v4968_v44  ;;  %v869_v29 = vpop.f32.mrb[23].mxu1  ;;  %v924_v31 = vld [vmem:[%s6286_s4 + $0x30] sm:$0xff] }
 0x253   :  { %v5405_v36 = vadd.f32 %v869_v29, %v4970_v45  ;;  %4256 = vmatprep.subr.bf16.mxu0 %v4255_v6  ;;  %v925_v6 = vld [vmem:[%s6286_s4 + $0x38] sm:$0xff]  ;;  %v926_v29 = vld [vmem:[%s6286_s4 + $0x40] sm:$0xff] }
 0x254   :  { %4258 = vmatpush3.bf16.msra.mxu0 %v4257_v35  ;;  %v927_v35 = vld [vmem:[%s6286_s4 + $0x48] sm:$0xff] }
 0x255   :  { %v4259_v27 = vpack.c.bf16 %v5402_v28, %v5405_v36  ;;  %v4021_v48 = vpop.f32.mrb[24].mxu1 }
 0x256   :  { %v5418_v44 = vadd.f32 %v4021_v48, %v5007_v19  ;;  %v879_v45 = vpop.f32.mrb[25].mxu1  ;;  %v928_v48 = vld [vmem:[%s6286_s4 + $0x50] sm:$0xff] }
 0x257   :  { %v5421_v4 = vadd.f32 %v879_v45, %v5010_v21  ;;  %4260 = vmatprep.subr.bf16.mxu0 %v4259_v27  ;;  %v929_v27 = vld [vmem:[%s6286_s4 + $0x58] sm:$0xff]  ;;  %v930_v45 = vld [vmem:[%s6286_s4 + $0x60] sm:$0xff] }
 0x258   :  { %6327 = vst [vmem:[#allocation11_spill] sm:$0xff] %v5418_v44  ;;  %4262 = vmatpush3.bf16.msra.mxu0 %v4261_v60  ;;  %v931_v60 = vld [vmem:[%s6286_s4 + $0x68] sm:$0xff] }
 0x259   :  { %6328 = vst [vmem:[#allocation12_spill] sm:$0xff] %v5421_v4  ;;  %v4263_v46 = vpack.c.bf16 %v5418_v44, %v5421_v4  ;;  %v4024_v56 = vpop.f32.mrb[26].mxu1 }
 0x25a   :  { %v5434_v19 = vadd.f32 %v4024_v56, %v5037_v9  ;;  %v889_v21 = vpop.f32.mrb[27].mxu1  ;;  %v5449_v9 = vadd.f32 %v5341_v57, %v6334_v11  ;;  %v5467_v57 = vadd.f32 %v5345_v0, %v5150_v43  ;;  %v918_v43 = vld [vmem:[%s6286_s4] sm:$0xff]  ;;  %v923_v0 = vld [vmem:[%s6286_s4 + $0x28] sm:$0xff]  ;;  %v932_v56 = vld [vmem:[%s6286_s4 + $0x70] sm:$0xff] }
 0x25b   :  { %v5437_v2 = vadd.f32 %v889_v21, %v5039_v10  ;;  %4264 = vmatprep.subr.bf16.mxu0 %v4263_v46  ;;  %v933_v46 = vld [vmem:[%s6286_s4 + $0x78] sm:$0xff] }
 0x25c   :  { %6331 = vst [vmem:[#allocation15_spill] sm:$0xff] %v5434_v19  ;;  %4266 = vmatpush3.bf16.msra.mxu0 %v4265_v47  ;;  %6335 = vst [vmem:[#allocation4_spill] sm:$0xff] %v5449_v9  ;;  %v4273_v50 = vpack.c.bf16 %v5445_v37, %v5449_v9  ;;  %v4277_v15 = vpack.c.bf16 %v5463_v20, %v5467_v57  ;;  %v1229_v47 = vld [vmem:[%s6287_s5] sm:$0xff] }
 0x25d   :  { %6332 = vst [vmem:[#allocation16_spill] sm:$0xff] %v5437_v2  ;;  %v4267_v26 = vpack.c.bf16 %v5434_v19, %v5437_v2  ;;  %v4027_v49 = vpop.f32.mrb[28].mxu1  ;;  %6341 = vst [vmem:[#allocation19_spill] sm:$0xff] %v5467_v57 }
 0x25e   :  { %v5452_v10 = vadd.f32 %v4027_v49, %v6336_v24  ;;  %v899_v63 = vpop.f32.mrb[29].mxu1 }
 0x25f   :  { %v5455_v62 = vadd.f32 %v899_v63, %v6338_v5  ;;  %4268 = vmatprep.subr.bf16.mxu0 %v4267_v26 }
 0x260   :  { %6337 = vst [vmem:[#allocation2_spill] sm:$0xff] %v5452_v10  ;;  %4270 = vmatpush3.bf16.msra.mxu0 %v4269_v30 }
 0x261   :  { %6339 = vst [vmem:[#allocation3_spill] sm:$0xff] %v5455_v62  ;;  %v4271_v38 = vpack.c.bf16 %v5452_v10, %v5455_v62  ;;  %v4030_v42 = vpop.f32.mrb[30].mxu1 }
 0x262   :  { %v5470_v41 = vadd.f32 %v4030_v42, %v5130_v53  ;;  %v909_v52 = vpop.f32.mrb[31].mxu1  ;;  %v921_v53 = vld [vmem:[%s6286_s4 + $0x18] sm:$0xff] }
 0x263   :  { %v5473_v51 = vadd.f32 %v909_v52, %v6343_v3  ;;  %4272 = vmatprep.subr.bf16.mxu0 %v4271_v38 }
 0x264   :  { %6342 = vst [vmem:[#allocation20_spill] sm:$0xff] %v5470_v41  ;;  %4274 = vmatpush3.bf16.msra.mxu0 %v4273_v50 }
 0x265   :  { %6344 = vst [vmem:[#allocation5_spill] sm:$0xff] %v5473_v51  ;;  %v4275_v23 = vpack.c.bf16 %v5470_v41, %v5473_v51  ;;  %v6347_v41 = vld [vmem:[#allocation10_spill] sm:$0xff] }
 0x267   :  { %4276 = vmatprep.subr.bf16.mxu0 %v4275_v23 }
 0x268   :  { %4278 = vmatpush3.bf16.msra.mxu0 %v4277_v15 }
 0x26b   :  { %999 = vmatmul.mubr.f32.vlgmr.msra.gmra.mrb[8].mxu0 %v918_v43 }
 0x26c   :  { %1003 = vmatprep.mubr.f32.mxu0 %v921_v53 }
 0x26f   :  { %1004 = vmatmul.mubr.f32.gmra.mrb[10].mxu0 %v920_v59 }
 0x270   :  { %1008 = vmatprep.mubr.f32.mxu0 %v923_v0 }
 0x273   :  { %1009 = vmatmul.mubr.f32.gmra.mrb[12].mxu0 %v922_v18 }
 0x274   :  { %1013 = vmatprep.mubr.f32.mxu0 %v925_v6 }
 0x277   :  { %1014 = vmatmul.mubr.f32.gmra.mrb[14].mxu0 %v924_v31 }
 0x278   :  { %1018 = vmatprep.mubr.f32.mxu0 %v927_v35 }
 0x27b   :  { %1019 = vmatmul.mubr.f32.gmra.mrb[16].mxu0 %v926_v29 }
 0x27c   :  { %1023 = vmatprep.mubr.f32.mxu0 %v929_v27 }
 0x27f   :  { %1024 = vmatmul.mubr.f32.gmra.mrb[18].mxu0 %v928_v48 }
 0x280   :  { %1028 = vmatprep.mubr.f32.mxu0 %v931_v60 }
 0x283   :  { %1029 = vmatmul.mubr.f32.gmra.mrb[20].mxu0 %v930_v45 }
 0x284   :  { %1033 = vmatprep.mubr.f32.mxu0 %v933_v46 }
 0x287   :  { %1034 = vmatmul.mubr.f32.gmra.mrb[22].mxu0 %v932_v56 }
 0x288   :  { %4047 = vmatprep.mubr.msk.f32.mxu0 %vm51_vm0, %v1229_v47 }
 0x33e   :  { %v3712_v21 = vpop.f32.mrb[8].mxu0 }
 0x33f   :  { %v3713_v26 = vpop.f32.mrb[9].mxu0 }
 0x340   :  { %v3714_v49 = vadd.f32 %v3713_v26, %v3712_v21 }
 0x342   :  { %v3715_v30 = vpop.f32.mrb[10].mxu0  ;;  %v1055_v63 = vsel %vm197_vm1, %v3714_v49, 0.0 }
 0x343   :  { %v3716_v11 = vpop.f32.mrb[11].mxu0 }
 0x344   :  { %v3717_v24 = vadd.f32 %v3716_v11, %v3715_v30 }
 0x346   :  { %v1056_v5 = vsel %vm197_vm1, %v3717_v24, 0.0  ;;  %v3718_v38 = vpop.f32.mrb[12].mxu0 }
 0x347   :  { %v1057_v42 = vadd.f32 %v1056_v5, %v1055_v63  ;;  %v3719_v50 = vpop.f32.mrb[13].mxu0 }
 0x348   :  { %v3720_v52 = vadd.f32 %v3719_v50, %v3718_v38 }
 0x34a   :  { %v1058_v3 = vsel %vm197_vm1, %v3720_v52, 0.0  ;;  %v3721_v23 = vpop.f32.mrb[14].mxu0 }
 0x34b   :  { %v1059_v15 = vadd.f32 %v1058_v3, %v1057_v42  ;;  %v3722_v43 = vpop.f32.mrb[15].mxu0 }
 0x34c   :  { %v3723_v53 = vadd.f32 %v3722_v43, %v3721_v23 }
 0x34e   :  { %v1060_v59 = vsel %vm197_vm1, %v3723_v53, 0.0  ;;  %v3724_v0 = vpop.f32.mrb[16].mxu0 }
 0x34f   :  { %v1061_v18 = vadd.f32 %v1060_v59, %v1059_v15  ;;  %v3725_v6 = vpop.f32.mrb[17].mxu0 }
 0x350   :  { %v3726_v31 = vadd.f32 %v3725_v6, %v3724_v0 }
 0x352   :  { %v1062_v35 = vsel %vm197_vm1, %v3726_v31, 0.0  ;;  %v3727_v29 = vpop.f32.mrb[18].mxu0 }
 0x353   :  { %v1063_v27 = vadd.f32 %v1062_v35, %v1061_v18  ;;  %v3728_v48 = vpop.f32.mrb[19].mxu0 }
 0x354   :  { %v3729_v60 = vadd.f32 %v3728_v48, %v3727_v29 }
 0x356   :  { %v1064_v45 = vsel %vm197_vm1, %v3729_v60, 0.0  ;;  %v3730_v46 = vpop.f32.mrb[20].mxu0 }
 0x357   :  { %v1065_v56 = vadd.f32 %v1064_v45, %v1063_v27  ;;  %v3731_v47 = vpop.f32.mrb[21].mxu0 }
 0x358   :  { %v3732_v21 = vadd.f32 %v3731_v47, %v3730_v46 }
 0x35a   :  { %v1066_v26 = vsel %vm197_vm1, %v3732_v21, 0.0  ;;  %v3733_v30 = vpop.f32.mrb[22].mxu0 }
 0x35b   :  { %v1067_v11 = vadd.f32 %v1066_v26, %v1065_v56  ;;  %v3734_v63 = vpop.f32.mrb[23].mxu0 }
 0x35c   :  { %v3735_v5 = vadd.f32 %v3734_v63, %v3733_v30 }
 0x35e   :  { %v1068_v38 = vsel %vm197_vm1, %v3735_v5, 0.0 }
 0x35f   :  { %v1069_v42 = vadd.f32 %v1068_v38, %v1067_v11 }
 0x361   :  { %v1070_v50 = vrot.slane %v1069_v42, 4 }
 0x363   :  { %v1071_v3 = vadd.f32 %v1070_v50, %v1069_v42 }
 0x365   :  { %v1072_v23 = vrot.slane %v1071_v3, 2 }
 0x367   :  { %v1073_v15 = vadd.f32 %v1072_v23, %v1071_v3 }
 0x369   :  { %v1074_v43 = vrot.slane %v1073_v15, 1 }
 0x36b   :  { %v1075_v59 = vadd.f32 %v1074_v43, %v1073_v15 }
 0x36d   :  { %v1076_v0 = vmul.f32 0.015625, %v1075_v59 }
 0x36f   :  { %v1077_v18 = vsub.f32 %v3714_v49, %v1076_v0  ;;  %v1078_v6 = vsub.f32 %v3717_v24, %v1076_v0  ;;  %v1079_v35 = vsub.f32 %v3720_v52, %v1076_v0  ;;  %v1080_v29 = vsub.f32 %v3723_v53, %v1076_v0 }
 0x370   :  { %v1081_v27 = vsub.f32 %v3726_v31, %v1076_v0  ;;  %v1082_v48 = vsub.f32 %v3729_v60, %v1076_v0  ;;  %v1083_v45 = vsub.f32 %v3732_v21, %v1076_v0  ;;  %v1084_v46 = vsub.f32 %v3735_v5, %v1076_v0 }
 0x371   :  { %v1085_v56 = vmul.f32 %v1077_v18, %v1077_v18  ;;  %v1086_v47 = vmul.f32 %v1078_v6, %v1078_v6  ;;  %v1087_v26 = vmul.f32 %v1079_v35, %v1079_v35  ;;  %v1088_v30 = vmul.f32 %v1080_v29, %v1080_v29 }
 0x372   :  { %v1089_v42 = vmul.f32 %v1081_v27, %v1081_v27  ;;  %v1090_v24 = vmul.f32 %v1082_v48, %v1082_v48  ;;  %v1091_v31 = vmul.f32 %v1083_v45, %v1083_v45  ;;  %v1092_v5 = vmul.f32 %v1084_v46, %v1084_v46 }
 0x373   :  { %v1093_v11 = vsel %vm197_vm1, %v1085_v56, 0.0  ;;  %v1094_v63 = vsel %vm197_vm1, %v1086_v47, 0.0  ;;  %v1096_v50 = vsel %vm197_vm1, %v1087_v26, 0.0  ;;  %v1098_v52 = vsel %vm197_vm1, %v1088_v30, 0.0 }
 0x374   :  { %v1095_v38 = vadd.f32 %v1094_v63, %v1093_v11  ;;  %v1100_v60 = vsel %vm197_vm1, %v1089_v42, 0.0  ;;  %v1102_v3 = vsel %vm197_vm1, %v1090_v24, 0.0  ;;  %v1104_v15 = vsel %vm197_vm1, %v1091_v31, 0.0  ;;  %v1191_v11 = vpop.permute.xlu1 %1190  ;;  %v1186_v63 = vpop.permute.xlu0 %1185 }
 0x375   :  { %v1106_v59 = vsel %vm197_vm1, %v1092_v5, 0.0 }
 0x376   :  { %v1097_v49 = vadd.f32 %v1096_v50, %v1095_v38 }
 0x378   :  { %v1099_v53 = vadd.f32 %v1098_v52, %v1097_v49  ;;  %v1153_v42 = vpop.permute.xlu1 %1152  ;;  %v1148_v52 = vpop.permute.xlu0 %1147 }
 0x37a   :  { %v1101_v21 = vadd.f32 %v1100_v60, %v1099_v53 }
 0x37c   :  { %v1103_v23 = vadd.f32 %v1102_v3, %v1101_v21  ;;  %v1201_v24 = vpop.permute.xlu1 %1200  ;;  %v1196_v60 = vpop.permute.xlu0 %1195 }
 0x37e   :  { %v1105_v43 = vadd.f32 %v1104_v15, %v1103_v23 }
 0x380   :  { %v1107_v0 = vadd.f32 %v1106_v59, %v1105_v43  ;;  %v1163_v31 = vpop.permute.xlu1 %1162  ;;  %v1158_v21 = vpop.permute.xlu0 %1157 }
 0x382   :  { %v1108_v56 = vrot.slane %v1107_v0, 4 }
 0x384   :  { %v1109_v47 = vadd.f32 %v1108_v56, %v1107_v0 }
 0x386   :  { %v1110_v26 = vrot.slane %v1109_v47, 2 }
 0x388   :  { %v1111_v30 = vadd.f32 %v1110_v26, %v1109_v47 }
 0x38a   :  { %v1112_v38 = vrot.slane %v1111_v30, 1 }
 0x38c   :  { %v1113_v50 = vadd.f32 %v1112_v38, %v1111_v30  ;;  %v6345_v30 = vld [vmem:[#allocation7_spill] sm:$0xff] }
 0x38e   :  { %v1114_v49 = vmul.f32 0.015625, %v1113_v50  ;;  %v6346_v50 = vld [vmem:[#allocation6_spill] sm:$0xff] }
 0x390   :  { %v1115_v53 = vadd.f32 1e-05, %v1114_v49 }
 0x392   :  { %4412 = vrsqrt.f32 %v1115_v53  ;;  %v1211_v53 = vpop.permute.xlu1 %1210 }
 0x39c   :  { %v4413_v3 = vpop.eup %4412 }
 0x39d   :  { %v1124_v5 = vmul.f32 %v4413_v3, %v1084_v46  ;;  %v1117_v23 = vmul.f32 %v4413_v3, %v1077_v18  ;;  %v1118_v15 = vmul.f32 %v4413_v3, %v1078_v6  ;;  %v1119_v43 = vmul.f32 %v4413_v3, %v1079_v35  ;;  %v1206_v18 = vpop.permute.xlu0 %1205  ;;  %v6348_v6 = vld [vmem:[#allocation9_spill] sm:$0xff] }
 0x39e   :  { %v1120_v59 = vmul.f32 %v4413_v3, %v1080_v29  ;;  %v1121_v0 = vmul.f32 %v4413_v3, %v1081_v27  ;;  %v1122_v56 = vmul.f32 %v4413_v3, %v1082_v48  ;;  %v1123_v47 = vmul.f32 %v4413_v3, %v1083_v45  ;;  %v6349_v29 = vld [vmem:[#allocation8_spill] sm:$0xff] }
 0x39f   :  { %v1172_v26 = vmul.f32 %v1163_v31, %v1124_v5  ;;  %v1165_v38 = vmul.f32 %v6345_v30, %v1117_v23  ;;  %v1166_v51 = vmul.f32 %v6346_v50, %v1118_v15  ;;  %v1167_v49 = vmul.f32 %v5186_v54, %v1119_v43 }
 0x3a0   :  { %v1168_v57 = vmul.f32 %v6347_v41, %v1120_v59  ;;  %v1169_v20 = vmul.f32 %v1148_v52, %v1121_v0  ;;  %v1170_v62 = vmul.f32 %v1153_v42, %v1122_v56  ;;  %v1171_v46 = vmul.f32 %v1158_v21, %v1123_v47 }
 0x3a1   :  { %v1213_v35 = vadd.f32 %v6348_v6, %v1165_v38  ;;  %v1214_v27 = vadd.f32 %v6349_v29, %v1166_v51  ;;  %v1215_v48 = vadd.f32 %v1186_v63, %v1167_v49  ;;  %v1220_v45 = vadd.f32 %v1211_v53, %v1172_v26 }
 0x3a2   :  { %v1216_v31 = vadd.f32 %v1191_v11, %v1168_v57  ;;  %v1217_v3 = vadd.f32 %v1196_v60, %v1169_v20  ;;  %v1218_v5 = vadd.f32 %v1201_v24, %v1170_v62  ;;  %v1219_v23 = vadd.f32 %v1206_v18, %v1171_v46  ;;  %v1230_v62 = vld [vmem:[%s6287_s5 + $0x8] sm:$0xff]  ;;  %v1371_v20 = vld [vmem:[%s6288_s6] sm:$0xff] }
 0x3a3   :  { %v1221_v15 = vmax.f32 %v1213_v35, 0.0  ;;  %v1222_v30 = vmax.f32 %v1214_v27, 0.0  ;;  %v1223_v54 = vmax.f32 %v1215_v48, 0.0  ;;  %v1228_v43 = vmax.f32 %v1220_v45, 0.0 }
 0x3a4   :  { %v1224_v50 = vmax.f32 %v1216_v31, 0.0  ;;  %v1225_v41 = vmax.f32 %v1217_v3, 0.0  ;;  %v1226_v52 = vmax.f32 %v1218_v5, 0.0  ;;  %v1227_v42 = vmax.f32 %v1219_v23, 0.0 }
 0x3a5   :  { %v4279_v21 = vpack.c.bf16 %v1222_v30, %v1221_v15 }
 0x3a6   :  { %v4283_v59 = vpack.c.bf16 %v1224_v50, %v1223_v54  ;;  %v4287_v0 = vpack.c.bf16 %v1226_v52, %v1225_v41  ;;  %v4291_v56 = vpack.c.bf16 %v1228_v43, %v1227_v42  ;;  %v1353_v50 = vpop.permute.xlu1 %1352  ;;  %v1348_v41 = vpop.permute.xlu0 %1347 }
 0x3a7   :  { %4280 = vmatprep.subr.bf16.mxu0 %v4279_v21 }
 0x3a8   :  { %4282 = vmatpush3.bf16.msra.mxu0 %v4279_v21 }
 0x3a9   :  { %4284 = vmatprep.subr.bf16.mxu0 %v4283_v59 }
 0x3ac   :  { %4286 = vmatpush3.bf16.msra.mxu0 %v4283_v59 }
 0x3ad   :  { %4288 = vmatprep.subr.bf16.mxu0 %v4287_v0 }
 0x3b0   :  { %4290 = vmatpush3.bf16.msra.mxu0 %v4287_v0 }
 0x3b1   :  { %4292 = vmatprep.subr.bf16.mxu0 %v4291_v56 }
 0x3b4   :  { %4294 = vmatpush3.bf16.msra.mxu0 %v4291_v56  ;;  %v1365_v56 = vpop.permute.xlu1 %1364 }
 0x3b7   :  { %4048 = vmatmul.mubr.msk.f32.vlgmr.msra.gmra.mrb[24].mxu0 %vm51_vm0, %v1230_v62  ;;  %v1360_v62 = vpop.permute.xlu0 %1359 }
 0x3b8   :  { %4054 = vmatprep.mubr.msk.f32.mxu0 %vm1375_vm2, %v1371_v20 }
 0x48a   :  { %v4049_v57 = vpop.f32.mrb[24].mxu0 }
 0x48b   :  { %v1317_v51 = vsel %vm197_vm1, %v4049_v57, 0.0  ;;  %v1303_v11 = vpop.f32.mrb[25].mxu0 }
 0x48c   :  { %v1316_v63 = vsel %vm197_vm1, %v1303_v11, 0.0 }
 0x48d   :  { %v1318_v24 = vadd.f32 %v1317_v51, %v1316_v63 }
 0x48f   :  { %v1319_v60 = vrot.slane %v1318_v24, 4 }
 0x491   :  { %v1320_v47 = vadd.f32 %v1319_v60, %v1318_v24  ;;  %v1372_v24 = vld [vmem:[%s6288_s6 + $0x8] sm:$0xff]  ;;  %v1373_v60 = vld [vmem:[%s6288_s6 + $0x10] sm:$0xff] }
 0x493   :  { %v1321_v26 = vrot.slane %v1320_v47, 2 }
 0x495   :  { %v1322_v38 = vadd.f32 %v1321_v26, %v1320_v47  ;;  %v1374_v47 = vld [vmem:[%s6288_s6 + $0x18] sm:$0xff]  ;;  %v1477_v26 = vld [vmem:[%s6289_s7] sm:$0xff] }
 0x497   :  { %v1323_v49 = vrot.slane %v1322_v38, 1 }
 0x499   :  { %v1324_v53 = vadd.f32 %v1323_v49, %v1322_v38 }
 0x49b   :  { %v1326_v46 = vmul.f32 0.0625, %v1324_v53 }
 0x49d   :  { %v1327_v18 = vsub.f32 %v1303_v11, %v1326_v46  ;;  %v1328_v6 = vsub.f32 %v4049_v57, %v1326_v46 }
 0x49f   :  { %v1329_v35 = vmul.f32 %v1327_v18, %v1327_v18  ;;  %v1330_v29 = vmul.f32 %v1328_v6, %v1328_v6 }
 0x4a1   :  { %v1331_v27 = vsel %vm197_vm1, %v1329_v35, 0.0  ;;  %v1332_v48 = vsel %vm197_vm1, %v1330_v29, 0.0 }
 0x4a2   :  { %v1333_v45 = vadd.f32 %v1332_v48, %v1331_v27 }
 0x4a4   :  { %v1334_v31 = vrot.slane %v1333_v45, 4 }
 0x4a6   :  { %v1335_v3 = vadd.f32 %v1334_v31, %v1333_v45  ;;  %v1478_v45 = vld [vmem:[%s6289_s7 + $0x8] sm:$0xff]  ;;  %v1563_v31 = vld [vmem:[%s6290_s8] sm:$0xff] }
 0x4a7   :  { %4075 = vmatprep.mubr.msk.f32.mxu1 %vm1375_vm2, %v1563_v31  ;;  %v3528_v31 = vld [vmem:[%s6286_s4 + $0x88] sm:$0xff] }
 0x4a8   :  { %v1336_v5 = vrot.slane %v1335_v3, 2 }
 0x4aa   :  { %v1337_v23 = vadd.f32 %v1336_v5, %v1335_v3 }
 0x4ac   :  { %v1338_v15 = vrot.slane %v1337_v23, 1 }
 0x4ae   :  { %v1339_v30 = vadd.f32 %v1338_v15, %v1337_v23 }
 0x4b0   :  { %v1340_v54 = vmul.f32 0.0625, %v1339_v30 }
 0x4b2   :  { %v1341_v43 = vadd.f32 1e-05, %v1340_v54  ;;  %v1564_v54 = vld [vmem:[%s6290_s8 + $0x8] sm:$0xff] }
 0x4b4   :  { %4414 = vrsqrt.f32 %v1341_v43  ;;  %v1565_v43 = vld [vmem:[%s6290_s8 + $0x10] sm:$0xff] }
 0x4be   :  { %v4415_v52 = vpop.eup %4414 }
 0x4bf   :  { %v1343_v42 = vmul.f32 %v4415_v52, %v1327_v18  ;;  %v1344_v21 = vmul.f32 %v4415_v52, %v1328_v6  ;;  %v1568_v52 = vld [vmem:[%s6290_s8 + $0x28] sm:$0xff] }
 0x4c1   :  { %v1355_v59 = vmul.f32 %v1348_v41, %v1343_v42  ;;  %v1356_v0 = vmul.f32 %v1353_v50, %v1344_v21  ;;  %v1566_v50 = vld [vmem:[%s6290_s8 + $0x18] sm:$0xff]  ;;  %v1567_v41 = vld [vmem:[%s6290_s8 + $0x20] sm:$0xff]  ;;  %v1569_v42 = vld [vmem:[%s6290_s8 + $0x30] sm:$0xff] }
 0x4c2   :  { %v1570_v21 = vld [vmem:[%s6290_s8 + $0x38] sm:$0xff] }
 0x4c3   :  { %v1367_v20 = vadd.f32 %v1360_v62, %v1355_v59  ;;  %v1368_v57 = vadd.f32 %v1365_v56, %v1356_v0  ;;  %v1571_v59 = vld [vmem:[%s6290_s8 + $0x40] sm:$0xff]  ;;  %v1572_v0 = vld [vmem:[%s6290_s8 + $0x48] sm:$0xff]  ;;  %v1573_v56 = vld [vmem:[%s6290_s8 + $0x50] sm:$0xff] }
 0x4c4   :  { %v1574_v62 = vld [vmem:[%s6290_s8 + $0x58] sm:$0xff] }
 0x4c5   :  { %v1369_v51 = vmax.f32 %v1367_v20, 0.0  ;;  %v1370_v11 = vmax.f32 %v1368_v57, 0.0  ;;  %v1575_v20 = vld [vmem:[%s6290_s8 + $0x60] sm:$0xff]  ;;  %v1576_v57 = vld [vmem:[%s6290_s8 + $0x68] sm:$0xff] }
 0x4c7   :  { %v4295_v63 = vpack.c.bf16 %v1370_v11, %v1369_v51  ;;  %v1577_v51 = vld [vmem:[%s6290_s8 + $0x70] sm:$0xff]  ;;  %v1578_v11 = vld [vmem:[%s6290_s8 + $0x78] sm:$0xff] }
 0x4c9   :  { %4296 = vmatprep.subr.bf16.mxu0 %v4295_v63 }
 0x4ca   :  { %4298 = vmatpush3.bf16.msra.mxu0 %v4295_v63  ;;  %v1579_v63 = vld [vmem:[%s6290_s8 + $0x80] sm:$0xff] }
 0x4cd   :  { %4055 = vmatmul.mubr.msk.f32.vlgmr.msra.gmra.mrb[26].mxu0 %vm1375_vm2, %v1372_v24  ;;  %v1580_v24 = vld [vmem:[%s6290_s8 + $0x88] sm:$0xff] }
 0x4ce   :  { %4057 = vmatprep.mubr.msk.f32.mxu0 %vm1375_vm2, %v1373_v60  ;;  %v1581_v60 = vld [vmem:[%s6290_s8 + $0x90] sm:$0xff] }
 0x4d1   :  { %4058 = vmatmul.mubr.msk.f32.gmra.mrb[28].mxu0 %vm1375_vm2, %v1374_v47  ;;  %v1582_v47 = vld [vmem:[%s6290_s8 + $0x98] sm:$0xff] }
 0x4d2   :  { %4068 = vmatprep.mubr.msk.f32.mxu0 %vm1479_vm3, %v1477_v26  ;;  %v1583_v26 = vld [vmem:[%s6290_s8 + $0xa0] sm:$0xff] }
 0x5a0   :  { %v4056_v38 = vpop.f32.mrb[26].mxu0 }
 0x5a1   :  { %4416 = vtanh.f32 %v4056_v38  ;;  %v1454_v49 = vpop.f32.mrb[27].mxu0  ;;  %v1584_v38 = vld [vmem:[%s6290_s8 + $0xa8] sm:$0xff] }
 0x5a2   :  { %4418 = vtanh.f32 %v1454_v49  ;;  %v1585_v49 = vld [vmem:[%s6290_s8 + $0xb0] sm:$0xff] }
 0x5a4   :  { %v4059_v53 = vpop.f32.mrb[28].mxu0 }
 0x5a5   :  { %4420 = vtanh.f32 %v4059_v53  ;;  %v1464_v46 = vpop.f32.mrb[29].mxu0  ;;  %v1586_v53 = vld [vmem:[%s6290_s8 + $0xb8] sm:$0xff] }
 0x5a6   :  { %4422 = vtanh.f32 %v1464_v46  ;;  %v1587_v46 = vld [vmem:[%s6290_s8 + $0xc0] sm:$0xff] }
 0x5ab   :  { %v4417_v18 = vpop.eup %4416 }
 0x5ac   :  { %v4419_v6 = vpop.eup %4418 }
 0x5ad   :  { %v4299_v35 = vpack.c.bf16 %v4417_v18, %v4419_v6  ;;  %v1588_v18 = vld [vmem:[%s6290_s8 + $0xc8] sm:$0xff]  ;;  %v1589_v6 = vld [vmem:[%s6290_s8 + $0xd0] sm:$0xff] }
 0x5af   :  { %v4421_v29 = vpop.eup %4420  ;;  %4300 = vmatprep.subr.bf16.mxu0 %v4299_v35 }
 0x5b0   :  { %v4423_v27 = vpop.eup %4422  ;;  %4302 = vmatpush3.bf16.msra.mxu0 %v4299_v35  ;;  %v1590_v35 = vld [vmem:[%s6290_s8 + $0xd8] sm:$0xff] }
 0x5b1   :  { %v4303_v48 = vpack.c.bf16 %v4421_v29, %v4423_v27  ;;  %v1591_v29 = vld [vmem:[%s6290_s8 + $0xe0] sm:$0xff]  ;;  %v1592_v27 = vld [vmem:[%s6290_s8 + $0xe8] sm:$0xff] }
 0x5b3   :  { %4304 = vmatprep.subr.bf16.mxu0 %v4303_v48 }
 0x5b4   :  { %4306 = vmatpush3.bf16.msra.mxu0 %v4303_v48  ;;  %v1593_v48 = vld [vmem:[%s6290_s8 + $0xf0] sm:$0xff] }
 0x5b7   :  { %4069 = vmatmul.mubr.msk.f32.vlgmr.msra.gmra.mrb[30].mxu0 %vm1479_vm3, %v1478_v45  ;;  %v1594_v45 = vld [vmem:[%s6290_s8 + $0xf8] sm:$0xff] }
 0x5b8   :  { %2221 = vmatprep.mubr.f32.mxu0 %v3528_v31 }
 0x68a   :  { %v4070_v3 = vpop.f32.mrb[30].mxu0 }
 0x68b   :  { %4424 = vtanh.f32 %v4070_v3  ;;  %v1552_v5 = vpop.f32.mrb[31].mxu0  ;;  %v1715_v3 = vpop.permute.xlu1 %1714 }
 0x68c   :  { %4426 = vtanh.f32 %v1552_v5  ;;  %v1710_v5 = vpop.permute.xlu0 %1709 }
 0x695   :  { %v4425_v23 = vpop.eup %4424 }
 0x696   :  { %v4427_v15 = vpop.eup %4426 }
 0x697   :  { %v4307_v30 = vpack.c.bf16 %v4425_v23, %v4427_v15  ;;  %v1635_v23 = vpop.permute.xlu1 %1634  ;;  %v1630_v15 = vpop.permute.xlu0 %1629 }
 0x699   :  { %4308 = vmatprep.subr.bf16.mxu1 %v4307_v30 }
 0x69a   :  { %4310 = vmatpush3.bf16.msra.mxu1 %v4307_v30 }
 0x69b   :  { %v1725_v30 = vpop.permute.xlu1 %1724 }
 0x69d   :  { %4076 = vmatmul.mubr.msk.f32.vlgmr.msra.gmra.mrb[32].mxu1 %vm1375_vm2, %v1564_v54  ;;  %v1720_v54 = vpop.permute.xlu0 %1719 }
 0x69e   :  { %4078 = vmatprep.mubr.msk.f32.mxu1 %vm1375_vm2, %v1565_v43 }
 0x69f   :  { %v1645_v43 = vpop.permute.xlu1 %1644 }
 0x6a1   :  { %4079 = vmatmul.mubr.msk.f32.gmra.mrb[34].mxu1 %vm1375_vm2, %v1566_v50  ;;  %v1640_v50 = vpop.permute.xlu0 %1639 }
 0x6a2   :  { %4081 = vmatprep.mubr.msk.f32.mxu1 %vm1375_vm2, %v1567_v41 }
 0x6a3   :  { %v1735_v41 = vpop.permute.xlu1 %1734 }
 0x6a5   :  { %4082 = vmatmul.mubr.msk.f32.gmra.mrb[36].mxu1 %vm1375_vm2, %v1568_v52  ;;  %v5713_v52 = vpop.permute.xlu0 %1729 }
 0x6a6   :  { %4084 = vmatprep.mubr.msk.f32.mxu1 %vm1375_vm2, %v1569_v42 }
 0x6a7   :  { %v1655_v42 = vpop.permute.xlu1 %1654 }
 0x6a9   :  { %4085 = vmatmul.mubr.msk.f32.gmra.mrb[38].mxu1 %vm1375_vm2, %v1570_v21  ;;  %v1650_v21 = vpop.permute.xlu0 %1649 }
 0x6aa   :  { %4087 = vmatprep.mubr.msk.f32.mxu1 %vm1375_vm2, %v1571_v59 }
 0x6ad   :  { %4088 = vmatmul.mubr.msk.f32.gmra.mrb[40].mxu1 %vm1375_vm2, %v1572_v0 }
 0x6ae   :  { %4090 = vmatprep.mubr.msk.f32.mxu1 %vm1375_vm2, %v1573_v56  ;;  %v5715_v56 = vpop.permute.xlu1 %1744 }
 0x6b1   :  { %4091 = vmatmul.mubr.msk.f32.gmra.mrb[42].mxu1 %vm1375_vm2, %v1574_v62  ;;  %v5717_v62 = vpop.permute.xlu0 %1739 }
 0x6b2   :  { %4093 = vmatprep.mubr.msk.f32.mxu1 %vm1375_vm2, %v1575_v20 }
 0x6b5   :  { %4094 = vmatmul.mubr.msk.f32.gmra.mrb[44].mxu1 %vm1375_vm2, %v1576_v57 }
 0x6b6   :  { %4096 = vmatprep.mubr.msk.f32.mxu1 %vm1375_vm2, %v1577_v51 }
 0x6b9   :  { %4097 = vmatmul.mubr.msk.f32.gmra.mrb[46].mxu1 %vm1375_vm2, %v1578_v11  ;;  %v1665_v11 = vpop.permute.xlu1 %1664 }
 0x6ba   :  { %4099 = vmatprep.mubr.msk.f32.mxu1 %vm1375_vm2, %v1579_v63 }
 0x6bd   :  { %4100 = vmatmul.mubr.msk.f32.gmra.mrb[48].mxu1 %vm1375_vm2, %v1580_v24  ;;  %v1660_v24 = vpop.permute.xlu0 %1659 }
 0x6be   :  { %4102 = vmatprep.mubr.msk.f32.mxu1 %vm1375_vm2, %v1581_v60 }
 0x6c1   :  { %4103 = vmatmul.mubr.msk.f32.gmra.mrb[50].mxu1 %vm1375_vm2, %v1582_v47 }
 0x6c2   :  { %4105 = vmatprep.mubr.msk.f32.mxu1 %vm1375_vm2, %v1583_v26  ;;  %v5719_v26 = vpop.permute.xlu1 %1754 }
 0x6c5   :  { %4106 = vmatmul.mubr.msk.f32.gmra.mrb[52].mxu1 %vm1375_vm2, %v1584_v38  ;;  %v5721_v38 = vpop.permute.xlu0 %1749 }
 0x6c6   :  { %4108 = vmatprep.mubr.msk.f32.mxu1 %vm1375_vm2, %v1585_v49 }
 0x6c9   :  { %4109 = vmatmul.mubr.msk.f32.gmra.mrb[54].mxu1 %vm1375_vm2, %v1586_v53 }
 0x6ca   :  { %4111 = vmatprep.mubr.msk.f32.mxu1 %vm1375_vm2, %v1587_v46 }
 0x6cd   :  { %4112 = vmatmul.mubr.msk.f32.gmra.mrb[56].mxu1 %vm1375_vm2, %v1588_v18  ;;  %v5729_v18 = vpop.permute.xlu1 %1674 }
 0x6ce   :  { %4114 = vmatprep.mubr.msk.f32.mxu1 %vm1375_vm2, %v1589_v6 }
 0x6d1   :  { %4115 = vmatmul.mubr.msk.f32.gmra.mrb[58].mxu1 %vm1375_vm2, %v1590_v35  ;;  %v1670_v35 = vpop.permute.xlu0 %1669 }
 0x6d2   :  { %4117 = vmatprep.mubr.msk.f32.mxu1 %vm1375_vm2, %v1591_v29 }
 0x6d5   :  { %4118 = vmatmul.mubr.msk.f32.gmra.mrb[60].mxu1 %vm1375_vm2, %v1592_v27 }
 0x6d6   :  { %4120 = vmatprep.mubr.msk.f32.mxu1 %vm1375_vm2, %v1593_v48  ;;  %v5737_v48 = vpop.permute.xlu1 %1764 }
 0x6d7   :  { %6352 = vst [vmem:[#allocation10_spill] sm:$0xff] %v5737_v48 }
 0x6d9   :  { %4121 = vmatmul.mubr.msk.f32.gmra.mrb[62].mxu1 %vm1375_vm2, %v1594_v45  ;;  %v5739_v45 = vpop.permute.xlu0 %1759 }
 0x6da   :  { %6353 = vst [vmem:[#allocation9_spill] sm:$0xff] %v5739_v45  ;;  %v1685_v19 = vpop.permute.xlu1 %1684 }
 0x6dd   :  { %v1680_v4 = vpop.permute.xlu0 %1679 }
 0x770   :  { %v4077_v59 = vpop.f32.mrb[32].mxu1 }
 0x771   :  { %v1949_v0 = vpop.f32.mrb[33].mxu1  ;;  %v1955_v9 = vadd.f32 %v4077_v59, %v1635_v23 }
 0x772   :  { %v1950_v37 = vadd.f32 %v1949_v0, %v1630_v15 }
 0x773   :  { %v5746_v44 = vadd.f32 %v1955_v9, %v5348_v13 }
 0x774   :  { %v4080_v20 = vpop.f32.mrb[34].mxu1 }
 0x775   :  { %v1959_v57 = vpop.f32.mrb[35].mxu1  ;;  %v1965_v48 = vadd.f32 %v4080_v20, %v1645_v43 }
 0x776   :  { %v1960_v45 = vadd.f32 %v1959_v57, %v1640_v50 }
 0x778   :  { %v4083_v51 = vpop.f32.mrb[36].mxu1 }
 0x779   :  { %v1969_v63 = vpop.f32.mrb[37].mxu1  ;;  %v1975_v59 = vadd.f32 %v4083_v51, %v1655_v42 }
 0x77a   :  { %v1970_v0 = vadd.f32 %v1969_v63, %v1650_v21 }
 0x77c   :  { %v4086_v60 = vpop.f32.mrb[38].mxu1 }
 0x77d   :  { %v1979_v47 = vpop.f32.mrb[39].mxu1 }
 0x780   :  { %v5723_v49 = vpop.f32.mrb[40].mxu1 }
 0x781   :  { %v5725_v53 = vpop.f32.mrb[41].mxu1 }
 0x782   :  { %v1990_v63 = vadd.f32 %v5725_v53, %v1670_v35 }
 0x784   :  { %v5727_v46 = vpop.f32.mrb[42].mxu1 }
 0x785   :  { %v5731_v6 = vpop.f32.mrb[43].mxu1 }
 0x788   :  { %v5733_v29 = vpop.f32.mrb[44].mxu1 }
 0x789   :  { %6350 = vst [vmem:[#allocation7_spill] sm:$0xff] %v5733_v29  ;;  %v5735_v27 = vpop.f32.mrb[45].mxu1 }
 0x78a   :  { %6351 = vst [vmem:[#allocation6_spill] sm:$0xff] %v5735_v27  ;;  %v5749_v27 = vadd.f32 %v1950_v37, %v5351_v16  ;;  %v5772_v37 = vpop.permute.xlu0 %1769 }
 0x78c   :  { %v5741_v31 = vpop.f32.mrb[46].mxu1  ;;  %v4313_v16 = vpack.c.bf16 %v5746_v44, %v5749_v27 }
 0x78d   :  { %6354 = vst [vmem:[#allocation8_spill] sm:$0xff] %v5741_v31  ;;  %v5743_v10 = vpop.f32.mrb[47].mxu1 }
 0x78e   :  { %6355 = vst [vmem:[#allocation21_spill] sm:$0xff] %v5743_v10 }
 0x790   :  { %v4101_v2 = vpop.f32.mrb[48].mxu1 }
 0x791   :  { %v2035_v55 = vadd.f32 %v4101_v2, %v1715_v3  ;;  %v2029_v58 = vpop.f32.mrb[49].mxu1 }
 0x792   :  { %v2030_v29 = vadd.f32 %v2029_v58, %v1710_v5  ;;  %v5759_v58 = vpop.permute.xlu1 %1774 }
 0x793   :  { %v5752_v31 = vadd.f32 %v2035_v55, %v5354_v22  ;;  %v5764_v22 = vadd.f32 %v1965_v48, %v5364_v12  ;;  %v5781_v12 = vadd.f32 %v1970_v0, %v5383_v25  ;;  %v6363_v48 = vld [vmem:[#allocation13_spill] sm:$0xff] }
 0x794   :  { %v5755_v23 = vadd.f32 %v2030_v29, %v5357_v32  ;;  %v4104_v15 = vpop.f32.mrb[50].mxu1  ;;  %v5767_v32 = vadd.f32 %v1960_v45, %v5367_v14  ;;  %v1985_v14 = vadd.f32 %v4086_v60, %v1665_v11 }
 0x795   :  { %v2045_v2 = vadd.f32 %v4104_v15, %v1725_v30  ;;  %v2039_v3 = vpop.f32.mrb[51].mxu1  ;;  %v5778_v30 = vadd.f32 %v1975_v59, %v5380_v34  ;;  %v6364_v15 = vld [vmem:[#allocation10_spill] sm:$0xff] }
 0x796   :  { %v2040_v10 = vadd.f32 %v2039_v3, %v1720_v54  ;;  %v4311_v13 = vpack.c.bf16 %v5752_v31, %v5755_v23  ;;  %v1695_v25 = vpop.permute.xlu1 %1694  ;;  %v5798_v51 = vadd.f32 %v1985_v14, %v5396_v40 }
 0x797   :  { %v5770_v55 = vadd.f32 %v2045_v2, %v5370_v7  ;;  %v4321_v57 = vpack.c.bf16 %v5778_v30, %v5781_v12 }
 0x798   :  { %v5775_v9 = vadd.f32 %v2040_v10, %v5373_v8  ;;  %v4107_v5 = vpop.f32.mrb[52].mxu1  ;;  %4312 = vmatprep.subr.bf16.mxu0 %v4311_v13  ;;  %v4317_v8 = vpack.c.bf16 %v5764_v22, %v5767_v32  ;;  %v1980_v10 = vadd.f32 %v1979_v47, %v1660_v24  ;;  %v6367_v13 = vld [vmem:[#allocation9_spill] sm:$0xff] }
 0x799   :  { %v2055_v54 = vadd.f32 %v4107_v5, %v1735_v41  ;;  %v2049_v43 = vpop.f32.mrb[53].mxu1  ;;  %4314 = vmatpush3.bf16.msra.mxu0 %v4313_v16 }
 0x79a   :  { %v2050_v7 = vadd.f32 %v2049_v43, %v5713_v52  ;;  %v4315_v50 = vpack.c.bf16 %v5770_v55, %v5775_v9  ;;  %v1690_v52 = vpop.permute.xlu0 %1689  ;;  %v5804_v11 = vadd.f32 %v1980_v10, %v5399_v39  ;;  %v2000_v39 = vadd.f32 %v5731_v6, %v1680_v4  ;;  %v6361_v4 = vld [vmem:[#allocation12_spill] sm:$0xff]  ;;  %v6368_v43 = vld [vmem:[#allocation6_spill] sm:$0xff] }
 0x79b   :  { %v5789_v42 = vadd.f32 %v2055_v54, %v5386_v17  ;;  %v2010_v14 = vadd.f32 %v6368_v43, %v1690_v52  ;;  %v3527_v43 = vld [vmem:[%s6286_s4 + $0x80] sm:$0xff] }
 0x79c   :  { %v5792_v34 = vadd.f32 %v2050_v7, %v5389_v61  ;;  %v4110_v41 = vpop.f32.mrb[54].mxu1  ;;  %4316 = vmatprep.subr.bf16.mxu0 %v4315_v50  ;;  %v6369_v7 = vld [vmem:[#allocation15_spill] sm:$0xff] }
 0x79d   :  { %v2065_v21 = vadd.f32 %v4110_v41, %v5715_v56  ;;  %v2059_v20 = vpop.f32.mrb[55].mxu1  ;;  %4318 = vmatpush3.bf16.msra.mxu0 %v4317_v8  ;;  %v1995_v56 = vadd.f32 %v5723_v49, %v5729_v18  ;;  %v6371_v8 = vld [vmem:[#allocation16_spill] sm:$0xff] }
 0x79e   :  { %6356 = vst [vmem:[#allocation22_spill] sm:$0xff] %v5792_v34  ;;  %v2060_v17 = vadd.f32 %v2059_v20, %v5717_v62  ;;  %v4319_v61 = vpack.c.bf16 %v5789_v42, %v5792_v34  ;;  %v2005_v62 = vadd.f32 %v5727_v46, %v1685_v19  ;;  %v5827_v19 = vadd.f32 %v1990_v63, %v5415_v1  ;;  %v1780_v35 = vpop.permute.xlu0 %1779  ;;  %v6366_v1 = vld [vmem:[#allocation7_spill] sm:$0xff] }
 0x79f   :  { %v5810_v24 = vadd.f32 %v2065_v21, %v5402_v28  ;;  %v1785_v28 = vpop.permute.xlu1 %1784  ;;  %v5824_v18 = vadd.f32 %v1995_v56, %v5412_v33  ;;  %v6365_v33 = vld [vmem:[#allocation14_spill] sm:$0xff]  ;;  %v2015_v0 = vadd.f32 %v6366_v1, %v1695_v25  ;;  %v6382_v1 = vld [vmem:[#allocation19_spill] sm:$0xff] }
 0x7a0   :  { %v5813_v60 = vadd.f32 %v2060_v17, %v5405_v36  ;;  %v4113_v40 = vpop.f32.mrb[56].mxu1  ;;  %4320 = vmatprep.subr.bf16.mxu0 %v4319_v61  ;;  %v4325_v36 = vpack.c.bf16 %v5798_v51, %v5804_v11  ;;  %v5836_v45 = vadd.f32 %v2005_v62, %v6363_v48  ;;  %v5840_v3 = vadd.f32 %v2000_v39, %v6365_v33  ;;  %v6373_v61 = vld [vmem:[#allocation17_spill] sm:$0xff] }
 0x7a1   :  { %6357 = vst [vmem:[#allocation23_spill] sm:$0xff] %v5810_v24  ;;  %v2075_v47 = vadd.f32 %v4113_v40, %v5719_v26  ;;  %v2069_v29 = vpop.f32.mrb[57].mxu1  ;;  %4322 = vmatpush3.bf16.msra.mxu0 %v4321_v57  ;;  %v6359_v26 = vld [vmem:[#allocation11_spill] sm:$0xff]  ;;  %v4329_v54 = vpack.c.bf16 %v5824_v18, %v5827_v19  ;;  %v5859_v56 = vadd.f32 %v2015_v0, %v6373_v61  ;;  %v6374_v40 = vld [vmem:[#allocation4_spill] sm:$0xff] }
 0x7a2   :  { %6358 = vst [vmem:[#allocation24_spill] sm:$0xff] %v5813_v60  ;;  %v2070_v49 = vadd.f32 %v2069_v29, %v5721_v38  ;;  %v4323_v53 = vpack.c.bf16 %v5810_v24, %v5813_v60  ;;  %v1700_v57 = vpop.permute.xlu0 %1699  ;;  %v4333_v17 = vpack.c.bf16 %v5836_v45, %v5840_v3  ;;  %v5865_v62 = vadd.f32 %v2010_v14, %v6374_v40  ;;  %v6376_v29 = vld [vmem:[#allocation21_spill] sm:$0xff]  ;;  %v3537_v61 = vld [vmem:[%s6286_s4 + $0xd0] sm:$0xff] }
 0x7a3   :  { %v5830_v46 = vadd.f32 %v2075_v47, %v6359_v26  ;;  %v1705_v20 = vpop.permute.xlu1 %1704  ;;  %v6375_v47 = vld [vmem:[#allocation8_spill] sm:$0xff]  ;;  %v2020_v39 = vadd.f32 %v6376_v29, %v1700_v57  ;;  %v3530_v14 = vld [vmem:[%s6286_s4 + $0x98] sm:$0xff]  ;;  %v3535_v57 = vld [vmem:[%s6286_s4 + $0xc0] sm:$0xff] }
 0x7a4   :  { %v5833_v6 = vadd.f32 %v2070_v49, %v6361_v4  ;;  %v4116_v38 = vpop.f32.mrb[58].mxu1  ;;  %4324 = vmatprep.subr.bf16.mxu0 %v4323_v53  ;;  %v6377_v49 = vld [vmem:[#allocation2_spill] sm:$0xff]  ;;  %v3542_v40 = vld [vmem:[%s6286_s4 + $0xf8] sm:$0xff] }
 0x7a5   :  { %6360 = vst [vmem:[#allocation11_spill] sm:$0xff] %v5830_v46  ;;  %v2085_v59 = vadd.f32 %v4116_v38, %v6364_v15  ;;  %v2079_v2 = vpop.f32.mrb[59].mxu1  ;;  %4326 = vmatpush3.bf16.msra.mxu0 %v4325_v36  ;;  %v6379_v36 = vld [vmem:[#allocation3_spill] sm:$0xff]  ;;  %v5883_v0 = vadd.f32 %v2020_v39, %v6382_v1 }
 0x7a6   :  { %6362 = vst [vmem:[#allocation12_spill] sm:$0xff] %v5833_v6  ;;  %v2080_v16 = vadd.f32 %v2079_v2, %v6367_v13  ;;  %v4327_v5 = vpack.c.bf16 %v5830_v46, %v5833_v6  ;;  %v6381_v2 = vld [vmem:[#allocation18_spill] sm:$0xff]  ;;  %v6383_v13 = vld [vmem:[#allocation20_spill] sm:$0xff] }
 0x7a7   :  { %v5850_v50 = vadd.f32 %v2085_v59, %v6369_v7  ;;  %v4337_v59 = vpack.c.bf16 %v5859_v56, %v5865_v62  ;;  %v3529_v7 = vld [vmem:[%s6286_s4 + $0x90] sm:$0xff] }
 0x7a8   :  { %v5853_v10 = vadd.f32 %v2080_v16, %v6371_v8  ;;  %v4119_v41 = vpop.f32.mrb[60].mxu1  ;;  %4328 = vmatprep.subr.bf16.mxu0 %v4327_v5  ;;  %v6385_v5 = vld [vmem:[#allocation5_spill] sm:$0xff]  ;;  %v3532_v8 = vld [vmem:[%s6286_s4 + $0xa8] sm:$0xff] }
 0x7a9   :  { %6370 = vst [vmem:[#allocation13_spill] sm:$0xff] %v5850_v50  ;;  %v2095_v25 = vadd.f32 %v4119_v41, %v5759_v58  ;;  %v2089_v21 = vpop.f32.mrb[61].mxu1  ;;  %4330 = vmatpush3.bf16.msra.mxu0 %v4329_v54  ;;  %v2025_v58 = vadd.f32 %v6375_v47, %v1705_v20  ;;  %v3531_v41 = vld [vmem:[%s6286_s4 + $0xa0] sm:$0xff]  ;;  %v3536_v20 = vld [vmem:[%s6286_s4 + $0xc8] sm:$0xff]  ;;  %v3541_v47 = vld [vmem:[%s6286_s4 + $0xf0] sm:$0xff] }
 0x7aa   :  { %6372 = vst [vmem:[#allocation10_spill] sm:$0xff] %v5853_v10  ;;  %v2090_v52 = vadd.f32 %v2089_v21, %v5772_v37  ;;  %v4331_v63 = vpack.c.bf16 %v5850_v50, %v5853_v10  ;;  %v3533_v21 = vld [vmem:[%s6286_s4 + $0xb0] sm:$0xff] }
 0x7ab   :  { %v5870_v53 = vadd.f32 %v2095_v25, %v6377_v49  ;;  %v5880_v33 = vadd.f32 %v2025_v58, %v6381_v2  ;;  %v3534_v25 = vld [vmem:[%s6286_s4 + $0xb8] sm:$0xff]  ;;  %v3543_v58 = vld [vmem:[%s6287_s5 + $0x10] sm:$0xff] }
 0x7ac   :  { %v5873_v26 = vadd.f32 %v2090_v52, %v6379_v36  ;;  %v4122_v4 = vpop.f32.mrb[62].mxu1  ;;  %4332 = vmatprep.subr.bf16.mxu0 %v4331_v63  ;;  %v3540_v52 = vld [vmem:[%s6286_s4 + $0xe8] sm:$0xff]  ;;  %v3539_v63 = vld [vmem:[%s6286_s4 + $0xe0] sm:$0xff] }
 0x7ad   :  { %6378 = vst [vmem:[#allocation14_spill] sm:$0xff] %v5870_v53  ;;  %v2105_v38 = vadd.f32 %v4122_v4, %v1785_v28  ;;  %v2099_v37 = vpop.f32.mrb[63].mxu1  ;;  %4334 = vmatpush3.bf16.msra.mxu0 %v4333_v17  ;;  %v4341_v54 = vpack.c.bf16 %v5880_v33, %v5883_v0  ;;  %v3538_v17 = vld [vmem:[%s6286_s4 + $0xd8] sm:$0xff] }
 0x7ae   :  { %6380 = vst [vmem:[#allocation7_spill] sm:$0xff] %v5873_v26  ;;  %v2100_v48 = vadd.f32 %v2099_v37, %v1780_v35  ;;  %v4335_v15 = vpack.c.bf16 %v5870_v53, %v5873_v26 }
 0x7af   :  { %v5886_v16 = vadd.f32 %v2105_v38, %v6383_v13 }
 0x7b0   :  { %v5889_v28 = vadd.f32 %v2100_v48, %v6385_v5  ;;  %4336 = vmatprep.subr.bf16.mxu0 %v4335_v15 }
 0x7b1   :  { %6384 = vst [vmem:[#allocation9_spill] sm:$0xff] %v5886_v16  ;;  %4338 = vmatpush3.bf16.msra.mxu0 %v4337_v59 }
 0x7b2   :  { %6386 = vst [vmem:[#allocation6_spill] sm:$0xff] %v5889_v28  ;;  %v4339_v35 = vpack.c.bf16 %v5886_v16, %v5889_v28 }
 0x7b4   :  { %4340 = vmatprep.subr.bf16.mxu0 %v4339_v35 }
 0x7b5   :  { %4342 = vmatpush3.bf16.msra.mxu0 %v4341_v54 }
 0x7b8   :  { %2222 = vmatmul.mubr.f32.vlgmr.msra.gmra.mrb[32].mxu0 %v3527_v43 }
 0x7b9   :  { %2226 = vmatprep.mubr.f32.mxu0 %v3530_v14 }
 0x7bc   :  { %2227 = vmatmul.mubr.f32.gmra.mrb[34].mxu0 %v3529_v7 }
 0x7bd   :  { %2231 = vmatprep.mubr.f32.mxu0 %v3532_v8 }
 0x7c0   :  { %2232 = vmatmul.mubr.f32.gmra.mrb[36].mxu0 %v3531_v41 }
 0x7c1   :  { %2236 = vmatprep.mubr.f32.mxu0 %v3534_v25 }
 0x7c4   :  { %2237 = vmatmul.mubr.f32.gmra.mrb[38].mxu0 %v3533_v21 }
 0x7c5   :  { %2241 = vmatprep.mubr.f32.mxu0 %v3536_v20 }
 0x7c8   :  { %2242 = vmatmul.mubr.f32.gmra.mrb[40].mxu0 %v3535_v57 }
 0x7c9   :  { %2246 = vmatprep.mubr.f32.mxu0 %v3538_v17 }
 0x7cc   :  { %2247 = vmatmul.mubr.f32.gmra.mrb[42].mxu0 %v3537_v61 }
 0x7cd   :  { %2251 = vmatprep.mubr.f32.mxu0 %v3540_v52 }
 0x7d0   :  { %2252 = vmatmul.mubr.f32.gmra.mrb[44].mxu0 %v3539_v63 }
 0x7d1   :  { %2256 = vmatprep.mubr.f32.mxu0 %v3542_v40 }
 0x7d4   :  { %2257 = vmatmul.mubr.f32.gmra.mrb[46].mxu0 %v3541_v47 }
 0x7d5   :  { %4139 = vmatprep.mubr.msk.f32.mxu0 %vm51_vm0, %v3543_v58 }
 0x88b   :  { %v3824_v29 = vpop.f32.mrb[32].mxu0 }
 0x88c   :  { %v3825_v39 = vpop.f32.mrb[33].mxu0 }
 0x88d   :  { %v3826_v49 = vadd.f32 %v3825_v39, %v3824_v29 }
 0x88f   :  { %v3827_v36 = vpop.f32.mrb[34].mxu0  ;;  %v2278_v37 = vsel %vm197_vm1, %v3826_v49, 0.0 }
 0x890   :  { %v3828_v4 = vpop.f32.mrb[35].mxu0 }
 0x891   :  { %v3829_v38 = vadd.f32 %v3828_v4, %v3827_v36 }
 0x893   :  { %v2279_v48 = vsel %vm197_vm1, %v3829_v38, 0.0  ;;  %v3830_v15 = vpop.f32.mrb[36].mxu0 }
 0x894   :  { %v2280_v59 = vadd.f32 %v2279_v48, %v2278_v37  ;;  %v3831_v2 = vpop.f32.mrb[37].mxu0 }
 0x895   :  { %v3832_v1 = vadd.f32 %v3831_v2, %v3830_v15 }
 0x897   :  { %v2281_v13 = vsel %vm197_vm1, %v3832_v1, 0.0  ;;  %v3833_v5 = vpop.f32.mrb[38].mxu0 }
 0x898   :  { %v2282_v35 = vadd.f32 %v2281_v13, %v2280_v59  ;;  %v3834_v54 = vpop.f32.mrb[39].mxu0 }
 0x899   :  { %v3835_v43 = vadd.f32 %v3834_v54, %v3833_v5 }
 0x89b   :  { %v2283_v14 = vsel %vm197_vm1, %v3835_v43, 0.0  ;;  %v3836_v7 = vpop.f32.mrb[40].mxu0 }
 0x89c   :  { %v2284_v8 = vadd.f32 %v2283_v14, %v2282_v35  ;;  %v3837_v41 = vpop.f32.mrb[41].mxu0 }
 0x89d   :  { %v3838_v25 = vadd.f32 %v3837_v41, %v3836_v7 }
 0x89f   :  { %v2285_v21 = vsel %vm197_vm1, %v3838_v25, 0.0  ;;  %v3839_v20 = vpop.f32.mrb[42].mxu0 }
 0x8a0   :  { %v2286_v57 = vadd.f32 %v2285_v21, %v2284_v8  ;;  %v3840_v17 = vpop.f32.mrb[43].mxu0 }
 0x8a1   :  { %v3841_v61 = vadd.f32 %v3840_v17, %v3839_v20 }
 0x8a3   :  { %v2287_v52 = vsel %vm197_vm1, %v3841_v61, 0.0  ;;  %v3842_v63 = vpop.f32.mrb[44].mxu0 }
 0x8a4   :  { %v2288_v40 = vadd.f32 %v2287_v52, %v2286_v57  ;;  %v3843_v47 = vpop.f32.mrb[45].mxu0 }
 0x8a5   :  { %v3844_v58 = vadd.f32 %v3843_v47, %v3842_v63 }
 0x8a7   :  { %v2289_v29 = vsel %vm197_vm1, %v3844_v58, 0.0  ;;  %v3845_v39 = vpop.f32.mrb[46].mxu0 }
 0x8a8   :  { %v2290_v36 = vadd.f32 %v2289_v29, %v2288_v40  ;;  %v3846_v4 = vpop.f32.mrb[47].mxu0 }
 0x8a9   :  { %v3847_v37 = vadd.f32 %v3846_v4, %v3845_v39 }
 0x8ab   :  { %v2291_v48 = vsel %vm197_vm1, %v3847_v37, 0.0 }
 0x8ac   :  { %v2292_v15 = vadd.f32 %v2291_v48, %v2290_v36 }
 0x8ae   :  { %v2293_v59 = vrot.slane %v2292_v15, 4 }
 0x8b0   :  { %v2294_v2 = vadd.f32 %v2293_v59, %v2292_v15 }
 0x8b2   :  { %v2295_v13 = vrot.slane %v2294_v2, 2 }
 0x8b4   :  { %v2296_v5 = vadd.f32 %v2295_v13, %v2294_v2 }
 0x8b6   :  { %v2297_v35 = vrot.slane %v2296_v5, 1 }
 0x8b8   :  { %v2298_v54 = vadd.f32 %v2297_v35, %v2296_v5 }
 0x8ba   :  { %v2299_v14 = vmul.f32 0.015625, %v2298_v54 }
 0x8bc   :  { %v2300_v7 = vsub.f32 %v3826_v49, %v2299_v14  ;;  %v2301_v8 = vsub.f32 %v3829_v38, %v2299_v14  ;;  %v2302_v41 = vsub.f32 %v3832_v1, %v2299_v14  ;;  %v2303_v21 = vsub.f32 %v3835_v43, %v2299_v14  ;;  %v2356_v49 = vpop.permute.xlu1 %2355  ;;  %v2351_v1 = vpop.permute.xlu0 %2350 }
 0x8bd   :  { %v2304_v20 = vsub.f32 %v3838_v25, %v2299_v14  ;;  %v2305_v57 = vsub.f32 %v3841_v61, %v2299_v14  ;;  %v2306_v17 = vsub.f32 %v3844_v58, %v2299_v14  ;;  %v2307_v52 = vsub.f32 %v3847_v37, %v2299_v14 }
 0x8be   :  { %v2308_v63 = vmul.f32 %v2300_v7, %v2300_v7  ;;  %v2309_v40 = vmul.f32 %v2301_v8, %v2301_v8  ;;  %v2310_v47 = vmul.f32 %v2302_v41, %v2302_v41  ;;  %v2311_v29 = vmul.f32 %v2303_v21, %v2303_v21 }
 0x8bf   :  { %v2312_v48 = vmul.f32 %v2304_v20, %v2304_v20  ;;  %v2313_v43 = vmul.f32 %v2305_v57, %v2305_v57  ;;  %v2314_v58 = vmul.f32 %v2306_v17, %v2306_v17  ;;  %v2315_v2 = vmul.f32 %v2307_v52, %v2307_v52 }
 0x8c0   :  { %v2316_v39 = vsel %vm197_vm1, %v2308_v63, 0.0  ;;  %v2317_v36 = vsel %vm197_vm1, %v2309_v40, 0.0  ;;  %v2319_v15 = vsel %vm197_vm1, %v2310_v47, 0.0  ;;  %v2321_v25 = vsel %vm197_vm1, %v2311_v29, 0.0  ;;  %v2404_v5 = vpop.permute.xlu1 %2403  ;;  %v2399_v54 = vpop.permute.xlu0 %2398 }
 0x8c1   :  { %v2318_v4 = vadd.f32 %v2317_v36, %v2316_v39  ;;  %v2323_v37 = vsel %vm197_vm1, %v2312_v48, 0.0  ;;  %v2325_v13 = vsel %vm197_vm1, %v2313_v43, 0.0  ;;  %v2327_v14 = vsel %vm197_vm1, %v2314_v58, 0.0 }
 0x8c2   :  { %v2329_v40 = vsel %vm197_vm1, %v2315_v2, 0.0 }
 0x8c3   :  { %v2320_v38 = vadd.f32 %v2319_v15, %v2318_v4 }
 0x8c4   :  { %v2366_v39 = vpop.permute.xlu1 %2365  ;;  %v2361_v29 = vpop.permute.xlu0 %2360 }
 0x8c5   :  { %v2322_v61 = vadd.f32 %v2321_v25, %v2320_v38 }
 0x8c7   :  { %v2324_v59 = vadd.f32 %v2323_v37, %v2322_v61 }
 0x8c8   :  { %v2414_v38 = vpop.permute.xlu1 %2413  ;;  %v2409_v25 = vpop.permute.xlu0 %2408 }
 0x8c9   :  { %v2326_v35 = vadd.f32 %v2325_v13, %v2324_v59 }
 0x8cb   :  { %v2328_v63 = vadd.f32 %v2327_v14, %v2326_v35 }
 0x8cc   :  { %v2376_v43 = vpop.permute.xlu1 %2375  ;;  %v2371_v59 = vpop.permute.xlu0 %2370 }
 0x8cd   :  { %v2330_v47 = vadd.f32 %v2329_v40, %v2328_v63 }
 0x8cf   :  { %v2331_v36 = vrot.slane %v2330_v47, 4 }
 0x8d0   :  { %v2424_v58 = vpop.permute.xlu1 %2423  ;;  %v2419_v35 = vpop.permute.xlu0 %2418 }
 0x8d1   :  { %v2332_v4 = vadd.f32 %v2331_v36, %v2330_v47 }
 0x8d3   :  { %v2333_v15 = vrot.slane %v2332_v4, 2 }
 0x8d4   :  { %v2386_v14 = vpop.permute.xlu1 %2385  ;;  %v2381_v2 = vpop.permute.xlu0 %2380 }
 0x8d5   :  { %v2334_v48 = vadd.f32 %v2333_v15, %v2332_v4 }
 0x8d7   :  { %v2335_v61 = vrot.slane %v2334_v48, 1 }
 0x8d8   :  { %v2434_v50 = vpop.permute.xlu1 %2433  ;;  %v2429_v60 = vpop.permute.xlu0 %2428 }
 0x8d9   :  { %v2336_v37 = vadd.f32 %v2335_v61, %v2334_v48 }
 0x8db   :  { %v2337_v28 = vmul.f32 0.015625, %v2336_v37 }
 0x8dd   :  { %v2338_v13 = vadd.f32 1e-05, %v2337_v28 }
 0x8df   :  { %4428 = vrsqrt.f32 %v2338_v13 }
 0x8e9   :  { %v4429_v63 = vpop.eup %4428 }
 0x8ea   :  { %v2347_v40 = vmul.f32 %v4429_v63, %v2307_v52  ;;  %v2340_v16 = vmul.f32 %v4429_v63, %v2300_v7  ;;  %v2341_v26 = vmul.f32 %v4429_v63, %v2301_v8  ;;  %v2342_v47 = vmul.f32 %v4429_v63, %v2302_v41 }
 0x8eb   :  { %v2343_v36 = vmul.f32 %v4429_v63, %v2303_v21  ;;  %v2344_v53 = vmul.f32 %v4429_v63, %v2304_v20  ;;  %v2345_v4 = vmul.f32 %v4429_v63, %v2305_v57  ;;  %v2346_v15 = vmul.f32 %v4429_v63, %v2306_v17 }
 0x8ec   :  { %v2395_v10 = vmul.f32 %v2386_v14, %v2347_v40  ;;  %v2388_v48 = vmul.f32 %v2351_v1, %v2340_v16  ;;  %v2389_v61 = vmul.f32 %v2356_v49, %v2341_v26  ;;  %v2390_v37 = vmul.f32 %v2361_v29, %v2342_v47 }
 0x8ed   :  { %v2391_v28 = vmul.f32 %v2366_v39, %v2343_v36  ;;  %v2392_v13 = vmul.f32 %v2371_v59, %v2344_v53  ;;  %v2393_v6 = vmul.f32 %v2376_v43, %v2345_v4  ;;  %v2394_v46 = vmul.f32 %v2381_v2, %v2346_v15 }
 0x8ee   :  { %v2436_v24 = vadd.f32 %v2399_v54, %v2388_v48  ;;  %v2437_v34 = vadd.f32 %v2404_v5, %v2389_v61  ;;  %v2438_v52 = vadd.f32 %v2409_v25, %v2390_v37  ;;  %v2443_v7 = vadd.f32 %v2434_v50, %v2395_v10 }
 0x8ef   :  { %v2439_v8 = vadd.f32 %v2414_v38, %v2391_v28  ;;  %v2440_v41 = vadd.f32 %v2419_v35, %v2392_v13  ;;  %v2441_v21 = vadd.f32 %v2424_v58, %v2393_v6  ;;  %v2442_v20 = vadd.f32 %v2429_v60, %v2394_v46 }
 0x8f0   :  { %v2444_v57 = vmax.f32 %v2436_v24, 0.0  ;;  %v2445_v17 = vmax.f32 %v2437_v34, 0.0  ;;  %v2446_v14 = vmax.f32 %v2438_v52, 0.0  ;;  %v2451_v16 = vmax.f32 %v2443_v7, 0.0  ;;  %v3544_v34 = vld [vmem:[%s6287_s5 + $0x18] sm:$0xff]  ;;  %v3547_v24 = vld [vmem:[%s6288_s6 + $0x20] sm:$0xff] }
 0x8f1   :  { %v2447_v26 = vmax.f32 %v2439_v8, 0.0  ;;  %v2448_v49 = vmax.f32 %v2440_v41, 0.0  ;;  %v2449_v1 = vmax.f32 %v2441_v21, 0.0  ;;  %v2450_v39 = vmax.f32 %v2442_v20, 0.0  ;;  %v2576_v21 = vpop.permute.xlu1 %2575  ;;  %v2571_v20 = vpop.permute.xlu0 %2570 }
 0x8f2   :  { %v4343_v53 = vpack.c.bf16 %v2445_v17, %v2444_v57 }
 0x8f3   :  { %v4347_v29 = vpack.c.bf16 %v2447_v26, %v2446_v14  ;;  %v4351_v43 = vpack.c.bf16 %v2449_v1, %v2448_v49  ;;  %v4355_v59 = vpack.c.bf16 %v2451_v16, %v2450_v39 }
 0x8f4   :  { %4344 = vmatprep.subr.bf16.mxu0 %v4343_v53 }
 0x8f5   :  { %4346 = vmatpush3.bf16.msra.mxu0 %v4343_v53  ;;  %v2588_v49 = vpop.permute.xlu1 %2587  ;;  %v2583_v1 = vpop.permute.xlu0 %2582 }
 0x8f6   :  { %4348 = vmatprep.subr.bf16.mxu0 %v4347_v29 }
 0x8f9   :  { %4350 = vmatpush3.bf16.msra.mxu0 %v4347_v29 }
 0x8fa   :  { %4352 = vmatprep.subr.bf16.mxu0 %v4351_v43 }
 0x8fd   :  { %4354 = vmatpush3.bf16.msra.mxu0 %v4351_v43 }
 0x8fe   :  { %4356 = vmatprep.subr.bf16.mxu0 %v4355_v59 }
 0x901   :  { %4358 = vmatpush3.bf16.msra.mxu0 %v4355_v59 }
 0x904   :  { %4140 = vmatmul.mubr.msk.f32.vlgmr.msra.gmra.mrb[48].mxu0 %vm51_vm0, %v3544_v34  ;;  %v3548_v34 = vld [vmem:[%s6288_s6 + $0x28] sm:$0xff] }
 0x905   :  { %4146 = vmatprep.mubr.msk.f32.mxu0 %vm1375_vm2, %v3547_v24  ;;  %v3549_v24 = vld [vmem:[%s6288_s6 + $0x30] sm:$0xff] }
 0x9d7   :  { %v4141_v60 = vpop.f32.mrb[48].mxu0 }
 0x9d8   :  { %v2541_v46 = vsel %vm197_vm1, %v4141_v60, 0.0  ;;  %v2527_v6 = vpop.f32.mrb[49].mxu0 }
 0x9d9   :  { %v2540_v50 = vsel %vm197_vm1, %v2527_v6, 0.0 }
 0x9da   :  { %v2542_v10 = vadd.f32 %v2541_v46, %v2540_v50  ;;  %v3555_v46 = vld [vmem:[%s6289_s7 + $0x10] sm:$0xff] }
 0x9dc   :  { %v2543_v5 = vrot.slane %v2542_v10, 4 }
 0x9de   :  { %v2544_v54 = vadd.f32 %v2543_v5, %v2542_v10 }
 0x9e0   :  { %v2545_v38 = vrot.slane %v2544_v54, 2 }
 0x9e2   :  { %v2546_v25 = vadd.f32 %v2545_v38, %v2544_v54 }
 0x9e4   :  { %v2547_v58 = vrot.slane %v2546_v25, 1 }
 0x9e6   :  { %v2548_v35 = vadd.f32 %v2547_v58, %v2546_v25 }
 0x9e8   :  { %v2549_v2 = vmul.f32 0.0625, %v2548_v35 }
 0x9ea   :  { %v2550_v63 = vsub.f32 %v2527_v6, %v2549_v2  ;;  %v2551_v40 = vsub.f32 %v4141_v60, %v2549_v2  ;;  %v3550_v60 = vld [vmem:[%s6288_s6 + $0x38] sm:$0xff] }
 0x9ec   :  { %v2552_v47 = vmul.f32 %v2550_v63, %v2550_v63  ;;  %v2553_v36 = vmul.f32 %v2551_v40, %v2551_v40 }
 0x9ee   :  { %v2554_v4 = vsel %vm197_vm1, %v2552_v47, 0.0  ;;  %v2555_v15 = vsel %vm197_vm1, %v2553_v36, 0.0 }
 0x9ef   :  { %v2556_v48 = vadd.f32 %v2555_v15, %v2554_v4 }
 0x9f1   :  { %v2557_v61 = vrot.slane %v2556_v48, 4 }
 0x9f3   :  { %v2558_v37 = vadd.f32 %v2557_v61, %v2556_v48  ;;  %v3560_v61 = vld [vmem:[%s6290_s8 + $0x108] sm:$0xff] }
 0x9f5   :  { %v2559_v28 = vrot.slane %v2558_v37, 2 }
 0x9f7   :  { %v2560_v13 = vadd.f32 %v2559_v28, %v2558_v37  ;;  %v3561_v37 = vld [vmem:[%s6290_s8 + $0x110] sm:$0xff]  ;;  %v3562_v28 = vld [vmem:[%s6290_s8 + $0x118] sm:$0xff] }
 0x9f9   :  { %v2561_v52 = vrot.slane %v2560_v13, 1 }
 0x9fb   :  { %v2562_v7 = vadd.f32 %v2561_v52, %v2560_v13  ;;  %v3563_v13 = vld [vmem:[%s6290_s8 + $0x120] sm:$0xff]  ;;  %v3564_v52 = vld [vmem:[%s6290_s8 + $0x128] sm:$0xff] }
 0x9fd   :  { %v2563_v8 = vmul.f32 0.0625, %v2562_v7  ;;  %v3565_v7 = vld [vmem:[%s6290_s8 + $0x130] sm:$0xff] }
 0x9ff   :  { %v2564_v41 = vadd.f32 1e-05, %v2563_v8  ;;  %v3566_v8 = vld [vmem:[%s6290_s8 + $0x138] sm:$0xff] }
 0xa01   :  { %4430 = vrsqrt.f32 %v2564_v41  ;;  %v3567_v41 = vld [vmem:[%s6290_s8 + $0x140] sm:$0xff] }
 0xa0b   :  { %v4431_v57 = vpop.eup %4430 }
 0xa0c   :  { %v2566_v17 = vmul.f32 %v4431_v57, %v2550_v63  ;;  %v2567_v14 = vmul.f32 %v4431_v57, %v2551_v40  ;;  %v3556_v63 = vld [vmem:[%s6289_s7 + $0x18] sm:$0xff]  ;;  %v3559_v40 = vld [vmem:[%s6290_s8 + $0x100] sm:$0xff] }
 0xa0d   :  { %4167 = vmatprep.mubr.msk.f32.mxu1 %vm1375_vm2, %v3559_v40  ;;  %v3570_v57 = vld [vmem:[%s6290_s8 + $0x158] sm:$0xff] }
 0xa0e   :  { %v2578_v16 = vmul.f32 %v2571_v20, %v2566_v17  ;;  %v2579_v26 = vmul.f32 %v2576_v21, %v2567_v14  ;;  %v3568_v21 = vld [vmem:[%s6290_s8 + $0x148] sm:$0xff]  ;;  %v3569_v20 = vld [vmem:[%s6290_s8 + $0x150] sm:$0xff]  ;;  %v3571_v17 = vld [vmem:[%s6290_s8 + $0x160] sm:$0xff] }
 0xa0f   :  { %v3572_v14 = vld [vmem:[%s6290_s8 + $0x168] sm:$0xff] }
 0xa10   :  { %v2590_v39 = vadd.f32 %v2583_v1, %v2578_v16  ;;  %v2591_v53 = vadd.f32 %v2588_v49, %v2579_v26  ;;  %v3573_v16 = vld [vmem:[%s6290_s8 + $0x170] sm:$0xff]  ;;  %v3574_v26 = vld [vmem:[%s6290_s8 + $0x178] sm:$0xff]  ;;  %v3575_v49 = vld [vmem:[%s6290_s8 + $0x180] sm:$0xff] }
 0xa11   :  { %v3576_v1 = vld [vmem:[%s6290_s8 + $0x188] sm:$0xff] }
 0xa12   :  { %v2592_v29 = vmax.f32 %v2590_v39, 0.0  ;;  %v2593_v43 = vmax.f32 %v2591_v53, 0.0  ;;  %v3577_v39 = vld [vmem:[%s6290_s8 + $0x190] sm:$0xff]  ;;  %v3578_v53 = vld [vmem:[%s6290_s8 + $0x198] sm:$0xff] }
 0xa14   :  { %v4359_v59 = vpack.c.bf16 %v2593_v43, %v2592_v29  ;;  %v3579_v29 = vld [vmem:[%s6290_s8 + $0x1a0] sm:$0xff]  ;;  %v3580_v43 = vld [vmem:[%s6290_s8 + $0x1a8] sm:$0xff] }
 0xa16   :  { %4360 = vmatprep.subr.bf16.mxu0 %v4359_v59 }
 0xa17   :  { %4362 = vmatpush3.bf16.msra.mxu0 %v4359_v59  ;;  %v3581_v59 = vld [vmem:[%s6290_s8 + $0x1b0] sm:$0xff] }
 0xa1a   :  { %4147 = vmatmul.mubr.msk.f32.vlgmr.msra.gmra.mrb[50].mxu0 %vm1375_vm2, %v3548_v34  ;;  %v3582_v34 = vld [vmem:[%s6290_s8 + $0x1b8] sm:$0xff] }
 0xa1b   :  { %4149 = vmatprep.mubr.msk.f32.mxu0 %vm1375_vm2, %v3549_v24  ;;  %v3583_v24 = vld [vmem:[%s6290_s8 + $0x1c0] sm:$0xff] }
 0xa1e   :  { %4150 = vmatmul.mubr.msk.f32.gmra.mrb[52].mxu0 %vm1375_vm2, %v3550_v60  ;;  %v3584_v60 = vld [vmem:[%s6290_s8 + $0x1c8] sm:$0xff] }
 0xa1f   :  { %4160 = vmatprep.mubr.msk.f32.mxu0 %vm1479_vm3, %v3555_v46  ;;  %v3585_v46 = vld [vmem:[%s6290_s8 + $0x1d0] sm:$0xff] }
 0xaed   :  { %v4148_v6 = vpop.f32.mrb[50].mxu0 }
 0xaee   :  { %4432 = vtanh.f32 %v4148_v6  ;;  %v2677_v50 = vpop.f32.mrb[51].mxu0  ;;  %v3586_v6 = vld [vmem:[%s6290_s8 + $0x1d8] sm:$0xff] }
 0xaef   :  { %4434 = vtanh.f32 %v2677_v50  ;;  %v3587_v50 = vld [vmem:[%s6290_s8 + $0x1e0] sm:$0xff] }
 0xaf1   :  { %v4151_v10 = vpop.f32.mrb[52].mxu0 }
 0xaf2   :  { %4436 = vtanh.f32 %v4151_v10  ;;  %v2687_v5 = vpop.f32.mrb[53].mxu0  ;;  %v3588_v10 = vld [vmem:[%s6290_s8 + $0x1e8] sm:$0xff] }
 0xaf3   :  { %4438 = vtanh.f32 %v2687_v5  ;;  %v3589_v5 = vld [vmem:[%s6290_s8 + $0x1f0] sm:$0xff] }
 0xaf8   :  { %v4433_v54 = vpop.eup %4432 }
 0xaf9   :  { %v4435_v38 = vpop.eup %4434 }
 0xafa   :  { %v4363_v25 = vpack.c.bf16 %v4433_v54, %v4435_v38  ;;  %v3590_v54 = vld [vmem:[%s6290_s8 + $0x1f8] sm:$0xff]  ;;  %v6120_v38 = vpop.permute.xlu1 %2938 }
 0xafc   :  { %v4437_v58 = vpop.eup %4436  ;;  %4364 = vmatprep.subr.bf16.mxu0 %v4363_v25 }
 0xafd   :  { %v4439_v35 = vpop.eup %4438  ;;  %4366 = vmatpush3.bf16.msra.mxu0 %v4363_v25  ;;  %v6122_v25 = vpop.permute.xlu0 %2933 }
 0xafe   :  { %v4367_v2 = vpack.c.bf16 %v4437_v58, %v4439_v35  ;;  %v3365_v58 = vld [vmem:[%s6291_s9 + $0x8] sm:$0xff]  ;;  %v2859_v35 = vpop.permute.xlu1 %2858 }
 0xb00   :  { %4368 = vmatprep.subr.bf16.mxu0 %v4367_v2 }
 0xb01   :  { %4370 = vmatpush3.bf16.msra.mxu0 %v4367_v2  ;;  %v2854_v2 = vpop.permute.xlu0 %2853 }
 0xb04   :  { %4161 = vmatmul.mubr.msk.f32.vlgmr.msra.gmra.mrb[54].mxu0 %vm1479_vm3, %v3556_v63  ;;  %v6127_v63 = vpop.permute.xlu1 %2948 }
 0xb05   :  { %3430 = vmatprep.mubr.f32.mxu0 %v3365_v58  ;;  %v6129_v40 = vpop.permute.xlu0 %2943 }
 0xbd7   :  { %v4162_v47 = vpop.f32.mrb[54].mxu0 }
 0xbd8   :  { %4440 = vtanh.f32 %v4162_v47  ;;  %v2775_v36 = vpop.f32.mrb[55].mxu0  ;;  %v2869_v47 = vpop.permute.xlu1 %2868 }
 0xbd9   :  { %4442 = vtanh.f32 %v2775_v36  ;;  %v2864_v36 = vpop.permute.xlu0 %2863 }
 0xbe2   :  { %v4441_v4 = vpop.eup %4440 }
 0xbe3   :  { %v4443_v15 = vpop.eup %4442 }
 0xbe4   :  { %v4371_v48 = vpack.c.bf16 %v4441_v4, %v4443_v15  ;;  %v6131_v4 = vpop.permute.xlu1 %2958  ;;  %v6133_v15 = vpop.permute.xlu0 %2953 }
 0xbe6   :  { %4372 = vmatprep.subr.bf16.mxu1 %v4371_v48 }
 0xbe7   :  { %4374 = vmatpush3.bf16.msra.mxu1 %v4371_v48 }
 0xbe8   :  { %v2879_v48 = vpop.permute.xlu1 %2878 }
 0xbea   :  { %4168 = vmatmul.mubr.msk.f32.vlgmr.msra.gmra.mrb[64].mxu1 %vm1375_vm2, %v3560_v61  ;;  %v2874_v61 = vpop.permute.xlu0 %2873 }
 0xbeb   :  { %4170 = vmatprep.mubr.msk.f32.mxu1 %vm1375_vm2, %v3561_v37 }
 0xbec   :  { %v6135_v37 = vpop.permute.xlu1 %2968 }
 0xbee   :  { %4171 = vmatmul.mubr.msk.f32.gmra.mrb[66].mxu1 %vm1375_vm2, %v3562_v28  ;;  %v6137_v28 = vpop.permute.xlu0 %2963 }
 0xbef   :  { %4173 = vmatprep.mubr.msk.f32.mxu1 %vm1375_vm2, %v3563_v13 }
 0xbf0   :  { %v2889_v13 = vpop.permute.xlu1 %2888 }
 0xbf2   :  { %4174 = vmatmul.mubr.msk.f32.gmra.mrb[68].mxu1 %vm1375_vm2, %v3564_v52  ;;  %v2884_v52 = vpop.permute.xlu0 %2883 }
 0xbf3   :  { %4176 = vmatprep.mubr.msk.f32.mxu1 %vm1375_vm2, %v3565_v7 }
 0xbf4   :  { %v6139_v7 = vpop.permute.xlu1 %2978 }
 0xbf6   :  { %4177 = vmatmul.mubr.msk.f32.gmra.mrb[70].mxu1 %vm1375_vm2, %v3566_v8  ;;  %v6141_v8 = vpop.permute.xlu0 %2973 }
 0xbf7   :  { %4179 = vmatprep.mubr.msk.f32.mxu1 %vm1375_vm2, %v3567_v41 }
 0xbf8   :  { %v2899_v41 = vpop.permute.xlu1 %2898 }
 0xbfa   :  { %4180 = vmatmul.mubr.msk.f32.gmra.mrb[72].mxu1 %vm1375_vm2, %v3568_v21  ;;  %v2894_v21 = vpop.permute.xlu0 %2893 }
 0xbfb   :  { %4182 = vmatprep.mubr.msk.f32.mxu1 %vm1375_vm2, %v3569_v20 }
 0xbfc   :  { %v6143_v20 = vpop.permute.xlu1 %2988 }
 0xbfe   :  { %4183 = vmatmul.mubr.msk.f32.gmra.mrb[74].mxu1 %vm1375_vm2, %v3570_v57  ;;  %v6145_v57 = vpop.permute.xlu0 %2983 }
 0xbff   :  { %4185 = vmatprep.mubr.msk.f32.mxu1 %vm1375_vm2, %v3571_v17 }
 0xc02   :  { %4186 = vmatmul.mubr.msk.f32.gmra.mrb[76].mxu1 %vm1375_vm2, %v3572_v14 }
 0xc03   :  { %4188 = vmatprep.mubr.msk.f32.mxu1 %vm1375_vm2, %v3573_v16 }
 0xc06   :  { %4189 = vmatmul.mubr.msk.f32.gmra.mrb[78].mxu1 %vm1375_vm2, %v3574_v26 }
 0xc07   :  { %4191 = vmatprep.mubr.msk.f32.mxu1 %vm1375_vm2, %v3575_v49 }
 0xc0a   :  { %4192 = vmatmul.mubr.msk.f32.gmra.mrb[80].mxu1 %vm1375_vm2, %v3576_v1  ;;  %v2909_v1 = vpop.permute.xlu1 %2908 }
 0xc0b   :  { %4194 = vmatprep.mubr.msk.f32.mxu1 %vm1375_vm2, %v3577_v39 }
 0xc0e   :  { %4195 = vmatmul.mubr.msk.f32.gmra.mrb[82].mxu1 %vm1375_vm2, %v3578_v53 }
 0xc0f   :  { %4197 = vmatprep.mubr.msk.f32.mxu1 %vm1375_vm2, %v3579_v29  ;;  %v2904_v29 = vpop.permute.xlu0 %2903 }
 0xc12   :  { %4198 = vmatmul.mubr.msk.f32.gmra.mrb[84].mxu1 %vm1375_vm2, %v3580_v43 }
 0xc13   :  { %4200 = vmatprep.mubr.msk.f32.mxu1 %vm1375_vm2, %v3581_v59 }
 0xc16   :  { %4201 = vmatmul.mubr.msk.f32.gmra.mrb[86].mxu1 %vm1375_vm2, %v3582_v34 }
 0xc17   :  { %4203 = vmatprep.mubr.msk.f32.mxu1 %vm1375_vm2, %v3583_v24 }
 0xc1a   :  { %4204 = vmatmul.mubr.msk.f32.gmra.mrb[88].mxu1 %vm1375_vm2, %v3584_v60 }
 0xc1b   :  { %4206 = vmatprep.mubr.msk.f32.mxu1 %vm1375_vm2, %v3585_v46 }
 0xc1e   :  { %4207 = vmatmul.mubr.msk.f32.gmra.mrb[90].mxu1 %vm1375_vm2, %v3586_v6 }
 0xc1f   :  { %4209 = vmatprep.mubr.msk.f32.mxu1 %vm1375_vm2, %v3587_v50 }
 0xc22   :  { %4210 = vmatmul.mubr.msk.f32.gmra.mrb[92].mxu1 %vm1375_vm2, %v3588_v10  ;;  %v6161_v10 = vpop.permute.xlu1 %2998 }
 0xc23   :  { %4212 = vmatprep.mubr.msk.f32.mxu1 %vm1375_vm2, %v3589_v5 }
 0xc26   :  { %4213 = vmatmul.mubr.msk.f32.gmra.mrb[94].mxu1 %vm1375_vm2, %v3590_v54  ;;  %v6165_v54 = vpop.permute.xlu0 %2993 }
 0xcbd   :  { %v4169_v17 = vpop.f32.mrb[64].mxu1 }
 0xcbe   :  { %v3179_v14 = vadd.f32 %v4169_v17, %v2859_v35  ;;  %v3173_v16 = vpop.f32.mrb[65].mxu1  ;;  %v2919_v17 = vpop.permute.xlu1 %2918 }
 0xcbf   :  { %v3174_v26 = vadd.f32 %v3173_v16, %v2854_v2 }
 0xcc0   :  { %v6148_v49 = vadd.f32 %v3179_v14, %v5746_v44 }
 0xcc1   :  { %v6151_v39 = vadd.f32 %v3174_v26, %v5749_v27  ;;  %v4172_v53 = vpop.f32.mrb[66].mxu1 }
 0xcc2   :  { %v3189_v43 = vadd.f32 %v4172_v53, %v2869_v47  ;;  %v3183_v59 = vpop.f32.mrb[67].mxu1 }
 0xcc3   :  { %v4377_v34 = vpack.c.bf16 %v6148_v49, %v6151_v39  ;;  %v3184_v24 = vadd.f32 %v3183_v59, %v2864_v36  ;;  %v6388_v39 = vld [vmem:[#allocation23_spill] sm:$0xff] }
 0xcc4   :  { %v6156_v60 = vadd.f32 %v3189_v43, %v5764_v22 }
 0xcc5   :  { %v6159_v46 = vadd.f32 %v3184_v24, %v5767_v32  ;;  %v4175_v44 = vpop.f32.mrb[68].mxu1  ;;  %v6189_v24 = vpop.permute.xlu1 %3008 }
 0xcc6   :  { %v3199_v6 = vadd.f32 %v4175_v44, %v2879_v48  ;;  %v3193_v50 = vpop.f32.mrb[69].mxu1 }
 0xcc7   :  { %v4381_v27 = vpack.c.bf16 %v6156_v60, %v6159_v46  ;;  %v3194_v5 = vadd.f32 %v3193_v50, %v2874_v61  ;;  %v6390_v46 = vld [vmem:[#allocation11_spill] sm:$0xff] }
 0xcc8   :  { %v6168_v58 = vadd.f32 %v3199_v6, %v5778_v30  ;;  %v2914_v30 = vpop.permute.xlu0 %2913 }
 0xcc9   :  { %v6171_v22 = vadd.f32 %v3194_v5, %v5781_v12  ;;  %v4178_v35 = vpop.f32.mrb[70].mxu1 }
 0xcca   :  { %v3209_v32 = vadd.f32 %v4178_v35, %v2889_v13  ;;  %v3203_v2 = vpop.f32.mrb[71].mxu1 }
 0xccb   :  { %v4385_v47 = vpack.c.bf16 %v6168_v58, %v6171_v22  ;;  %v3204_v36 = vadd.f32 %v3203_v2, %v2884_v52  ;;  %v6392_v22 = vld [vmem:[#allocation13_spill] sm:$0xff] }
 0xccc   :  { %v6176_v48 = vadd.f32 %v3209_v32, %v5798_v51  ;;  %v6193_v44 = vpop.permute.xlu0 %3003  ;;  %v2929_v32 = vpop.permute.xlu1 %2928 }
 0xccd   :  { %v6179_v61 = vadd.f32 %v3204_v36, %v5804_v11  ;;  %v4181_v14 = vpop.f32.mrb[72].mxu1 }
 0xcce   :  { %v3219_v16 = vadd.f32 %v4181_v14, %v2899_v41  ;;  %v3213_v26 = vpop.f32.mrb[73].mxu1 }
 0xccf   :  { %v4389_v12 = vpack.c.bf16 %v6176_v48, %v6179_v61  ;;  %v3214_v13 = vadd.f32 %v3213_v26, %v2894_v21  ;;  %v6394_v61 = vld [vmem:[#allocation14_spill] sm:$0xff] }
 0xcd0   :  { %v6184_v53 = vadd.f32 %v3219_v16, %v5824_v18 }
 0xcd1   :  { %v6187_v52 = vadd.f32 %v3214_v13, %v5827_v19  ;;  %v4184_v51 = vpop.f32.mrb[74].mxu1 }
 0xcd2   :  { %v3229_v43 = vadd.f32 %v4184_v51, %v2909_v1  ;;  %v3223_v59 = vpop.f32.mrb[75].mxu1 }
 0xcd3   :  { %v4393_v11 = vpack.c.bf16 %v6184_v53, %v6187_v52  ;;  %v3224_v41 = vadd.f32 %v3223_v59, %v2904_v29  ;;  %v6396_v52 = vld [vmem:[#allocation9_spill] sm:$0xff] }
 0xcd4   :  { %v6196_v6 = vadd.f32 %v3229_v43, %v5836_v45  ;;  %v2924_v45 = vpop.permute.xlu0 %2923 }
 0xcd5   :  { %v6199_v18 = vadd.f32 %v3224_v41, %v5840_v3  ;;  %v4187_v21 = vpop.f32.mrb[76].mxu1 }
 0xcd6   :  { %v3239_v19 = vadd.f32 %v4187_v21, %v2919_v17  ;;  %v3233_v50 = vpop.f32.mrb[77].mxu1 }
 0xcd7   :  { %v4397_v1 = vpack.c.bf16 %v6196_v6, %v6199_v18  ;;  %v3234_v5 = vadd.f32 %v3233_v50, %v2914_v30 }
 0xcd8   :  { %v6204_v35 = vadd.f32 %v3239_v19, %v5859_v56 }
 0xcd9   :  { %v6207_v29 = vadd.f32 %v3234_v5, %v5865_v62  ;;  %v4190_v2 = vpop.f32.mrb[78].mxu1 }
 0xcda   :  { %v3249_v36 = vadd.f32 %v4190_v2, %v2929_v32  ;;  %v3243_v14 = vpop.f32.mrb[79].mxu1 }
 0xcdb   :  { %v4401_v3 = vpack.c.bf16 %v6204_v35, %v6207_v29  ;;  %v3244_v17 = vadd.f32 %v3243_v14, %v2924_v45 }
 0xcdc   :  { %v6212_v16 = vadd.f32 %v3249_v36, %v5880_v33 }
 0xcdd   :  { %v6215_v30 = vadd.f32 %v3244_v17, %v5883_v0  ;;  %v4193_v56 = vpop.f32.mrb[80].mxu1 }
 0xcde   :  { %v3259_v26 = vadd.f32 %v4193_v56, %v6120_v38  ;;  %v3253_v13 = vpop.f32.mrb[81].mxu1 }
 0xcdf   :  { %v4405_v62 = vpack.c.bf16 %v6212_v16, %v6215_v30  ;;  %v3254_v51 = vadd.f32 %v3253_v13, %v6122_v25 }
 0xce0   :  { %v3349_v43 = vadd.f32 %v3259_v26, %v5752_v31 }
 0xce1   :  { %v3348_v59 = vadd.f32 %v3254_v51, %v5755_v23  ;;  %v4196_v41 = vpop.f32.mrb[82].mxu1 }
 0xce2   :  { %v3269_v33 = vadd.f32 %v4196_v41, %v6127_v63  ;;  %v3263_v21 = vpop.f32.mrb[83].mxu1 }
 0xce3   :  { %v3264_v0 = vadd.f32 %v3263_v21, %v6129_v40  ;;  %v4375_v19 = vpack.c.bf16 %v3349_v43, %v3348_v59  ;;  %v6387_v40 = vld [vmem:[#allocation22_spill] sm:$0xff] }
 0xce4   :  { %v3351_v50 = vadd.f32 %v3269_v33, %v5770_v55 }
 0xce5   :  { %v3350_v38 = vadd.f32 %v3264_v0, %v5775_v9  ;;  %v4199_v5 = vpop.f32.mrb[84].mxu1  ;;  %4376 = vmatprep.subr.bf16.mxu0 %v4375_v19 }
 0xce6   :  { %v3279_v32 = vadd.f32 %v4199_v5, %v6131_v4  ;;  %v3273_v25 = vpop.f32.mrb[85].mxu1  ;;  %4378 = vmatpush3.bf16.msra.mxu0 %v4377_v34 }
 0xce7   :  { %v3274_v31 = vadd.f32 %v3273_v25, %v6133_v15  ;;  %v4379_v23 = vpack.c.bf16 %v3351_v50, %v3350_v38  ;;  %v6389_v15 = vld [vmem:[#allocation24_spill] sm:$0xff] }
 0xce8   :  { %v3353_v63 = vadd.f32 %v3279_v32, %v5789_v42 }
 0xce9   :  { %v3352_v2 = vadd.f32 %v3274_v31, %v6387_v40  ;;  %v4202_v45 = vpop.f32.mrb[86].mxu1  ;;  %4380 = vmatprep.subr.bf16.mxu0 %v4379_v23 }
 0xcea   :  { %v3289_v55 = vadd.f32 %v4202_v45, %v6135_v37  ;;  %v3283_v9 = vpop.f32.mrb[87].mxu1  ;;  %4382 = vmatpush3.bf16.msra.mxu0 %v4381_v27 }
 0xceb   :  { %v3284_v4 = vadd.f32 %v3283_v9, %v6137_v28  ;;  %v4383_v49 = vpack.c.bf16 %v3353_v63, %v3352_v2  ;;  %v6391_v28 = vld [vmem:[#allocation12_spill] sm:$0xff] }
 0xcec   :  { %v3355_v34 = vadd.f32 %v3289_v55, %v6388_v39 }
 0xced   :  { %v3354_v36 = vadd.f32 %v3284_v4, %v6389_v15  ;;  %v4205_v14 = vpop.f32.mrb[88].mxu1  ;;  %4384 = vmatprep.subr.bf16.mxu0 %v4383_v49 }
 0xcee   :  { %v3299_v42 = vadd.f32 %v4205_v14, %v6139_v7  ;;  %v3293_v17 = vpop.f32.mrb[89].mxu1  ;;  %4386 = vmatpush3.bf16.msra.mxu0 %v4385_v47 }
 0xcef   :  { %v3294_v37 = vadd.f32 %v3293_v17, %v6141_v8  ;;  %v4387_v60 = vpack.c.bf16 %v3355_v34, %v3354_v36  ;;  %v6393_v8 = vld [vmem:[#allocation10_spill] sm:$0xff] }
 0xcf0   :  { %v3357_v27 = vadd.f32 %v3299_v42, %v6390_v46 }
 0xcf1   :  { %v3356_v56 = vadd.f32 %v3294_v37, %v6391_v28  ;;  %v4208_v26 = vpop.f32.mrb[90].mxu1  ;;  %4388 = vmatprep.subr.bf16.mxu0 %v4387_v60 }
 0xcf2   :  { %v3309_v13 = vadd.f32 %v4208_v26, %v6143_v20  ;;  %v3303_v51 = vpop.f32.mrb[91].mxu1  ;;  %4390 = vmatpush3.bf16.msra.mxu0 %v4389_v12 }
 0xcf3   :  { %v3304_v7 = vadd.f32 %v3303_v51, %v6145_v57  ;;  %v4391_v58 = vpack.c.bf16 %v3357_v27, %v3356_v56  ;;  %v6395_v57 = vld [vmem:[#allocation7_spill] sm:$0xff] }
 0xcf4   :  { %v3359_v47 = vadd.f32 %v3309_v13, %v6392_v22 }
 0xcf5   :  { %v3358_v43 = vadd.f32 %v3304_v7, %v6393_v8  ;;  %v4211_v59 = vpop.f32.mrb[92].mxu1  ;;  %4392 = vmatprep.subr.bf16.mxu0 %v4391_v58 }
 0xcf6   :  { %v3319_v41 = vadd.f32 %v4211_v59, %v6161_v10  ;;  %v3313_v33 = vpop.f32.mrb[93].mxu1  ;;  %4394 = vmatpush3.bf16.msra.mxu0 %v4393_v11 }
 0xcf7   :  { %v3314_v20 = vadd.f32 %v3313_v33, %v6165_v54  ;;  %v4395_v48 = vpack.c.bf16 %v3359_v47, %v3358_v43  ;;  %v6397_v54 = vld [vmem:[#allocation6_spill] sm:$0xff] }
 0xcf8   :  { %v3361_v12 = vadd.f32 %v3319_v41, %v6394_v61 }
 0xcf9   :  { %v3360_v21 = vadd.f32 %v3314_v20, %v6395_v57  ;;  %v4214_v0 = vpop.f32.mrb[94].mxu1  ;;  %4396 = vmatprep.subr.bf16.mxu0 %v4395_v48 }
 0xcfa   :  { %v3329_v19 = vadd.f32 %v4214_v0, %v6189_v24  ;;  %v3323_v50 = vpop.f32.mrb[95].mxu1  ;;  %4398 = vmatpush3.bf16.msra.mxu0 %v4397_v1  ;;  %v3364_v24 = vld [vmem:[%s6291_s9] sm:$0xff] }
 0xcfb   :  { %v3324_v10 = vadd.f32 %v3323_v50, %v6193_v44  ;;  %v4399_v53 = vpack.c.bf16 %v3361_v12, %v3360_v21 }
 0xcfc   :  { %v3363_v11 = vadd.f32 %v3329_v19, %v6396_v52 }
 0xcfd   :  { %v3362_v38 = vadd.f32 %v3324_v10, %v6397_v54  ;;  %4400 = vmatprep.subr.bf16.mxu0 %v4399_v53 }
 0xcfe   :  { %4402 = vmatpush3.bf16.msra.mxu0 %v4401_v3 }
 0xcff   :  { %v4403_v5 = vpack.c.bf16 %v3363_v11, %v3362_v38 }
 0xd01   :  { %4404 = vmatprep.subr.bf16.mxu0 %v4403_v5 }
 0xd02   :  { %4406 = vmatpush3.bf16.msra.mxu0 %v4405_v62 }
 0xd05   :  { %3431 = vmatmul.mubr.f32.vlgmr.msra.gmra.mrb[56].mxu0 %v3364_v24 }
 0xdd8   :  { %v3936_v44 = vpop.f32.mrb[56].mxu0 }
 0xdd9   :  { %v3937_v6 = vpop.f32.mrb[57].mxu0 }
 0xdda   :  { %v3938_v18 = vadd.f32 %v3937_v6, %v3936_v44 }
 0xddc   :  { %v3623_v1 = vmul.f32 -1.442695, %v3938_v18 }
 0xdde   :  { %4444 = vpow2.f32 %v3623_v1 }
 0xde8   :  { %v4445_v32 = vpop.eup %4444 }
 0xde9   :  { %v3439_v25 = vadd.f32 1.0, %v4445_v32 }
 0xdeb   :  { %4446 = vrcp.f32 %v3439_v25 }
 0xdf5   :  { %v4447_v35 = vpop.eup %4446 }
 0xdf6   :  { %3442 = vst.msk [vmem:[%s6292_s10] sm:$0xff] %vm197_vm1, %v4447_v35 }

</bundles_post_ra>
